<compile_context>
chip_gen: v6e
topology: v6e:2x2x1
jax: 0.10.0
libtpu: 0.0.40
codegen_flags: <defaults>
</compile_context>

<pallas_src>
import functools

import jax
import jax.numpy as jnp
from jax.experimental import pallas as pl
from jax.experimental.pallas import tpu as pltpu


def _round_up(x, m):
    return ((x + m - 1) // m) * m


def _pad_gates_cols(w, hidden, hidden_pad):
    """(K, 3*hidden) -> (K, 3*hidden_pad), zero-padding each gate block [r|z|n]."""
    k = w.shape[0]
    w3 = w.reshape(k, 3, hidden)
    w3 = jnp.pad(w3, ((0, 0), (0, 0), (0, hidden_pad - hidden)))
    return w3.reshape(k, 3 * hidden_pad)


# --------------------------------------------------------------------------- #
# Phase 1: input projection for every timestep (embarrassingly parallel).
# --------------------------------------------------------------------------- #
def _input_proj_kernel(x_ref, w_ref, b_ref, gi_ref, *, matmul_dtype):
    x = x_ref[...].astype(matmul_dtype)                 # (bm, I)
    gi = jnp.dot(x, w_ref[...], preferred_element_type=jnp.float32)
    gi_ref[...] = (gi + b_ref[...]).astype(gi_ref.dtype)  # b_ih folded in here


# --------------------------------------------------------------------------- #
# Phase 2: the time recurrence (serial), chunked over time.
# --------------------------------------------------------------------------- #
def _gru_recurrence_kernel(gi_ref, h0_ref, whh_ref, bhh_ref, out_ref, h_scratch,
                           *, hidden_pad, chunk_t, seq_len, mask_tail):
    t_idx = pl.program_id(1)
    Hp = hidden_pad

    # Load the initial hidden state into the resident accumulator at the first
    # time chunk of every batch block.
    @pl.when(t_idx == 0)
    def _():
        h_scratch[...] = h0_ref[...].astype(jnp.float32)

    h = h_scratch[...]                                   # (Bc, Hp) f32
    mm_dtype = whh_ref.dtype

    # Fully-unrolled serial loop over the Tc timesteps of this chunk
    # (static trip count => static indices; same codegen as fori_loop unroll=True).
    for s in range(chunk_t):
        gi_t = gi_ref[:, s, :]                           # (Bc, 3Hp) precomputed
        gh = jnp.dot(h.astype(mm_dtype), whh_ref[...],
                     preferred_element_type=jnp.float32) + bhh_ref[...]
        r = jax.nn.sigmoid(gi_t[:, 0:Hp] + gh[:, 0:Hp])
        z = jax.nn.sigmoid(gi_t[:, Hp:2 * Hp] + gh[:, Hp:2 * Hp])
        n = jnp.tanh(gi_t[:, 2 * Hp:3 * Hp] + r * gh[:, 2 * Hp:3 * Hp])
        h_new = (1.0 - z) * n + z * h
        if mask_tail:  # only traced when T was padded up to a chunk multiple
            valid = (t_idx * chunk_t + s) < seq_len
            h_new = jnp.where(valid, h_new, h)
        h = h_new

    h_scratch[...] = h

    @pl.when(t_idx == pl.num_programs(1) - 1)
    def _():
        out_ref[...] = h.astype(out_ref.dtype)


# --------------------------------------------------------------------------- #
# Wrapper
# --------------------------------------------------------------------------- #
def gru_user_encoder(h, h0, w_ih, w_hh, b_ih, b_hh, *,
                     matmul_dtype=jnp.bfloat16, time_chunk=32, batch_block=128):
    """Pallas GRU forward.

    h    : (B, T, I)  batch_first input sequence
    h0   : (B, H)     initial hidden state
    w_ih : (3H, I), w_hh : (3H, H), b_ih : (3H,), b_hh : (3H,)
    returns hn : (B, H)  -- final hidden state (== PyTorch hn.squeeze(0))
    """
    B, T, I = h.shape
    H = h0.shape[-1]
    if T == 0:
        return h0.astype(h.dtype)

    f32 = jnp.float32
    Hp = _round_up(H, 128)                 # lane-dense per-gate hidden size
    Bp = _round_up(B, 8)                   # sublane-aligned batch
    Bc = min(Bp, batch_block)
    if Bp % Bc:
        Bp = _round_up(Bp, Bc)
    Tc = min(_round_up(T, 8), time_chunk)  # timesteps per grid step (mult of 8)
    Tp = _round_up(T, Tc)

    # ---- one-time parameter staging (off the serial path) ------------------ #
    wih_t = _pad_gates_cols(jnp.transpose(w_ih, (1, 0)), H, Hp).astype(matmul_dtype)
    whh_t = _pad_gates_cols(jnp.transpose(w_hh, (1, 0)), H, Hp)
    whh_t = jnp.pad(whh_t, ((0, Hp - H), (0, 0))).astype(matmul_dtype)   # (Hp, 3Hp)
    bih = _pad_gates_cols(b_ih.astype(f32).reshape(1, 3 * H), H, Hp)     # (1, 3Hp)
    bhh = _pad_gates_cols(b_hh.astype(f32).reshape(1, 3 * H), H, Hp)     # (1, 3Hp)

    # Zero-pad activations to aligned shapes (at production scale, batch more
    # users into the call instead of padding).
    x_p = jnp.pad(h, ((0, Bp - B), (0, Tp - T), (0, 0)))                 # (Bp, Tp, I)
    h0_p = jnp.pad(h0.astype(f32), ((0, Bp - B), (0, Hp - H)))           # (Bp, Hp)

    # ---- phase 1: gi = x @ W_ih^T + b_ih for all timesteps ------------------ #
    M = Bp * Tp
    bm = M if M <= 512 else 512
    x_flat = x_p.reshape(M, I)                                           # free reshape
    gi_flat = pl.pallas_call(
        functools.partial(_input_proj_kernel, matmul_dtype=matmul_dtype),
        out_shape=jax.ShapeDtypeStruct((M, 3 * Hp), f32),
        grid_spec=pltpu.PrefetchScalarGridSpec(
            num_scalar_prefetch=0,
            grid=(pl.cdiv(M, bm),),
            in_specs=[
                pl.BlockSpec((bm, I), lambda m: (m, 0)),
                pl.BlockSpec((I, 3 * Hp), lambda m: (0, 0)),
                pl.BlockSpec((1, 3 * Hp), lambda m: (0, 0)),
            ],
            out_specs=pl.BlockSpec((bm, 3 * Hp), lambda m: (m, 0)),
        ),
        compiler_params=pltpu.CompilerParams(
            dimension_semantics=("parallel",),
            vmem_limit_bytes=32 * 1024 * 1024,
        ),
    )(x_flat, wih_t, bih)
    gi = gi_flat.reshape(Bp, Tp, 3 * Hp)                                 # free reshape

    # ---- phase 2: serial recurrence ----------------------------------------- #
    kernel = functools.partial(
        _gru_recurrence_kernel, hidden_pad=Hp, chunk_t=Tc, seq_len=T,
        mask_tail=(Tp != T))
    out_p = pl.pallas_call(
        kernel,
        out_shape=jax.ShapeDtypeStruct((Bp, Hp), f32),
        grid_spec=pltpu.PrefetchScalarGridSpec(
            num_scalar_prefetch=0,
            grid=(Bp // Bc, Tp // Tc),            # recurrent (time) axis last
            in_specs=[
                pl.BlockSpec((Bc, Tc, 3 * Hp), lambda b, t: (b, t, 0)),   # gi
                pl.BlockSpec((Bc, Hp), lambda b, t: (b, 0)),              # h0
                pl.BlockSpec((Hp, 3 * Hp), lambda b, t: (0, 0)),          # W_hh^T
                pl.BlockSpec((1, 3 * Hp), lambda b, t: (0, 0)),           # b_hh
            ],
            out_specs=pl.BlockSpec((Bc, Hp), lambda b, t: (b, 0)),
            scratch_shapes=[pltpu.VMEM((Bc, Hp), jnp.float32)],
        ),
        compiler_params=pltpu.CompilerParams(
            # batch blocks can split across TensorCores (v7x); time is serial.
            dimension_semantics=("parallel", "arbitrary"),
            vmem_limit_bytes=32 * 1024 * 1024,
        ),
    )(gi, h0_p, whh_t, bhh)

    return out_p[:B, :H].astype(h.dtype)


# --------------------------------------------------------------------------- #
# Pure-JAX reference (PyTorch nn.GRU semantics) for correctness checking.
# --------------------------------------------------------------------------- #
def gru_reference(h, h0, w_ih, w_hh, b_ih, b_hh):
    H = h0.shape[-1]

    def step(h_prev, x_t):
        gi = x_t @ w_ih.T + b_ih
        gh = h_prev @ w_hh.T + b_hh
        i_r, i_z, i_n = gi[:, :H], gi[:, H:2 * H], gi[:, 2 * H:]
        h_r, h_z, h_n = gh[:, :H], gh[:, H:2 * H], gh[:, 2 * H:]
        r = jax.nn.sigmoid(i_r + h_r)
        z = jax.nn.sigmoid(i_z + h_z)
        n = jnp.tanh(i_n + r * h_n)
        h_new = (1.0 - z) * n + z * h_prev
        return h_new, h_new

    hn, _ = jax.lax.scan(step, h0, jnp.transpose(h, (1, 0, 2)))
    return hn


if __name__ == "__main__":
    B, T, I, H = 2, 8, 32, 32

    key = jax.random.PRNGKey(0)
    k_x, k_h0, k_wih, k_whh, k_bih, k_bhh = jax.random.split(key, 6)

    bound = 1.0 / (H ** 0.5)  # nn.GRU init: U(-1/sqrt(H), 1/sqrt(H))
    w_ih = jax.random.uniform(k_wih, (3 * H, I), jnp.float32, -bound, bound)
    w_hh = jax.random.uniform(k_whh, (3 * H, H), jnp.float32, -bound, bound)
    b_ih = jax.random.uniform(k_bih, (3 * H,), jnp.float32, -bound, bound)
    b_hh = jax.random.uniform(k_bhh, (3 * H,), jnp.float32, -bound, bound)

    x = jax.random.normal(k_x, (B, T, I), jnp.float32)
    # The PyTorch module draws h0 ~ randn each forward; we pass it as an
    # explicit deterministic input instead.
    h0 = jax.random.normal(k_h0, (B, H), jnp.float32)

    hn_ref = gru_reference(x, h0, w_ih, w_hh, b_ih, b_hh)

    # Exactness check with f32 MXU operands.
    gru_f32 = jax.jit(functools.partial(gru_user_encoder, matmul_dtype=jnp.float32))
    hn_f32 = jax.block_until_ready(gru_f32(x, h0, w_ih, w_hh, b_ih, b_hh))
    assert hn_f32.shape == (B, H)
    assert jnp.allclose(hn_f32, hn_ref, atol=1e-4, rtol=1e-4)

    # Default (bf16 MXU operands, f32 gate math / accumulator) path.
    gru_bf16 = jax.jit(functools.partial(gru_user_encoder, matmul_dtype=jnp.bfloat16))
    hn = jax.block_until_ready(gru_bf16(x, h0, w_ih, w_hh, b_ih, b_hh))
    assert hn.shape == (B, H)
    assert jnp.allclose(hn, hn_ref, atol=5e-2, rtol=5e-2)

    print("KERNEL_OK")
</pallas_src>

<mosaic_0001>
module attributes {stable_mosaic.version = 11 : i64} {
  func.func @_input_proj_kernel(%arg0: i32, %arg1: memref<64x32xf32, #tpu.memory_space<vmem>>, %arg2: memref<32x384xf32, #tpu.memory_space<vmem>>, %arg3: memref<1x384xf32, #tpu.memory_space<vmem>>, %arg4: memref<64x384xf32, #tpu.memory_space<vmem>>) attributes {dimension_semantics = [#tpu.dimension_semantics<parallel>], iteration_bounds = array<i64: 1>, scalar_prefetch = 0 : i64, scratch_operands = 0 : i64, tpu.core_type = #tpu.core_type<tc>, window_params = [{transform_indices = @transform_0, window_bounds = array<i64: 64, 32>}, {pipeline_mode = #tpu.pipeline_mode<synchronous>, transform_indices = @transform_1, window_bounds = array<i64: 32, 384>}, {pipeline_mode = #tpu.pipeline_mode<synchronous>, transform_indices = @transform_2, window_bounds = array<i64: 1, 384>}, {transform_indices = @transform_3, window_bounds = array<i64: 64, 384>}]} {
    %c0 = arith.constant 0 : index
    %c0_0 = arith.constant 0 : index
    %0 = vector.load %arg1[%c0, %c0_0] : memref<64x32xf32, #tpu.memory_space<vmem>>, vector<64x32xf32>
    %c0_1 = arith.constant 0 : index
    %c0_2 = arith.constant 0 : index
    %1 = vector.load %arg2[%c0_1, %c0_2] : memref<32x384xf32, #tpu.memory_space<vmem>>, vector<32x384xf32>
    %cst = arith.constant dense<0.000000e+00> : vector<64x384xf32>
    %2 = tpu.matmul %0, %1, %cst {dimension_numbers = #tpu.dot_dimension_numbers<[1], [0], [0], [1], [0, 0, 1, 1], [], []>} : vector<64x32xf32>, vector<32x384xf32>, vector<64x384xf32> -> vector<64x384xf32>
    %c0_3 = arith.constant 0 : index
    %c0_4 = arith.constant 0 : index
    %3 = vector.load %arg3[%c0_3, %c0_4] : memref<1x384xf32, #tpu.memory_space<vmem>>, vector<1x384xf32>
    %4 = vector.broadcast %3 : vector<1x384xf32> to vector<64x384xf32>
    %5 = arith.addf %2, %4 : vector<64x384xf32>
    %c0_5 = arith.constant 0 : index
    %c0_6 = arith.constant 0 : index
    %6 = vector.load %arg4[%c0_5, %c0_6] : memref<64x384xf32, #tpu.memory_space<vmem>>, vector<64x384xf32>
    tpu.vector_store %arg4[%c0_5, %c0_6], %5 {strides = array<i32>} : memref<64x384xf32, #tpu.memory_space<vmem>>, vector<64x384xf32>,
    return
  }
  func.func @transform_0(%arg0: i32) -> (i32, i32) {
    %c0_i32 = arith.constant 0 : i32
    %c0_i32_0 = arith.constant 0 : i32
    return %arg0, %c0_i32 : i32, i32
  }
  func.func @transform_1(%arg0: i32) -> (i32, i32) {
    %c0_i32 = arith.constant 0 : i32
    %c0_i32_0 = arith.constant 0 : i32
    %c0_i32_1 = arith.constant 0 : i32
    return %c0_i32, %c0_i32_0 : i32, i32
  }
  func.func @transform_2(%arg0: i32) -> (i32, i32) {
    %c0_i32 = arith.constant 0 : i32
    %c0_i32_0 = arith.constant 0 : i32
    %c0_i32_1 = arith.constant 0 : i32
    return %c0_i32, %c0_i32_0 : i32, i32
  }
  func.func @transform_3(%arg0: i32) -> (i32, i32) {
    %c0_i32 = arith.constant 0 : i32
    %c0_i32_0 = arith.constant 0 : i32
    return %arg0, %c0_i32 : i32, i32
  }
}

module attributes {stable_mosaic.version = 11 : i64} {
  func.func @_gru_recurrence_kernel(%arg0: i32, %arg1: i32, %arg2: memref<8x8x384xf32, #tpu.memory_space<vmem>>, %arg3: memref<8x128xf32, #tpu.memory_space<vmem>>, %arg4: memref<128x384xf32, #tpu.memory_space<vmem>>, %arg5: memref<1x384xf32, #tpu.memory_space<vmem>>, %arg6: memref<8x128xf32, #tpu.memory_space<vmem>>, %arg7: memref<8x128xf32, #tpu.memory_space<vmem>>) attributes {dimension_semantics = [#tpu.dimension_semantics<parallel>, #tpu.dimension_semantics<arbitrary>], iteration_bounds = array<i64: 1, 1>, scalar_prefetch = 0 : i64, scratch_operands = 1 : i64, tpu.core_type = #tpu.core_type<tc>, window_params = [{transform_indices = @transform_0, window_bounds = array<i64: 8, 8, 384>}, {transform_indices = @transform_1, window_bounds = array<i64: 8, 128>}, {pipeline_mode = #tpu.pipeline_mode<synchronous>, transform_indices = @transform_2, window_bounds = array<i64: 128, 384>}, {pipeline_mode = #tpu.pipeline_mode<synchronous>, transform_indices = @transform_3, window_bounds = array<i64: 1, 384>}, {transform_indices = @transform_4, window_bounds = array<i64: 8, 128>}]} {
    %c0_i32 = arith.constant 0 : i32
    %0 = arith.cmpi eq, %arg1, %c0_i32 : i32
    %1 = arith.extui %0 : i1 to i32
    %c0_i32_0 = arith.constant 0 : i32
    %2 = arith.cmpi ne, %1, %c0_i32_0 : i32
    scf.if %2 {
      %c0_86 = arith.constant 0 : index
      %c0_87 = arith.constant 0 : index
      %272 = vector.load %arg3[%c0_86, %c0_87] : memref<8x128xf32, #tpu.memory_space<vmem>>, vector<8x128xf32>
      %c0_88 = arith.constant 0 : index
      %c0_89 = arith.constant 0 : index
      %273 = vector.load %arg7[%c0_88, %c0_89] : memref<8x128xf32, #tpu.memory_space<vmem>>, vector<8x128xf32>
      tpu.vector_store %arg7[%c0_88, %c0_89], %272 {strides = array<i32>} : memref<8x128xf32, #tpu.memory_space<vmem>>, vector<8x128xf32>,
    } else {
    }
    %c0 = arith.constant 0 : index
    %c0_1 = arith.constant 0 : index
    %3 = vector.load %arg7[%c0, %c0_1] : memref<8x128xf32, #tpu.memory_space<vmem>>, vector<8x128xf32>
    %c0_2 = arith.constant 0 : index
    %c0_3 = arith.constant 0 : index
    %c0_4 = arith.constant 0 : index
    %4 = vector.load %arg2[%c0_2, %c0_3, %c0_4] : memref<8x8x384xf32, #tpu.memory_space<vmem>>, vector<8x1x384xf32>
    %5 = vector.shape_cast %4 : vector<8x1x384xf32> to vector<8x384xf32>
    %c0_5 = arith.constant 0 : index
    %c0_6 = arith.constant 0 : index
    %6 = vector.load %arg4[%c0_5, %c0_6] : memref<128x384xf32, #tpu.memory_space<vmem>>, vector<128x384xf32>
    %cst = arith.constant dense<0.000000e+00> : vector<8x384xf32>
    %7 = tpu.matmul %3, %6, %cst {dimension_numbers = #tpu.dot_dimension_numbers<[1], [0], [0], [1], [0, 0, 1, 1], [], []>} : vector<8x128xf32>, vector<128x384xf32>, vector<8x384xf32> -> vector<8x384xf32>
    %c0_7 = arith.constant 0 : index
    %c0_8 = arith.constant 0 : index
    %8 = vector.load %arg5[%c0_7, %c0_8] : memref<1x384xf32, #tpu.memory_space<vmem>>, vector<1x384xf32>
    %9 = vector.broadcast %8 : vector<1x384xf32> to vector<8x384xf32>
    %10 = arith.addf %7, %9 : vector<8x384xf32>
    %11 = vector.extract_strided_slice %5 {offsets = [0, 0], sizes = [8, 128], strides = [1, 1]} : vector<8x384xf32> to vector<8x128xf32>
    %12 = vector.extract_strided_slice %10 {offsets = [0, 0], sizes = [8, 128], strides = [1, 1]} : vector<8x384xf32> to vector<8x128xf32>
    %13 = arith.addf %11, %12 : vector<8x128xf32>
    %14 = arith.negf %13 : vector<8x128xf32>
    %15 = math.exp %14 : vector<8x128xf32>
    %cst_9 = arith.constant 1.000000e+00 : f32
    %16 = vector.broadcast %cst_9 : f32 to vector<8x128xf32>
    %17 = arith.addf %16, %15 : vector<8x128xf32>
    %18 = arith.divf %16, %17 : vector<8x128xf32>
    %19 = vector.extract_strided_slice %5 {offsets = [0, 128], sizes = [8, 128], strides = [1, 1]} : vector<8x384xf32> to vector<8x128xf32>
    %20 = vector.extract_strided_slice %10 {offsets = [0, 128], sizes = [8, 128], strides = [1, 1]} : vector<8x384xf32> to vector<8x128xf32>
    %21 = arith.addf %19, %20 : vector<8x128xf32>
    %22 = arith.negf %21 : vector<8x128xf32>
    %23 = math.exp %22 : vector<8x128xf32>
    %cst_10 = arith.constant 1.000000e+00 : f32
    %24 = vector.broadcast %cst_10 : f32 to vector<8x128xf32>
    %25 = arith.addf %24, %23 : vector<8x128xf32>
    %26 = arith.divf %24, %25 : vector<8x128xf32>
    %27 = vector.extract_strided_slice %5 {offsets = [0, 256], sizes = [8, 128], strides = [1, 1]} : vector<8x384xf32> to vector<8x128xf32>
    %28 = vector.extract_strided_slice %10 {offsets = [0, 256], sizes = [8, 128], strides = [1, 1]} : vector<8x384xf32> to vector<8x128xf32>
    %29 = arith.mulf %18, %28 : vector<8x128xf32>
    %30 = arith.addf %27, %29 : vector<8x128xf32>
    %31 = math.tanh %30 : vector<8x128xf32>
    %cst_11 = arith.constant 1.000000e+00 : f32
    %32 = vector.broadcast %cst_11 : f32 to vector<8x128xf32>
    %33 = arith.subf %32, %26 : vector<8x128xf32>
    %34 = arith.mulf %33, %31 : vector<8x128xf32>
    %35 = arith.mulf %26, %3 : vector<8x128xf32>
    %36 = arith.addf %34, %35 : vector<8x128xf32>
    %c0_12 = arith.constant 0 : index
    %c1 = arith.constant 1 : index
    %c0_13 = arith.constant 0 : index
    %37 = vector.load %arg2[%c0_12, %c1, %c0_13] : memref<8x8x384xf32, #tpu.memory_space<vmem>>, vector<8x1x384xf32>
    %38 = vector.shape_cast %37 : vector<8x1x384xf32> to vector<8x384xf32>
    %c0_14 = arith.constant 0 : index
    %c0_15 = arith.constant 0 : index
    %39 = vector.load %arg4[%c0_14, %c0_15] : memref<128x384xf32, #tpu.memory_space<vmem>>, vector<128x384xf32>
    %cst_16 = arith.constant dense<0.000000e+00> : vector<8x384xf32>
    %40 = tpu.matmul %36, %39, %cst_16 {dimension_numbers = #tpu.dot_dimension_numbers<[1], [0], [0], [1], [0, 0, 1, 1], [], []>} : vector<8x128xf32>, vector<128x384xf32>, vector<8x384xf32> -> vector<8x384xf32>
    %c0_17 = arith.constant 0 : index
    %c0_18 = arith.constant 0 : index
    %41 = vector.load %arg5[%c0_17, %c0_18] : memref<1x384xf32, #tpu.memory_space<vmem>>, vector<1x384xf32>
    %42 = vector.broadcast %41 : vector<1x384xf32> to vector<8x384xf32>
    %43 = arith.addf %40, %42 : vector<8x384xf32>
    %44 = vector.extract_strided_slice %38 {offsets = [0, 0], sizes = [8, 128], strides = [1, 1]} : vector<8x384xf32> to vector<8x128xf32>
    %45 = vector.extract_strided_slice %43 {offsets = [0, 0], sizes = [8, 128], strides = [1, 1]} : vector<8x384xf32> to vector<8x128xf32>
    %46 = arith.addf %44, %45 : vector<8x128xf32>
    %47 = arith.negf %46 : vector<8x128xf32>
    %48 = math.exp %47 : vector<8x128xf32>
    %cst_19 = arith.constant 1.000000e+00 : f32
    %49 = vector.broadcast %cst_19 : f32 to vector<8x128xf32>
    %50 = arith.addf %49, %48 : vector<8x128xf32>
    %51 = arith.divf %49, %50 : vector<8x128xf32>
    %52 = vector.extract_strided_slice %38 {offsets = [0, 128], sizes = [8, 128], strides = [1, 1]} : vector<8x384xf32> to vector<8x128xf32>
    %53 = vector.extract_strided_slice %43 {offsets = [0, 128], sizes = [8, 128], strides = [1, 1]} : vector<8x384xf32> to vector<8x128xf32>
    %54 = arith.addf %52, %53 : vector<8x128xf32>
    %55 = arith.negf %54 : vector<8x128xf32>
    %56 = math.exp %55 : vector<8x128xf32>
    %cst_20 = arith.constant 1.000000e+00 : f32
    %57 = vector.broadcast %cst_20 : f32 to vector<8x128xf32>
    %58 = arith.addf %57, %56 : vector<8x128xf32>
    %59 = arith.divf %57, %58 : vector<8x128xf32>
    %60 = vector.extract_strided_slice %38 {offsets = [0, 256], sizes = [8, 128], strides = [1, 1]} : vector<8x384xf32> to vector<8x128xf32>
    %61 = vector.extract_strided_slice %43 {offsets = [0, 256], sizes = [8, 128], strides = [1, 1]} : vector<8x384xf32> to vector<8x128xf32>
    %62 = arith.mulf %51, %61 : vector<8x128xf32>
    %63 = arith.addf %60, %62 : vector<8x128xf32>
    %64 = math.tanh %63 : vector<8x128xf32>
    %cst_21 = arith.constant 1.000000e+00 : f32
    %65 = vector.broadcast %cst_21 : f32 to vector<8x128xf32>
    %66 = arith.subf %65, %59 : vector<8x128xf32>
    %67 = arith.mulf %66, %64 : vector<8x128xf32>
    %68 = arith.mulf %59, %36 : vector<8x128xf32>
    %69 = arith.addf %67, %68 : vector<8x128xf32>
    %c0_22 = arith.constant 0 : index
    %c2 = arith.constant 2 : index
    %c0_23 = arith.constant 0 : index
    %70 = vector.load %arg2[%c0_22, %c2, %c0_23] : memref<8x8x384xf32, #tpu.memory_space<vmem>>, vector<8x1x384xf32>
    %71 = vector.shape_cast %70 : vector<8x1x384xf32> to vector<8x384xf32>
    %c0_24 = arith.constant 0 : index
    %c0_25 = arith.constant 0 : index
    %72 = vector.load %arg4[%c0_24, %c0_25] : memref<128x384xf32, #tpu.memory_space<vmem>>, vector<128x384xf32>
    %cst_26 = arith.constant dense<0.000000e+00> : vector<8x384xf32>
    %73 = tpu.matmul %69, %72, %cst_26 {dimension_numbers = #tpu.dot_dimension_numbers<[1], [0], [0], [1], [0, 0, 1, 1], [], []>} : vector<8x128xf32>, vector<128x384xf32>, vector<8x384xf32> -> vector<8x384xf32>
    %c0_27 = arith.constant 0 : index
    %c0_28 = arith.constant 0 : index
    %74 = vector.load %arg5[%c0_27, %c0_28] : memref<1x384xf32, #tpu.memory_space<vmem>>, vector<1x384xf32>
    %75 = vector.broadcast %74 : vector<1x384xf32> to vector<8x384xf32>
    %76 = arith.addf %73, %75 : vector<8x384xf32>
    %77 = vector.extract_strided_slice %71 {offsets = [0, 0], sizes = [8, 128], strides = [1, 1]} : vector<8x384xf32> to vector<8x128xf32>
    %78 = vector.extract_strided_slice %76 {offsets = [0, 0], sizes = [8, 128], strides = [1, 1]} : vector<8x384xf32> to vector<8x128xf32>
    %79 = arith.addf %77, %78 : vector<8x128xf32>
    %80 = arith.negf %79 : vector<8x128xf32>
    %81 = math.exp %80 : vector<8x128xf32>
    %cst_29 = arith.constant 1.000000e+00 : f32
    %82 = vector.broadcast %cst_29 : f32 to vector<8x128xf32>
    %83 = arith.addf %82, %81 : vector<8x128xf32>
    %84 = arith.divf %82, %83 : vector<8x128xf32>
    %85 = vector.extract_strided_slice %71 {offsets = [0, 128], sizes = [8, 128], strides = [1, 1]} : vector<8x384xf32> to vector<8x128xf32>
    %86 = vector.extract_strided_slice %76 {offsets = [0, 128], sizes = [8, 128], strides = [1, 1]} : vector<8x384xf32> to vector<8x128xf32>
    %87 = arith.addf %85, %86 : vector<8x128xf32>
    %88 = arith.negf %87 : vector<8x128xf32>
    %89 = math.exp %88 : vector<8x128xf32>
    %cst_30 = arith.constant 1.000000e+00 : f32
    %90 = vector.broadcast %cst_30 : f32 to vector<8x128xf32>
    %91 = arith.addf %90, %89 : vector<8x128xf32>
    %92 = arith.divf %90, %91 : vector<8x128xf32>
    %93 = vector.extract_strided_slice %71 {offsets = [0, 256], sizes = [8, 128], strides = [1, 1]} : vector<8x384xf32> to vector<8x128xf32>
    %94 = vector.extract_strided_slice %76 {offsets = [0, 256], sizes = [8, 128], strides = [1, 1]} : vector<8x384xf32> to vector<8x128xf32>
    %95 = arith.mulf %84, %94 : vector<8x128xf32>
    %96 = arith.addf %93, %95 : vector<8x128xf32>
    %97 = math.tanh %96 : vector<8x128xf32>
    %cst_31 = arith.constant 1.000000e+00 : f32
    %98 = vector.broadcast %cst_31 : f32 to vector<8x128xf32>
    %99 = arith.subf %98, %92 : vector<8x128xf32>
    %100 = arith.mulf %99, %97 : vector<8x128xf32>
    %101 = arith.mulf %92, %69 : vector<8x128xf32>
    %102 = arith.addf %100, %101 : vector<8x128xf32>
    %c0_32 = arith.constant 0 : index
    %c3 = arith.constant 3 : index
    %c0_33 = arith.constant 0 : index
    %103 = vector.load %arg2[%c0_32, %c3, %c0_33] : memref<8x8x384xf32, #tpu.memory_space<vmem>>, vector<8x1x384xf32>
    %104 = vector.shape_cast %103 : vector<8x1x384xf32> to vector<8x384xf32>
    %c0_34 = arith.constant 0 : index
    %c0_35 = arith.constant 0 : index
    %105 = vector.load %arg4[%c0_34, %c0_35] : memref<128x384xf32, #tpu.memory_space<vmem>>, vector<128x384xf32>
    %cst_36 = arith.constant dense<0.000000e+00> : vector<8x384xf32>
    %106 = tpu.matmul %102, %105, %cst_36 {dimension_numbers = #tpu.dot_dimension_numbers<[1], [0], [0], [1], [0, 0, 1, 1], [], []>} : vector<8x128xf32>, vector<128x384xf32>, vector<8x384xf32> -> vector<8x384xf32>
    %c0_37 = arith.constant 0 : index
    %c0_38 = arith.constant 0 : index
    %107 = vector.load %arg5[%c0_37, %c0_38] : memref<1x384xf32, #tpu.memory_space<vmem>>, vector<1x384xf32>
    %108 = vector.broadcast %107 : vector<1x384xf32> to vector<8x384xf32>
    %109 = arith.addf %106, %108 : vector<8x384xf32>
    %110 = vector.extract_strided_slice %104 {offsets = [0, 0], sizes = [8, 128], strides = [1, 1]} : vector<8x384xf32> to vector<8x128xf32>
    %111 = vector.extract_strided_slice %109 {offsets = [0, 0], sizes = [8, 128], strides = [1, 1]} : vector<8x384xf32> to vector<8x128xf32>
    %112 = arith.addf %110, %111 : vector<8x128xf32>
    %113 = arith.negf %112 : vector<8x128xf32>
    %114 = math.exp %113 : vector<8x128xf32>
    %cst_39 = arith.constant 1.000000e+00 : f32
    %115 = vector.broadcast %cst_39 : f32 to vector<8x128xf32>
    %116 = arith.addf %115, %114 : vector<8x128xf32>
    %117 = arith.divf %115, %116 : vector<8x128xf32>
    %118 = vector.extract_strided_slice %104 {offsets = [0, 128], sizes = [8, 128], strides = [1, 1]} : vector<8x384xf32> to vector<8x128xf32>
    %119 = vector.extract_strided_slice %109 {offsets = [0, 128], sizes = [8, 128], strides = [1, 1]} : vector<8x384xf32> to vector<8x128xf32>
    %120 = arith.addf %118, %119 : vector<8x128xf32>
    %121 = arith.negf %120 : vector<8x128xf32>
    %122 = math.exp %121 : vector<8x128xf32>
    %cst_40 = arith.constant 1.000000e+00 : f32
    %123 = vector.broadcast %cst_40 : f32 to vector<8x128xf32>
    %124 = arith.addf %123, %122 : vector<8x128xf32>
    %125 = arith.divf %123, %124 : vector<8x128xf32>
    %126 = vector.extract_strided_slice %104 {offsets = [0, 256], sizes = [8, 128], strides = [1, 1]} : vector<8x384xf32> to vector<8x128xf32>
    %127 = vector.extract_strided_slice %109 {offsets = [0, 256], sizes = [8, 128], strides = [1, 1]} : vector<8x384xf32> to vector<8x128xf32>
    %128 = arith.mulf %117, %127 : vector<8x128xf32>
    %129 = arith.addf %126, %128 : vector<8x128xf32>
    %130 = math.tanh %129 : vector<8x128xf32>
    %cst_41 = arith.constant 1.000000e+00 : f32
    %131 = vector.broadcast %cst_41 : f32 to vector<8x128xf32>
    %132 = arith.subf %131, %125 : vector<8x128xf32>
    %133 = arith.mulf %132, %130 : vector<8x128xf32>
    %134 = arith.mulf %125, %102 : vector<8x128xf32>
    %135 = arith.addf %133, %134 : vector<8x128xf32>
    %c0_42 = arith.constant 0 : index
    %c4 = arith.constant 4 : index
    %c0_43 = arith.constant 0 : index
    %136 = vector.load %arg2[%c0_42, %c4, %c0_43] : memref<8x8x384xf32, #tpu.memory_space<vmem>>, vector<8x1x384xf32>
    %137 = vector.shape_cast %136 : vector<8x1x384xf32> to vector<8x384xf32>
    %c0_44 = arith.constant 0 : index
    %c0_45 = arith.constant 0 : index
    %138 = vector.load %arg4[%c0_44, %c0_45] : memref<128x384xf32, #tpu.memory_space<vmem>>, vector<128x384xf32>
    %cst_46 = arith.constant dense<0.000000e+00> : vector<8x384xf32>
    %139 = tpu.matmul %135, %138, %cst_46 {dimension_numbers = #tpu.dot_dimension_numbers<[1], [0], [0], [1], [0, 0, 1, 1], [], []>} : vector<8x128xf32>, vector<128x384xf32>, vector<8x384xf32> -> vector<8x384xf32>
    %c0_47 = arith.constant 0 : index
    %c0_48 = arith.constant 0 : index
    %140 = vector.load %arg5[%c0_47, %c0_48] : memref<1x384xf32, #tpu.memory_space<vmem>>, vector<1x384xf32>
    %141 = vector.broadcast %140 : vector<1x384xf32> to vector<8x384xf32>
    %142 = arith.addf %139, %141 : vector<8x384xf32>
    %143 = vector.extract_strided_slice %137 {offsets = [0, 0], sizes = [8, 128], strides = [1, 1]} : vector<8x384xf32> to vector<8x128xf32>
    %144 = vector.extract_strided_slice %142 {offsets = [0, 0], sizes = [8, 128], strides = [1, 1]} : vector<8x384xf32> to vector<8x128xf32>
    %145 = arith.addf %143, %144 : vector<8x128xf32>
    %146 = arith.negf %145 : vector<8x128xf32>
    %147 = math.exp %146 : vector<8x128xf32>
    %cst_49 = arith.constant 1.000000e+00 : f32
    %148 = vector.broadcast %cst_49 : f32 to vector<8x128xf32>
    %149 = arith.addf %148, %147 : vector<8x128xf32>
    %150 = arith.divf %148, %149 : vector<8x128xf32>
    %151 = vector.extract_strided_slice %137 {offsets = [0, 128], sizes = [8, 128], strides = [1, 1]} : vector<8x384xf32> to vector<8x128xf32>
    %152 = vector.extract_strided_slice %142 {offsets = [0, 128], sizes = [8, 128], strides = [1, 1]} : vector<8x384xf32> to vector<8x128xf32>
    %153 = arith.addf %151, %152 : vector<8x128xf32>
    %154 = arith.negf %153 : vector<8x128xf32>
    %155 = math.exp %154 : vector<8x128xf32>
    %cst_50 = arith.constant 1.000000e+00 : f32
    %156 = vector.broadcast %cst_50 : f32 to vector<8x128xf32>
    %157 = arith.addf %156, %155 : vector<8x128xf32>
    %158 = arith.divf %156, %157 : vector<8x128xf32>
    %159 = vector.extract_strided_slice %137 {offsets = [0, 256], sizes = [8, 128], strides = [1, 1]} : vector<8x384xf32> to vector<8x128xf32>
    %160 = vector.extract_strided_slice %142 {offsets = [0, 256], sizes = [8, 128], strides = [1, 1]} : vector<8x384xf32> to vector<8x128xf32>
    %161 = arith.mulf %150, %160 : vector<8x128xf32>
    %162 = arith.addf %159, %161 : vector<8x128xf32>
    %163 = math.tanh %162 : vector<8x128xf32>
    %cst_51 = arith.constant 1.000000e+00 : f32
    %164 = vector.broadcast %cst_51 : f32 to vector<8x128xf32>
    %165 = arith.subf %164, %158 : vector<8x128xf32>
    %166 = arith.mulf %165, %163 : vector<8x128xf32>
    %167 = arith.mulf %158, %135 : vector<8x128xf32>
    %168 = arith.addf %166, %167 : vector<8x128xf32>
    %c0_52 = arith.constant 0 : index
    %c5 = arith.constant 5 : index
    %c0_53 = arith.constant 0 : index
    %169 = vector.load %arg2[%c0_52, %c5, %c0_53] : memref<8x8x384xf32, #tpu.memory_space<vmem>>, vector<8x1x384xf32>
    %170 = vector.shape_cast %169 : vector<8x1x384xf32> to vector<8x384xf32>
    %c0_54 = arith.constant 0 : index
    %c0_55 = arith.constant 0 : index
    %171 = vector.load %arg4[%c0_54, %c0_55] : memref<128x384xf32, #tpu.memory_space<vmem>>, vector<128x384xf32>
    %cst_56 = arith.constant dense<0.000000e+00> : vector<8x384xf32>
    %172 = tpu.matmul %168, %171, %cst_56 {dimension_numbers = #tpu.dot_dimension_numbers<[1], [0], [0], [1], [0, 0, 1, 1], [], []>} : vector<8x128xf32>, vector<128x384xf32>, vector<8x384xf32> -> vector<8x384xf32>
    %c0_57 = arith.constant 0 : index
    %c0_58 = arith.constant 0 : index
    %173 = vector.load %arg5[%c0_57, %c0_58] : memref<1x384xf32, #tpu.memory_space<vmem>>, vector<1x384xf32>
    %174 = vector.broadcast %173 : vector<1x384xf32> to vector<8x384xf32>
    %175 = arith.addf %172, %174 : vector<8x384xf32>
    %176 = vector.extract_strided_slice %170 {offsets = [0, 0], sizes = [8, 128], strides = [1, 1]} : vector<8x384xf32> to vector<8x128xf32>
    %177 = vector.extract_strided_slice %175 {offsets = [0, 0], sizes = [8, 128], strides = [1, 1]} : vector<8x384xf32> to vector<8x128xf32>
    %178 = arith.addf %176, %177 : vector<8x128xf32>
    %179 = arith.negf %178 : vector<8x128xf32>
    %180 = math.exp %179 : vector<8x128xf32>
    %cst_59 = arith.constant 1.000000e+00 : f32
    %181 = vector.broadcast %cst_59 : f32 to vector<8x128xf32>
    %182 = arith.addf %181, %180 : vector<8x128xf32>
    %183 = arith.divf %181, %182 : vector<8x128xf32>
    %184 = vector.extract_strided_slice %170 {offsets = [0, 128], sizes = [8, 128], strides = [1, 1]} : vector<8x384xf32> to vector<8x128xf32>
    %185 = vector.extract_strided_slice %175 {offsets = [0, 128], sizes = [8, 128], strides = [1, 1]} : vector<8x384xf32> to vector<8x128xf32>
    %186 = arith.addf %184, %185 : vector<8x128xf32>
    %187 = arith.negf %186 : vector<8x128xf32>
    %188 = math.exp %187 : vector<8x128xf32>
    %cst_60 = arith.constant 1.000000e+00 : f32
    %189 = vector.broadcast %cst_60 : f32 to vector<8x128xf32>
    %190 = arith.addf %189, %188 : vector<8x128xf32>
    %191 = arith.divf %189, %190 : vector<8x128xf32>
    %192 = vector.extract_strided_slice %170 {offsets = [0, 256], sizes = [8, 128], strides = [1, 1]} : vector<8x384xf32> to vector<8x128xf32>
    %193 = vector.extract_strided_slice %175 {offsets = [0, 256], sizes = [8, 128], strides = [1, 1]} : vector<8x384xf32> to vector<8x128xf32>
    %194 = arith.mulf %183, %193 : vector<8x128xf32>
    %195 = arith.addf %192, %194 : vector<8x128xf32>
    %196 = math.tanh %195 : vector<8x128xf32>
    %cst_61 = arith.constant 1.000000e+00 : f32
    %197 = vector.broadcast %cst_61 : f32 to vector<8x128xf32>
    %198 = arith.subf %197, %191 : vector<8x128xf32>
    %199 = arith.mulf %198, %196 : vector<8x128xf32>
    %200 = arith.mulf %191, %168 : vector<8x128xf32>
    %201 = arith.addf %199, %200 : vector<8x128xf32>
    %c0_62 = arith.constant 0 : index
    %c6 = arith.constant 6 : index
    %c0_63 = arith.constant 0 : index
    %202 = vector.load %arg2[%c0_62, %c6, %c0_63] : memref<8x8x384xf32, #tpu.memory_space<vmem>>, vector<8x1x384xf32>
    %203 = vector.shape_cast %202 : vector<8x1x384xf32> to vector<8x384xf32>
    %c0_64 = arith.constant 0 : index
    %c0_65 = arith.constant 0 : index
    %204 = vector.load %arg4[%c0_64, %c0_65] : memref<128x384xf32, #tpu.memory_space<vmem>>, vector<128x384xf32>
    %cst_66 = arith.constant dense<0.000000e+00> : vector<8x384xf32>
    %205 = tpu.matmul %201, %204, %cst_66 {dimension_numbers = #tpu.dot_dimension_numbers<[1], [0], [0], [1], [0, 0, 1, 1], [], []>} : vector<8x128xf32>, vector<128x384xf32>, vector<8x384xf32> -> vector<8x384xf32>
    %c0_67 = arith.constant 0 : index
    %c0_68 = arith.constant 0 : index
    %206 = vector.load %arg5[%c0_67, %c0_68] : memref<1x384xf32, #tpu.memory_space<vmem>>, vector<1x384xf32>
    %207 = vector.broadcast %206 : vector<1x384xf32> to vector<8x384xf32>
    %208 = arith.addf %205, %207 : vector<8x384xf32>
    %209 = vector.extract_strided_slice %203 {offsets = [0, 0], sizes = [8, 128], strides = [1, 1]} : vector<8x384xf32> to vector<8x128xf32>
    %210 = vector.extract_strided_slice %208 {offsets = [0, 0], sizes = [8, 128], strides = [1, 1]} : vector<8x384xf32> to vector<8x128xf32>
    %211 = arith.addf %209, %210 : vector<8x128xf32>
    %212 = arith.negf %211 : vector<8x128xf32>
    %213 = math.exp %212 : vector<8x128xf32>
    %cst_69 = arith.constant 1.000000e+00 : f32
    %214 = vector.broadcast %cst_69 : f32 to vector<8x128xf32>
    %215 = arith.addf %214, %213 : vector<8x128xf32>
    %216 = arith.divf %214, %215 : vector<8x128xf32>
    %217 = vector.extract_strided_slice %203 {offsets = [0, 128], sizes = [8, 128], strides = [1, 1]} : vector<8x384xf32> to vector<8x128xf32>
    %218 = vector.extract_strided_slice %208 {offsets = [0, 128], sizes = [8, 128], strides = [1, 1]} : vector<8x384xf32> to vector<8x128xf32>
    %219 = arith.addf %217, %218 : vector<8x128xf32>
    %220 = arith.negf %219 : vector<8x128xf32>
    %221 = math.exp %220 : vector<8x128xf32>
    %cst_70 = arith.constant 1.000000e+00 : f32
    %222 = vector.broadcast %cst_70 : f32 to vector<8x128xf32>
    %223 = arith.addf %222, %221 : vector<8x128xf32>
    %224 = arith.divf %222, %223 : vector<8x128xf32>
    %225 = vector.extract_strided_slice %203 {offsets = [0, 256], sizes = [8, 128], strides = [1, 1]} : vector<8x384xf32> to vector<8x128xf32>
    %226 = vector.extract_strided_slice %208 {offsets = [0, 256], sizes = [8, 128], strides = [1, 1]} : vector<8x384xf32> to vector<8x128xf32>
    %227 = arith.mulf %216, %226 : vector<8x128xf32>
    %228 = arith.addf %225, %227 : vector<8x128xf32>
    %229 = math.tanh %228 : vector<8x128xf32>
    %cst_71 = arith.constant 1.000000e+00 : f32
    %230 = vector.broadcast %cst_71 : f32 to vector<8x128xf32>
    %231 = arith.subf %230, %224 : vector<8x128xf32>
    %232 = arith.mulf %231, %229 : vector<8x128xf32>
    %233 = arith.mulf %224, %201 : vector<8x128xf32>
    %234 = arith.addf %232, %233 : vector<8x128xf32>
    %c0_72 = arith.constant 0 : index
    %c7 = arith.constant 7 : index
    %c0_73 = arith.constant 0 : index
    %235 = vector.load %arg2[%c0_72, %c7, %c0_73] : memref<8x8x384xf32, #tpu.memory_space<vmem>>, vector<8x1x384xf32>
    %236 = vector.shape_cast %235 : vector<8x1x384xf32> to vector<8x384xf32>
    %c0_74 = arith.constant 0 : index
    %c0_75 = arith.constant 0 : index
    %237 = vector.load %arg4[%c0_74, %c0_75] : memref<128x384xf32, #tpu.memory_space<vmem>>, vector<128x384xf32>
    %cst_76 = arith.constant dense<0.000000e+00> : vector<8x384xf32>
    %238 = tpu.matmul %234, %237, %cst_76 {dimension_numbers = #tpu.dot_dimension_numbers<[1], [0], [0], [1], [0, 0, 1, 1], [], []>} : vector<8x128xf32>, vector<128x384xf32>, vector<8x384xf32> -> vector<8x384xf32>
    %c0_77 = arith.constant 0 : index
    %c0_78 = arith.constant 0 : index
    %239 = vector.load %arg5[%c0_77, %c0_78] : memref<1x384xf32, #tpu.memory_space<vmem>>, vector<1x384xf32>
    %240 = vector.broadcast %239 : vector<1x384xf32> to vector<8x384xf32>
    %241 = arith.addf %238, %240 : vector<8x384xf32>
    %242 = vector.extract_strided_slice %236 {offsets = [0, 0], sizes = [8, 128], strides = [1, 1]} : vector<8x384xf32> to vector<8x128xf32>
    %243 = vector.extract_strided_slice %241 {offsets = [0, 0], sizes = [8, 128], strides = [1, 1]} : vector<8x384xf32> to vector<8x128xf32>
    %244 = arith.addf %242, %243 : vector<8x128xf32>
    %245 = arith.negf %244 : vector<8x128xf32>
    %246 = math.exp %245 : vector<8x128xf32>
    %cst_79 = arith.constant 1.000000e+00 : f32
    %247 = vector.broadcast %cst_79 : f32 to vector<8x128xf32>
    %248 = arith.addf %247, %246 : vector<8x128xf32>
    %249 = arith.divf %247, %248 : vector<8x128xf32>
    %250 = vector.extract_strided_slice %236 {offsets = [0, 128], sizes = [8, 128], strides = [1, 1]} : vector<8x384xf32> to vector<8x128xf32>
    %251 = vector.extract_strided_slice %241 {offsets = [0, 128], sizes = [8, 128], strides = [1, 1]} : vector<8x384xf32> to vector<8x128xf32>
    %252 = arith.addf %250, %251 : vector<8x128xf32>
    %253 = arith.negf %252 : vector<8x128xf32>
    %254 = math.exp %253 : vector<8x128xf32>
    %cst_80 = arith.constant 1.000000e+00 : f32
    %255 = vector.broadcast %cst_80 : f32 to vector<8x128xf32>
    %256 = arith.addf %255, %254 : vector<8x128xf32>
    %257 = arith.divf %255, %256 : vector<8x128xf32>
    %258 = vector.extract_strided_slice %236 {offsets = [0, 256], sizes = [8, 128], strides = [1, 1]} : vector<8x384xf32> to vector<8x128xf32>
    %259 = vector.extract_strided_slice %241 {offsets = [0, 256], sizes = [8, 128], strides = [1, 1]} : vector<8x384xf32> to vector<8x128xf32>
    %260 = arith.mulf %249, %259 : vector<8x128xf32>
    %261 = arith.addf %258, %260 : vector<8x128xf32>
    %262 = math.tanh %261 : vector<8x128xf32>
    %cst_81 = arith.constant 1.000000e+00 : f32
    %263 = vector.broadcast %cst_81 : f32 to vector<8x128xf32>
    %264 = arith.subf %263, %257 : vector<8x128xf32>
    %265 = arith.mulf %264, %262 : vector<8x128xf32>
    %266 = arith.mulf %257, %234 : vector<8x128xf32>
    %267 = arith.addf %265, %266 : vector<8x128xf32>
    %c0_82 = arith.constant 0 : index
    %c0_83 = arith.constant 0 : index
    %268 = vector.load %arg7[%c0_82, %c0_83] : memref<8x128xf32, #tpu.memory_space<vmem>>, vector<8x128xf32>
    tpu.vector_store %arg7[%c0_82, %c0_83], %267 {strides = array<i32>} : memref<8x128xf32, #tpu.memory_space<vmem>>, vector<8x128xf32>,
    %c0_i32_84 = arith.constant 0 : i32
    %269 = arith.cmpi eq, %arg1, %c0_i32_84 : i32
    %270 = arith.extui %269 : i1 to i32
    %c0_i32_85 = arith.constant 0 : i32
    %271 = arith.cmpi ne, %270, %c0_i32_85 : i32
    scf.if %271 {
      %c0_86 = arith.constant 0 : index
      %c0_87 = arith.constant 0 : index
      %272 = vector.load %arg6[%c0_86, %c0_87] : memref<8x128xf32, #tpu.memory_space<vmem>>, vector<8x128xf32>
      tpu.vector_store %arg6[%c0_86, %c0_87], %267 {strides = array<i32>} : memref<8x128xf32, #tpu.memory_space<vmem>>, vector<8x128xf32>,
    } else {
    }
    return
  }
  func.func @transform_0(%arg0: i32, %arg1: i32) -> (i32, i32, i32) {
    %c0_i32 = arith.constant 0 : i32
    %c0_i32_0 = arith.constant 0 : i32
    return %arg0, %arg1, %c0_i32 : i32, i32, i32
  }
  func.func @transform_1(%arg0: i32, %arg1: i32) -> (i32, i32) {
    %c0_i32 = arith.constant 0 : i32
    %c0_i32_0 = arith.constant 0 : i32
    return %arg0, %c0_i32 : i32, i32
  }
  func.func @transform_2(%arg0: i32, %arg1: i32) -> (i32, i32) {
    %c0_i32 = arith.constant 0 : i32
    %c0_i32_0 = arith.constant 0 : i32
    %c0_i32_1 = arith.constant 0 : i32
    return %c0_i32, %c0_i32_0 : i32, i32
  }
  func.func @transform_3(%arg0: i32, %arg1: i32) -> (i32, i32) {
    %c0_i32 = arith.constant 0 : i32
    %c0_i32_0 = arith.constant 0 : i32
    %c0_i32_1 = arith.constant 0 : i32
    return %c0_i32, %c0_i32_0 : i32, i32
  }
  func.func @transform_4(%arg0: i32, %arg1: i32) -> (i32, i32) {
    %c0_i32 = arith.constant 0 : i32
    %c0_i32_0 = arith.constant 0 : i32
    return %arg0, %c0_i32 : i32, i32
  }
}

</mosaic_0001>

<bundles_post_ra>
// kernel: gru_user_encoder.2
= control target key start
LH: loop header
LB: loop body
LE: loop exit
PB: predicated region body
PF: predicated region fallthrough
CT: control target
= control target key end

     0   :  { %v379_v3 = vmov 0.0   ;;  %vm51_vm0 = vcmask 261120   ;;  %v36_v21 = vlaneseq  ;;  %s579_s1 = inlined_call_operand.vmem [shape: f32[32,384], index: 1, kind: input, shape index: {}]   ;;  %s580_s0 = inlined_call_operand.vmem [shape: f32[64,32], index: 0, kind: input, shape index: {}]   ;;  %s581_s2 = inlined_call_operand.vmem [shape: f32[1,384], index: 2, kind: input, shape index: {}]   ;;  %s582_s3 = inlined_call_operand.vmem [shape: f32[64,384], index: 3, kind: output, shape index: {}]  }
   0x1   :  { %v32_v0 = vld [vmem:[%s579_s1 + $0x50] sm:$0xff]  ;;  %v31_v1 = vld [vmem:[%s579_s1 + $0x48] sm:$0xff]  ;;  %v29_v2 = vld [vmem:[%s579_s1 + $0x38] sm:$0xff]  ;;  %140 = vmatprep.mubr.f32.mxu0 %v379_v3  ;;  %176 = vmatprep.mubr.f32.mxu1 %v379_v3 }
   0x2   :  { %100 = vmatprep.subr.mxu0 %v32_v0  ;;  %370 = vmatprep.subr.mxu1 %v32_v0  ;;  %v28_v4 = vld [vmem:[%s579_s1 + $0x30] sm:$0xff]  ;;  %v26_v5 = vld [vmem:[%s579_s1 + $0x20] sm:$0xff]  ;;  %v25_v6 = vld [vmem:[%s579_s1 + $0x18] sm:$0xff]  ;;  %v37_v22 = vshrl.u32 %v36_v21, 7 }
   0x3   :  { %101 = vmatpush1.msra.mxu0 %v31_v1  ;;  %374 = vmatpush1.msra.mxu1 %v31_v1  ;;  %v23_v7 = vld [vmem:[%s579_s1 + $0x8] sm:$0xff]  ;;  %v22_v8 = vld [vmem:[%s579_s1] sm:$0xff]  ;;  %v20_v10 = vld [vmem:[%s580_s0 + $0x30] sm:$0xff] }
   0x4   :  { %102 = vmatprep.subr.mxu0 %v29_v2  ;;  %371 = vmatprep.subr.mxu1 %v29_v2  ;;  %v14_v9 = vld [vmem:[%s580_s0] sm:$0xff]  ;;  %v33_v11 = vld [vmem:[%s579_s1 + $0x58] sm:$0xff]  ;;  %v15_v13 = vld [vmem:[%s580_s0 + $0x8] sm:$0xff]  ;;  %v38_v23 = vsub.s32 0, %v37_v22  ;;  %v42_v25 = vsub.s32 1, %v37_v22  ;;  %v46_v34 = vsub.s32 2, %v37_v22 }
   0x5   :  { %103 = vmatpush1.msra.mxu0 %v28_v4  ;;  %375 = vmatpush1.msra.mxu1 %v28_v4  ;;  %v30_v12 = vld [vmem:[%s579_s1 + $0x40] sm:$0xff]  ;;  %v21_v14 = vld [vmem:[%s580_s0 + $0x38] sm:$0xff]  ;;  %v27_v15 = vld [vmem:[%s579_s1 + $0x28] sm:$0xff] }
   0x6   :  { %104 = vmatprep.subr.mxu0 %v26_v5  ;;  %372 = vmatprep.subr.mxu1 %v26_v5  ;;  %v24_v16 = vld [vmem:[%s579_s1 + $0x10] sm:$0xff]  ;;  %v17_v18 = vld [vmem:[%s580_s0 + $0x18] sm:$0xff]  ;;  %v18_v19 = vld [vmem:[%s580_s0 + $0x20] sm:$0xff] }
   0x7   :  { %105 = vmatpush1.msra.mxu0 %v25_v6  ;;  %376 = vmatpush1.msra.mxu1 %v25_v6  ;;  %v16_v17 = vld [vmem:[%s580_s0 + $0x10] sm:$0xff]  ;;  %v19_v20 = vld [vmem:[%s580_s0 + $0x28] sm:$0xff]  ;;  %v34_v24 = vld [vmem:[%s581_s2] sm:$0x7] }
   0x8   :  { %106 = vmatprep.subr.mxu0 %v23_v7  ;;  %373 = vmatprep.subr.mxu1 %v23_v7  ;;  %v487_v26 = vrot.slane %v34_v24, %v38_v23  ;;  %v489_v27 = vrot.slane %v34_v24, %v42_v25  ;;  %v47_v42 = vrot.slane %v34_v24, %v46_v34 }
   0x9   :  { %107 = vmatpush1.msra.mxu0 %v22_v8  ;;  %377 = vmatpush1.msra.mxu1 %v22_v8 }
   0xa   :  { %322 = vmatmul.mubr.msk.f32.vlgmr.msra.gmra.mxu0 %vm51_vm0, %v14_v9  ;;  %328 = vmatmul.mubr.msk.f32.vlgmr.msra.gmra.mxu1 %vm51_vm0, %v20_v10 }
   0xb   :  { %350 = vmatprep.subr.mxu1 %v33_v11  ;;  %146 = vmatprep.mubr.f32.mxu0 %v379_v3 }
   0xc   :  { %351 = vmatpush3.msra.mxu1 %v33_v11  ;;  %182 = vmatprep.mubr.f32.mxu1 %v379_v3 }
   0xd   :  { %352 = vmatprep.subr.mxu1 %v30_v12 }
   0xe   :  { %353 = vmatpush3.msra.mxu1 %v30_v12  ;;  %323 = vmatmul.mubr.msk.f32.gmra.mxu0 %vm51_vm0, %v15_v13 }
   0xf   :  { %329 = vmatmul.mubr.msk.f32.gmra.mxu1 %vm51_vm0, %v21_v14  ;;  %354 = vmatprep.subr.mxu1 %v27_v15 }
  0x10   :  { %355 = vmatpush3.msra.mxu1 %v27_v15  ;;  %152 = vmatprep.mubr.f32.mxu0 %v379_v3 }
  0x11   :  { %356 = vmatprep.subr.mxu1 %v24_v16  ;;  %358 = vmatprep.mubr.msk.f32.mxu1 %vm51_vm0, %v14_v9 }
  0x12   :  { %357 = vmatpush3.msra.mxu1 %v24_v16  ;;  %324 = vmatmul.mubr.msk.f32.gmra.mxu0 %vm51_vm0, %v16_v17 }
  0x13   :  { %359 = vmatmul.mubr.msk.f32.vlgmr.msra.gmra.mxu1 %vm51_vm0, %v15_v13  ;;  %158 = vmatprep.mubr.f32.mxu0 %v379_v3 }
  0x14   :  { %361 = vmatprep.mubr.msk.f32.mxu1 %vm51_vm0, %v16_v17 }
  0x16   :  { %325 = vmatmul.mubr.msk.f32.gmra.mxu0 %vm51_vm0, %v17_v18 }
  0x17   :  { %362 = vmatmul.mubr.msk.f32.gmra.mxu1 %vm51_vm0, %v17_v18  ;;  %164 = vmatprep.mubr.f32.mxu0 %v379_v3 }
  0x18   :  { %364 = vmatprep.mubr.msk.f32.mxu1 %vm51_vm0, %v18_v19 }
  0x1a   :  { %326 = vmatmul.mubr.msk.f32.gmra.mxu0 %vm51_vm0, %v18_v19 }
  0x1b   :  { %365 = vmatmul.mubr.msk.f32.gmra.mxu1 %vm51_vm0, %v19_v20  ;;  %170 = vmatprep.mubr.f32.mxu0 %v379_v3 }
  0x1c   :  { %367 = vmatprep.mubr.msk.f32.mxu1 %vm51_vm0, %v20_v10 }
  0x1e   :  { %327 = vmatmul.mubr.msk.f32.gmra.mxu0 %vm51_vm0, %v19_v20 }
  0x1f   :  { %368 = vmatmul.mubr.msk.f32.gmra.mxu1 %vm51_vm0, %v21_v14 }
  0xca   :  { %v142_v28 = vpop.f32.mrf.mxu0  ;;  %v178_v29 = vpop.f32.mrf.mxu1 }
  0xcb   :  { %v143_v30 = vadd.f32 %v142_v28, %v487_v26  ;;  %v179_v31 = vadd.f32 %v178_v29, %v487_v26 }
  0xcc   :  { %v144_v32 = vpop.f32.mrf.mxu0  ;;  %v180_v33 = vpop.f32.mrf.mxu1 }
  0xcd   :  { %294 = vst [vmem:[%s582_s3] sm:$0xff] %v143_v30  ;;  %312 = vst [vmem:[%s582_s3 + $0x90] sm:$0xff] %v179_v31  ;;  %v145_v35 = vadd.f32 %v144_v32, %v489_v27  ;;  %v181_v36 = vadd.f32 %v180_v33, %v489_v27 }
  0xce   :  { %v148_v37 = vpop.f32.mrf.mxu0 }
  0xcf   :  { %295 = vst [vmem:[%s582_s3 + $0x8] sm:$0xff] %v145_v35  ;;  %313 = vst [vmem:[%s582_s3 + $0x98] sm:$0xff] %v181_v36  ;;  %v149_v38 = vadd.f32 %v148_v37, %v487_v26  ;;  %v184_v39 = vpop.f32.mrf.mxu1 }
  0xd0   :  { %v185_v40 = vadd.f32 %v184_v39, %v487_v26  ;;  %v150_v41 = vpop.f32.mrf.mxu0 }
  0xd1   :  { %297 = vst [vmem:[%s582_s3 + $0x18] sm:$0xff] %v149_v38  ;;  %v151_v43 = vadd.f32 %v150_v41, %v489_v27  ;;  %v186_v44 = vpop.f32.mrf.mxu1 }
  0xd2   :  { %315 = vst [vmem:[%s582_s3 + $0xa8] sm:$0xff] %v185_v40  ;;  %v187_v45 = vadd.f32 %v186_v44, %v489_v27  ;;  %v154_v46 = vpop.f32.mrf.mxu0 }
  0xd3   :  { %298 = vst [vmem:[%s582_s3 + $0x20] sm:$0xff] %v151_v43  ;;  %v155_v47 = vadd.f32 %v154_v46, %v487_v26  ;;  %v360_v48 = vpop.f32.mrf.mxu1 }
  0xd4   :  { %316 = vst [vmem:[%s582_s3 + $0xb0] sm:$0xff] %v187_v45  ;;  %v261_v49 = vadd.f32 %v360_v48, %v47_v42  ;;  %v156_v50 = vpop.f32.mrf.mxu0 }
  0xd5   :  { %300 = vst [vmem:[%s582_s3 + $0x30] sm:$0xff] %v155_v47  ;;  %v157_v51 = vadd.f32 %v156_v50, %v489_v27  ;;  %v255_v52 = vpop.f32.mrf.mxu1 }
  0xd6   :  { %299 = vst [vmem:[%s582_s3 + $0x28] sm:$0xff] %v261_v49  ;;  %v256_v53 = vadd.f32 %v255_v52, %v47_v42  ;;  %v160_v54 = vpop.f32.mrf.mxu0 }
  0xd7   :  { %301 = vst [vmem:[%s582_s3 + $0x38] sm:$0xff] %v157_v51  ;;  %v161_v55 = vadd.f32 %v160_v54, %v487_v26  ;;  %v363_v56 = vpop.f32.mrf.mxu1 }
  0xd8   :  { %296 = vst [vmem:[%s582_s3 + $0x10] sm:$0xff] %v256_v53  ;;  %v271_v57 = vadd.f32 %v363_v56, %v47_v42  ;;  %v162_v58 = vpop.f32.mrf.mxu0 }
  0xd9   :  { %303 = vst [vmem:[%s582_s3 + $0x48] sm:$0xff] %v161_v55  ;;  %v163_v59 = vadd.f32 %v162_v58, %v489_v27  ;;  %v265_v60 = vpop.f32.mrf.mxu1 }
  0xda   :  { %305 = vst [vmem:[%s582_s3 + $0x58] sm:$0xff] %v271_v57  ;;  %v266_v61 = vadd.f32 %v265_v60, %v47_v42  ;;  %v166_v62 = vpop.f32.mrf.mxu0 }
  0xdb   :  { %304 = vst [vmem:[%s582_s3 + $0x50] sm:$0xff] %v163_v59  ;;  %v167_v63 = vadd.f32 %v166_v62, %v487_v26  ;;  %v366_v0 = vpop.f32.mrf.mxu1 }
  0xdc   :  { %302 = vst [vmem:[%s582_s3 + $0x40] sm:$0xff] %v266_v61  ;;  %v281_v1 = vadd.f32 %v366_v0, %v47_v42  ;;  %v168_v2 = vpop.f32.mrf.mxu0 }
  0xdd   :  { %306 = vst [vmem:[%s582_s3 + $0x60] sm:$0xff] %v167_v63  ;;  %v169_v3 = vadd.f32 %v168_v2, %v489_v27  ;;  %v275_v4 = vpop.f32.mrf.mxu1 }
  0xde   :  { %311 = vst [vmem:[%s582_s3 + $0x88] sm:$0xff] %v281_v1  ;;  %v276_v5 = vadd.f32 %v275_v4, %v47_v42  ;;  %v172_v6 = vpop.f32.mrf.mxu0 }
  0xdf   :  { %307 = vst [vmem:[%s582_s3 + $0x68] sm:$0xff] %v169_v3  ;;  %v173_v7 = vadd.f32 %v172_v6, %v487_v26  ;;  %v369_v8 = vpop.f32.mrf.mxu1 }
  0xe0   :  { %308 = vst [vmem:[%s582_s3 + $0x70] sm:$0xff] %v276_v5  ;;  %v291_v9 = vadd.f32 %v369_v8, %v47_v42  ;;  %v174_v10 = vpop.f32.mrf.mxu0 }
  0xe1   :  { %309 = vst [vmem:[%s582_s3 + $0x78] sm:$0xff] %v173_v7  ;;  %v175_v11 = vadd.f32 %v174_v10, %v489_v27  ;;  %v285_v12 = vpop.f32.mrf.mxu1 }
  0xe2   :  { %317 = vst [vmem:[%s582_s3 + $0xb8] sm:$0xff] %v291_v9  ;;  %v286_v13 = vadd.f32 %v285_v12, %v47_v42 }
  0xe3   :  { %310 = vst [vmem:[%s582_s3 + $0x80] sm:$0xff] %v175_v11 }
  0xe4   :  { %314 = vst [vmem:[%s582_s3 + $0xa0] sm:$0xff] %v286_v13 }

// kernel: gru_user_encoder.3
= control target key start
LH: loop header
LB: loop body
LE: loop exit
PB: predicated region body
PF: predicated region fallthrough
CT: control target
= control target key end

     0   :  { %v8730_v3 = vmov 0.0   ;;  %vm6327_vm0 = vmmov 0   ;;  %v89_v50 = vlaneseq  ;;  %v6328_v52 = vmov 1966171168   ;;  %s8725_s2 = inlined_call_operand.vmem [shape: f32[128,384], index: 2, kind: input, shape index: {}]   ;;  %s8726_s1 = inlined_call_operand.vmem [shape: f32[8,128], index: 1, kind: input, shape index: {}]   ;;  %s8727_s3 = inlined_call_operand.vmem [shape: f32[1,384], index: 3, kind: input, shape index: {}]   ;;  %s8728_s0 = inlined_call_operand.vmem [shape: f32[8,8,384], index: 0, kind: input, shape index: {}]   ;;  %s8729_s4 = inlined_call_operand.vmem [shape: f32[8,128], index: 4, kind: output, shape index: {}]  }
   0x1   :  { %v6357_v0 = vld [vmem:[%s8725_s2 + $0x170] sm:$0xff]  ;;  %v6362_v1 = vld [vmem:[%s8725_s2 + $0x168] sm:$0xff]  ;;  %v6367_v2 = vld [vmem:[%s8725_s2 + $0x158] sm:$0xff]  ;;  %168 = vmatprep.mubr.f32.mxu0 %v8730_v3  ;;  %5258 = vmatprep.subr.mxu1 %v8730_v3  ;;  %v248_v53 = vunpack.c.l.s4 %v6328_v52 }
   0x2   :  { %104 = vmatprep.subr.mxu0 %v6357_v0  ;;  %v6375_v4 = vld [vmem:[%s8725_s2 + $0x150] sm:$0xff]  ;;  %5290 = vmatprep.mubr.msk.f32.mxu1 %vm6327_vm0, %v8730_v3  ;;  %v6383_v5 = vld [vmem:[%s8725_s2 + $0x140] sm:$0xff]  ;;  %v6389_v6 = vld [vmem:[%s8725_s2 + $0x138] sm:$0xff]  ;;  %v6737_v51 = vshrl.u32 %v89_v50, 7 }
   0x3   :  { %105 = vmatpush1.msra.mxu0 %v6362_v1  ;;  %v6395_v7 = vld [vmem:[%s8725_s2 + $0x128] sm:$0xff]  ;;  %v6401_v8 = vld [vmem:[%s8725_s2 + $0x120] sm:$0xff]  ;;  %v6407_v9 = vld [vmem:[%s8725_s2 + $0x110] sm:$0xff]  ;;  %v249_v56 = vunpack.c.0.s8 %v248_v53 }
   0x4   :  { %106 = vmatprep.subr.mxu0 %v6367_v2  ;;  %v6413_v10 = vld [vmem:[%s8725_s2 + $0x108] sm:$0xff]  ;;  %v6419_v11 = vld [vmem:[%s8725_s2 + $0xf8] sm:$0xff]  ;;  %v6425_v12 = vld [vmem:[%s8725_s2 + $0xf0] sm:$0xff]  ;;  %v91_v54 = vsub.s32 0, %v6737_v51  ;;  %v95_v57 = vsub.s32 1, %v6737_v51 }
   0x5   :  { %107 = vmatpush1.msra.mxu0 %v6375_v4  ;;  %v6431_v13 = vld [vmem:[%s8725_s2 + $0xe0] sm:$0xff]  ;;  %v6437_v14 = vld [vmem:[%s8725_s2 + $0xd8] sm:$0xff]  ;;  %v6453_v17 = vld [vmem:[%s8725_s2 + $0xc8] sm:$0xff]  ;;  %v6750_v59 = vsub.s32 %v249_v56, %v6737_v51 }
   0x6   :  { %108 = vmatprep.subr.mxu0 %v6383_v5  ;;  %8829 = vst [vmem:[#allocation3_spill] sm:$0xff] %v6437_v14  ;;  %v6442_v15 = vld [vmem:[%s8725_s2 + $0x178] sm:$0xff]  ;;  %v6447_v16 = vld [vmem:[%s8725_s2 + $0x160] sm:$0xff]  ;;  %8830 = vst [vmem:[#allocation4_spill] sm:$0xff] %v6453_v17 }
   0x7   :  { %109 = vmatpush1.msra.mxu0 %v6389_v6  ;;  %5259 = vmatpush3.msra.mxu1 %v6442_v15  ;;  %v6460_v18 = vld [vmem:[%s8725_s2 + $0xc0] sm:$0xff]  ;;  %v6467_v19 = vld [vmem:[%s8725_s2 + $0xb0] sm:$0xff]  ;;  %v6473_v20 = vld [vmem:[%s8725_s2 + $0x148] sm:$0xff] }
   0x8   :  { %110 = vmatprep.subr.mxu0 %v6395_v7  ;;  %8831 = vst [vmem:[#allocation5_spill] sm:$0xff] %v6460_v18  ;;  %5260 = vmatprep.subr.mxu1 %v8730_v3  ;;  %8832 = vst [vmem:[#allocation6_spill] sm:$0xff] %v6467_v19  ;;  %v6479_v21 = vld [vmem:[%s8725_s2 + $0xa8] sm:$0xff]  ;;  %v6485_v22 = vld [vmem:[%s8725_s2 + $0x98] sm:$0xff] }
   0x9   :  { %111 = vmatpush1.msra.mxu0 %v6401_v8  ;;  %5261 = vmatpush3.msra.mxu1 %v6447_v16  ;;  %8833 = vst [vmem:[#allocation7_spill] sm:$0xff] %v6479_v21  ;;  %8834 = vst [vmem:[#allocation8_spill] sm:$0xff] %v6485_v22  ;;  %v6491_v23 = vld [vmem:[%s8725_s2 + $0x130] sm:$0xff]  ;;  %v6504_v25 = vld [vmem:[%s8725_s2 + $0x80] sm:$0xff] }
   0xa   :  { %112 = vmatprep.subr.mxu0 %v6407_v9  ;;  %5262 = vmatprep.subr.mxu1 %v8730_v3  ;;  %v6497_v24 = vld [vmem:[%s8725_s2 + $0x90] sm:$0xff]  ;;  %8836 = vst [vmem:[#allocation10_spill] sm:$0xff] %v6504_v25  ;;  %v6510_v26 = vld [vmem:[%s8725_s2 + $0x118] sm:$0xff]  ;;  %v6523_v28 = vld [vmem:[%s8725_s2 + $0x68] sm:$0xff] }
   0xb   :  { %113 = vmatpush1.msra.mxu0 %v6413_v10  ;;  %8835 = vst [vmem:[#allocation9_spill] sm:$0xff] %v6497_v24  ;;  %5263 = vmatpush3.msra.mxu1 %v6473_v20  ;;  %v6516_v27 = vld [vmem:[%s8725_s2 + $0x78] sm:$0xff]  ;;  %8838 = vst [vmem:[#allocation12_spill] sm:$0xff] %v6523_v28  ;;  %v6529_v29 = vld [vmem:[%s8725_s2 + $0x100] sm:$0xff] }
   0xc   :  { %114 = vmatprep.subr.mxu0 %v6419_v11  ;;  %5264 = vmatprep.subr.mxu1 %v8730_v3  ;;  %8837 = vst [vmem:[#allocation11_spill] sm:$0xff] %v6516_v27  ;;  %v6535_v30 = vld [vmem:[%s8725_s2 + $0x60] sm:$0xff]  ;;  %v6542_v31 = vld [vmem:[%s8725_s2 + $0x50] sm:$0xff]  ;;  %v6548_v32 = vld [vmem:[%s8725_s2 + $0xe8] sm:$0xff] }
   0xd   :  { %115 = vmatpush1.msra.mxu0 %v6425_v12  ;;  %5265 = vmatpush3.msra.mxu1 %v6491_v23  ;;  %8839 = vst [vmem:[#allocation13_spill] sm:$0xff] %v6535_v30  ;;  %8840 = vst [vmem:[#allocation14_spill] sm:$0xff] %v6542_v31  ;;  %v6554_v33 = vld [vmem:[%s8725_s2 + $0x48] sm:$0xff]  ;;  %v6561_v34 = vld [vmem:[%s8725_s2 + $0x38] sm:$0xff] }
   0xe   :  { %116 = vmatprep.subr.mxu0 %v6431_v13  ;;  %5266 = vmatprep.subr.mxu1 %v8730_v3  ;;  %8841 = vst [vmem:[#allocation15_spill] sm:$0xff] %v6548_v32  ;;  %8842 = vst [vmem:[#allocation16_spill] sm:$0xff] %v6554_v33  ;;  %v6567_v35 = vld [vmem:[%s8725_s2 + $0xd0] sm:$0xff]  ;;  %v6580_v37 = vld [vmem:[%s8725_s2 + $0x20] sm:$0xff] }
   0xf   :  { %117 = vmatpush1.msra.mxu0 %v6437_v14  ;;  %5267 = vmatpush3.msra.mxu1 %v6510_v26  ;;  %8843 = vst [vmem:[#allocation17_spill] sm:$0xff] %v6561_v34  ;;  %8844 = vst [vmem:[#allocation18_spill] sm:$0xff] %v6567_v35  ;;  %v6573_v36 = vld [vmem:[%s8725_s2 + $0x30] sm:$0xff]  ;;  %v6586_v38 = vld [vmem:[%s8725_s2 + $0xb8] sm:$0xff] }
  0x10   :  { %118 = vmatprep.subr.mxu0 %v6453_v17  ;;  %5268 = vmatprep.subr.mxu1 %v8730_v3  ;;  %8845 = vst [vmem:[#allocation19_spill] sm:$0xff] %v6573_v36  ;;  %8846 = vst [vmem:[#allocation20_spill] sm:$0xff] %v6580_v37  ;;  %v6592_v39 = vld [vmem:[%s8725_s2 + $0x18] sm:$0xff]  ;;  %v6599_v40 = vld [vmem:[%s8725_s2 + $0x8] sm:$0xff] }
  0x11   :  { %119 = vmatpush1.msra.mxu0 %v6460_v18  ;;  %5269 = vmatpush3.msra.mxu1 %v6529_v29  ;;  %8847 = vst [vmem:[#allocation21_spill] sm:$0xff] %v6586_v38  ;;  %8848 = vst [vmem:[#allocation22_spill] sm:$0xff] %v6592_v39  ;;  %v6605_v41 = vld [vmem:[%s8725_s2 + $0xa0] sm:$0xff]  ;;  %v6624_v44 = vld [vmem:[%s8725_s2 + $0x88] sm:$0xff] }
  0x12   :  { %120 = vmatprep.subr.mxu0 %v6467_v19  ;;  %5270 = vmatprep.subr.mxu1 %v8730_v3  ;;  %8849 = vst [vmem:[#allocation23_spill] sm:$0xff] %v6599_v40  ;;  %8850 = vst [vmem:[#allocation24_spill] sm:$0xff] %v6605_v41  ;;  %v6611_v42 = vld [vmem:[%s8725_s2] sm:$0xff]  ;;  %v6633_v45 = vld [vmem:[%s8725_s2 + $0x70] sm:$0xff] }
  0x13   :  { %121 = vmatpush1.msra.mxu0 %v6479_v21  ;;  %5271 = vmatpush3.msra.mxu1 %v6548_v32  ;;  %8851 = vst [vmem:[#allocation25_spill] sm:$0xff] %v6611_v42  ;;  %v6618_v43 = vld [vmem:[%s8726_s1] sm:$0xff]  ;;  %8852 = vst [vmem:[#allocation26_spill] sm:$0xff] %v6624_v44  ;;  %v6641_v46 = vld [vmem:[%s8725_s2 + $0x58] sm:$0xff] }
  0x14   :  { %122 = vmatprep.subr.mxu0 %v6485_v22  ;;  %5272 = vmatprep.subr.mxu1 %v8730_v3  ;;  %8853 = vst [vmem:[#allocation27_spill] sm:$0xff] %v6633_v45  ;;  %8854 = vst [vmem:[#allocation28_spill] sm:$0xff] %v6641_v46  ;;  %v6650_v47 = vld [vmem:[%s8725_s2 + $0x40] sm:$0xff]  ;;  %v6659_v48 = vld [vmem:[%s8725_s2 + $0x28] sm:$0xff] }
  0x15   :  { %123 = vmatpush1.msra.mxu0 %v6497_v24  ;;  %5273 = vmatpush3.msra.mxu1 %v6567_v35  ;;  %8855 = vst [vmem:[#allocation29_spill] sm:$0xff] %v6650_v47  ;;  %8856 = vst [vmem:[#allocation30_spill] sm:$0xff] %v6659_v48  ;;  %v6668_v49 = vld [vmem:[%s8725_s2 + $0x10] sm:$0xff]  ;;  %v6743_v55 = vld [vmem:[%s8727_s3] sm:$0x7] }
  0x16   :  { %124 = vmatprep.subr.mxu0 %v6504_v25  ;;  %5274 = vmatprep.subr.mxu1 %v8730_v3  ;;  %8857 = vst [vmem:[#allocation31_spill] sm:$0xff] %v6668_v49  ;;  %v6747_v58 = vrot.slane %v6743_v55, %v91_v54  ;;  %v6755_v60 = vld [vmem:[%s8728_s0] ss:$8 sm:$0x7]  ;;  %v6758_v61 = vrot.slane %v6743_v55, %v95_v57 }
  0x17   :  { %125 = vmatpush1.msra.mxu0 %v6516_v27  ;;  %5275 = vmatpush3.msra.mxu1 %v6586_v38  ;;  %v6763_v62 = vld [vmem:[%s8728_s0 + $0x18] ss:$8 sm:$0x7] }
  0x18   :  { %126 = vmatprep.subr.mxu0 %v6523_v28  ;;  %5276 = vmatprep.subr.mxu1 %v8730_v3  ;;  %8858 = vst [vmem:[#allocation32_spill] sm:$0xff] %v6747_v58  ;;  %8859 = vst [vmem:[#allocation33_spill] sm:$0xff] %v6758_v61  ;;  %v6768_v63 = vld [vmem:[%s8728_s0 + $0x30] ss:$8 sm:$0x7] }
  0x19   :  { %127 = vmatpush1.msra.mxu0 %v6535_v30  ;;  %5277 = vmatpush3.msra.mxu1 %v6605_v41  ;;  %v6773_v50 = vld [vmem:[%s8728_s0 + $0x48] ss:$8 sm:$0x7] }
  0x1a   :  { %128 = vmatprep.subr.mxu0 %v6542_v31  ;;  %5278 = vmatprep.subr.mxu1 %v8730_v3  ;;  %v6778_v52 = vld [vmem:[%s8728_s0 + $0x60] ss:$8 sm:$0x7] }
  0x1b   :  { %129 = vmatpush1.msra.mxu0 %v6554_v33  ;;  %5279 = vmatpush3.msra.mxu1 %v6624_v44  ;;  %v6784_v54 = vld [vmem:[%s8728_s0 + $0x78] ss:$8 sm:$0x7] }
  0x1c   :  { %130 = vmatprep.subr.mxu0 %v6561_v34  ;;  %5280 = vmatprep.subr.mxu1 %v8730_v3  ;;  %v6789_v56 = vld [vmem:[%s8728_s0 + $0x90] ss:$8 sm:$0x7] }
  0x1d   :  { %131 = vmatpush1.msra.mxu0 %v6573_v36  ;;  %5281 = vmatpush3.msra.mxu1 %v6633_v45 }
  0x1e   :  { %132 = vmatprep.subr.mxu0 %v6580_v37  ;;  %5282 = vmatprep.subr.mxu1 %v8730_v3 }
  0x1f   :  { %133 = vmatpush1.msra.mxu0 %v6592_v39  ;;  %5283 = vmatpush3.msra.mxu1 %v6641_v46 }
  0x20   :  { %134 = vmatprep.subr.mxu0 %v6599_v40  ;;  %5284 = vmatprep.subr.mxu1 %v8730_v3 }
  0x21   :  { %135 = vmatpush1.msra.mxu0 %v6611_v42  ;;  %5285 = vmatpush3.msra.mxu1 %v6650_v47 }
  0x22   :  { %169 = vmatmul.mubr.f32.vlgmr.msra.gmra.mxu0 %v6618_v43  ;;  %759 = vmatprep.subr.mxu0 %v6357_v0 }
  0x23   :  { %760 = vmatpush1.msra.mxu0 %v6362_v1  ;;  %5286 = vmatprep.subr.mxu1 %v8730_v3 }
  0x24   :  { %761 = vmatprep.subr.mxu0 %v6367_v2  ;;  %5287 = vmatpush3.msra.mxu1 %v6659_v48 }
  0x25   :  { %762 = vmatpush1.msra.mxu0 %v6375_v4  ;;  %5288 = vmatprep.subr.mxu1 %v8730_v3 }
  0x26   :  { %763 = vmatprep.subr.mxu0 %v6383_v5  ;;  %5289 = vmatpush3.msra.mxu1 %v6668_v49 }
  0x27   :  { %764 = vmatpush1.msra.mxu0 %v6389_v6  ;;  %5291 = vmatmul.mubr.f32.vlgmr.msra.gmra.mxu1 %v6618_v43 }
  0x28   :  { %765 = vmatprep.subr.mxu0 %v6395_v7  ;;  %5293 = vmatprep.subr.mxu1 %v8730_v3 }
  0x29   :  { %766 = vmatpush1.msra.mxu0 %v6401_v8  ;;  %5294 = vmatpush3.msra.mxu1 %v6442_v15 }
  0x2a   :  { %767 = vmatprep.subr.mxu0 %v6407_v9  ;;  %5295 = vmatprep.subr.mxu1 %v8730_v3 }
  0x2b   :  { %768 = vmatpush1.msra.mxu0 %v6413_v10  ;;  %5296 = vmatpush3.msra.mxu1 %v6447_v16 }
  0x2c   :  { %769 = vmatprep.subr.mxu0 %v6419_v11  ;;  %5297 = vmatprep.subr.mxu1 %v8730_v3 }
  0x2d   :  { %770 = vmatpush1.msra.mxu0 %v6425_v12  ;;  %5298 = vmatpush3.msra.mxu1 %v6473_v20 }
  0x2e   :  { %771 = vmatprep.subr.mxu0 %v6431_v13  ;;  %5299 = vmatprep.subr.mxu1 %v8730_v3 }
  0x2f   :  { %772 = vmatpush1.msra.mxu0 %v6437_v14  ;;  %5300 = vmatpush3.msra.mxu1 %v6491_v23 }
  0x30   :  { %773 = vmatprep.subr.mxu0 %v6453_v17  ;;  %5301 = vmatprep.subr.mxu1 %v8730_v3 }
  0x31   :  { %774 = vmatpush1.msra.mxu0 %v6460_v18  ;;  %5302 = vmatpush3.msra.mxu1 %v6510_v26 }
  0x32   :  { %775 = vmatprep.subr.mxu0 %v6467_v19  ;;  %5303 = vmatprep.subr.mxu1 %v8730_v3 }
  0x33   :  { %776 = vmatpush1.msra.mxu0 %v6479_v21  ;;  %5304 = vmatpush3.msra.mxu1 %v6529_v29 }
  0x34   :  { %777 = vmatprep.subr.mxu0 %v6485_v22  ;;  %5305 = vmatprep.subr.mxu1 %v8730_v3 }
  0x35   :  { %778 = vmatpush1.msra.mxu0 %v6497_v24  ;;  %5306 = vmatpush3.msra.mxu1 %v6548_v32 }
  0x36   :  { %779 = vmatprep.subr.mxu0 %v6504_v25  ;;  %5307 = vmatprep.subr.mxu1 %v8730_v3 }
  0x37   :  { %780 = vmatpush1.msra.mxu0 %v6516_v27  ;;  %5308 = vmatpush3.msra.mxu1 %v6567_v35 }
  0x38   :  { %781 = vmatprep.subr.mxu0 %v6523_v28  ;;  %5309 = vmatprep.subr.mxu1 %v8730_v3 }
  0x39   :  { %782 = vmatpush1.msra.mxu0 %v6535_v30  ;;  %5310 = vmatpush3.msra.mxu1 %v6586_v38 }
  0x3a   :  { %783 = vmatprep.subr.mxu0 %v6542_v31  ;;  %5311 = vmatprep.subr.mxu1 %v8730_v3 }
  0x3b   :  { %784 = vmatpush1.msra.mxu0 %v6554_v33  ;;  %5312 = vmatpush3.msra.mxu1 %v6605_v41 }
  0x3c   :  { %785 = vmatprep.subr.mxu0 %v6561_v34  ;;  %5313 = vmatprep.subr.mxu1 %v8730_v3 }
  0x3d   :  { %786 = vmatpush1.msra.mxu0 %v6573_v36  ;;  %5314 = vmatpush3.msra.mxu1 %v6624_v44 }
  0x3e   :  { %787 = vmatprep.subr.mxu0 %v6580_v37  ;;  %5315 = vmatprep.subr.mxu1 %v8730_v3  ;;  %v371_v37 = vrot.slane %v6778_v52, 1 }
  0x3f   :  { %788 = vmatpush1.msra.mxu0 %v6592_v39  ;;  %5316 = vmatpush3.msra.mxu1 %v6633_v45  ;;  %v370_v39 = vrot.slane %v6773_v50, 1 }
  0x40   :  { %789 = vmatprep.subr.mxu0 %v6599_v40  ;;  %823 = vmatprep.mubr.f32.mxu0 %v8730_v3  ;;  %v368_v40 = vrot.slane %v6763_v62, 1 }
  0x41   :  { %790 = vmatpush1.msra.mxu0 %v6611_v42  ;;  %5317 = vmatprep.subr.mxu1 %v8730_v3 }
  0x42   :  { %5325 = vmatprep.mubr.msk.f32.mxu1 %vm6327_vm0, %v8730_v3  ;;  %5318 = vmatpush3.msra.mxu1 %v6641_v46 }
  0x43   :  { %1356 = vmatprep.subr.mxu0 %v6357_v0  ;;  %5319 = vmatprep.subr.mxu1 %v8730_v3 }
  0x44   :  { %5320 = vmatpush3.msra.mxu1 %v6650_v47 }
  0x45   :  { %5321 = vmatprep.subr.mxu1 %v8730_v3 }
  0x46   :  { %5322 = vmatpush3.msra.mxu1 %v6659_v48  ;;  %v369_v48 = vrot.slane %v6768_v63, 1 }
  0x47   :  { %5323 = vmatprep.subr.mxu1 %v8730_v3 }
  0x48   :  { %5324 = vmatpush3.msra.mxu1 %v6668_v49 }
  0x49   :  { %5328 = vmatprep.subr.mxu1 %v8730_v3  ;;  %v6794_v3 = vld [vmem:[%s8728_s0 + $0xa8] ss:$8 sm:$0x7] }
  0xe2   :  { %v170_v0 = vpop.f32.mrf.mxu0 }
  0xe3   :  { %v171_v53 = vadd.f32 %v170_v0, %v6747_v58  ;;  %v367_v58 = vrot.slane %v6755_v60, 1 }
  0xe4   :  { %v172_v57 = vpop.f32.mrf.mxu0 }
  0xe5   :  { %v246_v49 = vcombine.high %v171_v53, %v171_v53  ;;  %v253_v42 = vrot.slane %v171_v53, %v6750_v59  ;;  %v173_v0 = vadd.f32 %v172_v57, %v6758_v61  ;;  %v372_v53 = vrot.slane %v6784_v54, 1 }
  0xe6   :  { %v373_v57 = vrot.slane %v6789_v56, 1  ;;  %v374_v61 = vrot.slane %v6794_v3, 1 }
  0xe7   :  { %v260_v47 = vrot.slane %v246_v49, %v6750_v59  ;;  %v261_v36 = vcombine.high %v253_v42, %v253_v42  ;;  %v269_v34 = vrot.slane %v253_v42, %v6750_v59  ;;  %v384_v46 = vcombine.high %v173_v0, %v173_v0 }
  0xe8   :  { %v391_v33 = vrot.slane %v173_v0, %v6750_v59 }
  0xe9   :  { %v262_v31 = vcombine.high %v260_v47, %v260_v47  ;;  %v276_v45 = vrot.slane %v260_v47, %v6750_v59  ;;  %v283_v30 = vrot.slane %v261_v36, %v6750_v59  ;;  %v291_v28 = vcombine.high %v269_v34, %v269_v34 }
  0xea   :  { %v303_v49 = vadd.f32 %v269_v34, %v6755_v60  ;;  %v398_v44 = vrot.slane %v384_v46, %v6750_v59  ;;  %v399_v42 = vcombine.high %v391_v33, %v391_v33  ;;  %v407_v27 = vrot.slane %v391_v33, %v6750_v59  ;;  %v241_v33 = vpop.f32.mrf.mxu1 }
  0xeb   :  { %v290_v25 = vrot.slane %v262_v31, %v6750_v59  ;;  %v292_v41 = vcombine.high %v276_v45, %v276_v45  ;;  %v293_v24 = vcombine.high %v283_v30, %v283_v30  ;;  %v304_v22 = vadd.f32 %v6763_v62, %v283_v30 }
  0xec   :  { %v305_v0 = vadd.f32 %v6768_v63, %v291_v28  ;;  %v307_v47 = vadd.f32 %v6778_v52, %v276_v45  ;;  %v4938_v38 = vmul.f32 -1.442695, %v303_v49  ;;  %v400_v36 = vcombine.high %v398_v44, %v398_v44  ;;  %v5292_v45 = vpop.f32.mrf.mxu1 }
  0xed   :  { %v294_v21 = vcombine.high %v290_v25, %v290_v25  ;;  %v306_v34 = vadd.f32 %v6773_v50, %v293_v24  ;;  %v308_v46 = vadd.f32 %v6784_v54, %v290_v25  ;;  %v309_v19 = vadd.f32 %v6789_v56, %v292_v41 }
  0xee   :  { %5542 = vpow2.f32 %v4938_v38  ;;  %v4939_v31 = vmul.f32 -1.442695, %v304_v22  ;;  %v4940_v35 = vmul.f32 -1.442695, %v305_v0  ;;  %v4942_v18 = vmul.f32 -1.442695, %v307_v47 }
  0xef   :  { %v310_v30 = vadd.f32 %v6794_v3, %v294_v21  ;;  %v4941_v17 = vmul.f32 -1.442695, %v306_v34  ;;  %v4943_v28 = vmul.f32 -1.442695, %v308_v46  ;;  %v4944_v32 = vmul.f32 -1.442695, %v309_v19 }
  0xf0   :  { %5544 = vpow2.f32 %v4939_v31  ;;  %v414_v49 = vrot.slane %v398_v44, %v6750_v59  ;;  %v421_v24 = vrot.slane %v399_v42, %v6750_v59  ;;  %v428_v25 = vrot.slane %v400_v36, %v6750_v59 }
  0xf1   :  { %5546 = vpow2.f32 %v4940_v35  ;;  %v4945_v41 = vmul.f32 -1.442695, %v310_v30  ;;  %v429_v14 = vcombine.high %v407_v27, %v407_v27  ;;  %v441_v38 = vadd.f32 %v407_v27, %v367_v58 }
  0xf2   :  { %5548 = vpow2.f32 %v4941_v17  ;;  %v430_v22 = vcombine.high %v414_v49, %v414_v49  ;;  %v431_v0 = vcombine.high %v421_v24, %v421_v24  ;;  %v432_v47 = vcombine.high %v428_v25, %v428_v25 }
  0xf3   :  { %5550 = vpow2.f32 %v4942_v18  ;;  %v442_v21 = vadd.f32 %v421_v24, %v368_v40  ;;  %v443_v34 = vadd.f32 %v429_v14, %v369_v48  ;;  %v445_v19 = vadd.f32 %v414_v49, %v371_v37 }
  0xf4   :  { %5552 = vpow2.f32 %v4943_v28  ;;  %v444_v46 = vadd.f32 %v431_v0, %v370_v39  ;;  %v446_v31 = vadd.f32 %v428_v25, %v372_v53  ;;  %v99_v44 = vsub.s32 2, %v6737_v51 }
  0xf5   :  { %5554 = vpow2.f32 %v4944_v32  ;;  %v447_v42 = vadd.f32 %v430_v22, %v373_v57  ;;  %v4946_v36 = vmul.f32 -1.442695, %v441_v38  ;;  %v4947_v35 = vmul.f32 -1.442695, %v442_v21 }
  0xf6   :  { %5556 = vpow2.f32 %v4945_v41  ;;  %v4948_v30 = vmul.f32 -1.442695, %v443_v34  ;;  %v4949_v27 = vmul.f32 -1.442695, %v444_v46  ;;  %v448_v17 = vadd.f32 %v432_v47, %v374_v61 }
  0xf7   :  { %5558 = vpow2.f32 %v4946_v36  ;;  %v4950_v58 = vmul.f32 -1.442695, %v445_v19  ;;  %v4951_v18 = vmul.f32 -1.442695, %v446_v31  ;;  %v6827_v14 = vrot.slane %v6743_v55, %v99_v44 }
  0xf8   :  { %5560 = vpow2.f32 %v4947_v35  ;;  %v4952_v37 = vmul.f32 -1.442695, %v447_v42  ;;  %v4953_v32 = vmul.f32 -1.442695, %v448_v17 }
  0xf9   :  { %5562 = vpow2.f32 %v4948_v30  ;;  %v242_v48 = vadd.f32 %v241_v33, %v6827_v14 }
  0xfa   :  { %5564 = vpow2.f32 %v4949_v27 }
  0xfb   :  { %v5543_v39 = vpop.eup %5542  ;;  %5566 = vpow2.f32 %v4950_v58  ;;  %v498_v49 = vcombine.high %v242_v48, %v242_v48  ;;  %v505_v24 = vrot.slane %v242_v48, %v6750_v59 }
  0xfc   :  { %v335_v40 = vadd.f32 1.0, %v5543_v39  ;;  %5568 = vpow2.f32 %v4951_v18  ;;  %v612_v39 = vcombine.high %v6618_v43, %v6618_v43 }
  0xfd   :  { %v5545_v51 = vpop.eup %5544  ;;  %5570 = vpow2.f32 %v4952_v37  ;;  %v512_v34 = vrot.slane %v498_v49, %v6750_v59  ;;  %v513_v19 = vcombine.high %v505_v24, %v505_v24  ;;  %v521_v30 = vrot.slane %v505_v24, %v6750_v59 }
  0xfe   :  { %v5547_v61 = vpop.eup %5546  ;;  %v336_v53 = vadd.f32 1.0, %v5545_v51  ;;  %5572 = vrcp.f32 %v335_v40 }
  0xff   :  { %v5549_v57 = vpop.eup %5548  ;;  %v337_v28 = vadd.f32 1.0, %v5547_v61  ;;  %5574 = vpow2.f32 %v4953_v32  ;;  %v514_v58 = vcombine.high %v512_v34, %v512_v34  ;;  %v535_v18 = vrot.slane %v513_v19, %v6750_v59 }
 0x100   :  { %v5551_v55 = vpop.eup %5550  ;;  %v338_v45 = vadd.f32 1.0, %v5549_v57  ;;  %5576 = vrcp.f32 %v336_v53  ;;  %v6838_v32 = vrot.slane %v6618_v43, %v6750_v59  ;;  %v563_v61 = vrot.slane %v6755_v60, 2 }
 0x101   :  { %v5553_v25 = vpop.eup %5552  ;;  %v339_v41 = vadd.f32 1.0, %v5551_v55  ;;  %5578 = vrcp.f32 %v337_v28  ;;  %v564_v53 = vrot.slane %v6763_v62, 2  ;;  %v528_v55 = vrot.slane %v512_v34, %v6750_v59 }
 0x102   :  { %v5555_v38 = vpop.eup %5554  ;;  %v340_v22 = vadd.f32 1.0, %v5553_v25  ;;  %5580 = vrcp.f32 %v338_v45  ;;  %v543_v45 = vcombine.high %v521_v30, %v521_v30  ;;  %v542_v43 = vrot.slane %v514_v58, %v6750_v59 }
 0x103   :  { %v5557_v33 = vpop.eup %5556  ;;  %v341_v0 = vadd.f32 1.0, %v5555_v38  ;;  %5582 = vrcp.f32 %v339_v41  ;;  %v545_v24 = vcombine.high %v535_v18, %v535_v18  ;;  %v566_v60 = vrot.slane %v6773_v50, 2 }
 0x104   :  { %v5559_v47 = vpop.eup %5558  ;;  %v342_v21 = vadd.f32 1.0, %v5557_v33  ;;  %5584 = vrcp.f32 %v340_v22  ;;  %v565_v22 = vrot.slane %v6768_v63, 2  ;;  %v544_v34 = vcombine.high %v528_v55, %v528_v55 }
 0x105   :  { %v5561_v46 = vpop.eup %5560  ;;  %5586 = vrcp.f32 %v341_v0  ;;  %v473_v31 = vadd.f32 1.0, %v5559_v47  ;;  %v567_v0 = vrot.slane %v6778_v52, 2 }
 0x106   :  { %v5563_v44 = vpop.eup %5562  ;;  %5588 = vrcp.f32 %v342_v21  ;;  %v474_v42 = vadd.f32 1.0, %v5561_v46  ;;  %v568_v46 = vrot.slane %v6784_v54, 2  ;;  %v626_v54 = vrot.slane %v612_v39, %v6750_v59 }
 0x107   :  { %v5565_v36 = vpop.eup %5564  ;;  %v475_v35 = vadd.f32 1.0, %v5563_v44  ;;  %5590 = vrcp.f32 %v473_v31  ;;  %v546_v44 = vcombine.high %v542_v43, %v542_v43 }
 0x108   :  { %v5567_v27 = vpop.eup %5566  ;;  %v476_v17 = vadd.f32 1.0, %v5565_v36  ;;  %5592 = vrcp.f32 %v474_v42 }
 0x109   :  { %v5569_v37 = vpop.eup %5568  ;;  %v477_v40 = vadd.f32 1.0, %v5567_v27  ;;  %5594 = vrcp.f32 %v475_v35  ;;  %v569_v35 = vrot.slane %v6789_v56, 2 }
 0x10a   :  { %v5571_v48 = vpop.eup %5570  ;;  %v478_v51 = vadd.f32 1.0, %v5569_v37  ;;  %5596 = vrcp.f32 %v476_v17  ;;  %v570_v17 = vrot.slane %v6794_v3, 2 }
 0x10b   :  { %v5573_v57 = vpop.eup %5572  ;;  %v479_v28 = vadd.f32 1.0, %v5571_v48  ;;  %5598 = vrcp.f32 %v477_v40 }
 0x10c   :  { %v5575_v49 = vpop.eup %5574  ;;  %v555_v25 = vmul.f32 %v5573_v57, %v521_v30  ;;  %5600 = vrcp.f32 %v478_v51 }
 0x10d   :  { %v5577_v41 = vpop.eup %5576  ;;  %v480_v38 = vadd.f32 1.0, %v5575_v49  ;;  %5602 = vrcp.f32 %v479_v28  ;;  %v628_v28 = vcombine.high %v626_v54, %v626_v54 }
 0x10e   :  { %v5579_v62 = vpop.eup %5578  ;;  %v556_v33 = vmul.f32 %v5577_v41, %v535_v18  ;;  %v579_v47 = vadd.f32 %v563_v61, %v555_v25  ;;  %v627_v61 = vcombine.high %v6838_v32, %v6838_v32  ;;  %v642_v25 = vrot.slane %v626_v54, %v6750_v59 }
 0x10f   :  { %v5581_v21 = vpop.eup %5580  ;;  %v557_v19 = vmul.f32 %v5579_v62, %v543_v45  ;;  %v635_v45 = vrot.slane %v6838_v32, %v6750_v59  ;;  %v656_v41 = vrot.slane %v628_v28, %v6750_v59 }
 0x110   :  { %v5583_v31 = vpop.eup %5582  ;;  %v558_v42 = vmul.f32 %v5581_v21, %v545_v24  ;;  %v580_v36 = vadd.f32 %v564_v53, %v556_v33  ;;  %5604 = vtanh.f32 %v579_v47  ;;  %v649_v49 = vrot.slane %v627_v61, %v6750_v59 }
 0x111   :  { %v5585_v63 = vpop.eup %5584  ;;  %5606 = vrcp.f32 %v480_v38  ;;  %v559_v50 = vmul.f32 %v5583_v31, %v528_v55  ;;  %v581_v30 = vadd.f32 %v565_v22, %v557_v19  ;;  %v660_v19 = vcombine.high %v656_v41, %v656_v41 }
 0x112   :  { %v5587_v27 = vpop.eup %5586  ;;  %v560_v52 = vmul.f32 %v5585_v63, %v542_v43  ;;  %v582_v58 = vadd.f32 %v566_v60, %v558_v42  ;;  %5608 = vtanh.f32 %v580_v36  ;;  %v657_v60 = vcombine.high %v635_v45, %v635_v45 }
 0x113   :  { %v5589_v18 = vpop.eup %5588  ;;  %v561_v37 = vmul.f32 %v5587_v27, %v544_v34  ;;  %v583_v40 = vadd.f32 %v567_v0, %v559_v50  ;;  %5610 = vtanh.f32 %v581_v30  ;;  %v659_v62 = vcombine.high %v649_v49, %v649_v49 }
 0x114   :  { %v562_v48 = vmul.f32 %v5589_v18, %v546_v44  ;;  %v584_v51 = vadd.f32 %v568_v46, %v560_v52  ;;  %5612 = vtanh.f32 %v582_v58  ;;  %v5591_v53 = vpop.eup %5590  ;;  %v658_v34 = vcombine.high %v642_v25, %v642_v25 }
 0x115   :  { %v585_v56 = vadd.f32 %v569_v35, %v561_v37  ;;  %5614 = vtanh.f32 %v583_v40  ;;  %v5593_v3 = vpop.eup %5592  ;;  %v595_v33 = vsub.f32 1.0, %v5591_v53  ;;  %v669_v36 = vmul.f32 %v5591_v53, %v635_v45 }
 0x116   :  { %v586_v57 = vadd.f32 %v570_v17, %v562_v48  ;;  %5616 = vtanh.f32 %v584_v51  ;;  %v5595_v55 = vpop.eup %5594  ;;  %v596_v47 = vsub.f32 1.0, %v5593_v3  ;;  %v670_v63 = vmul.f32 %v5593_v3, %v649_v49 }
 0x117   :  { %5618 = vtanh.f32 %v585_v56  ;;  %v5597_v39 = vpop.eup %5596  ;;  %v597_v46 = vsub.f32 1.0, %v5595_v55  ;;  %v671_v27 = vmul.f32 %v5595_v55, %v657_v60 }
 0x118   :  { %5620 = vtanh.f32 %v586_v57  ;;  %v5599_v43 = vpop.eup %5598  ;;  %v598_v44 = vsub.f32 1.0, %v5597_v39  ;;  %v672_v52 = vmul.f32 %v5597_v39, %v659_v62 }
 0x119   :  { %v5601_v24 = vpop.eup %5600  ;;  %v599_v35 = vsub.f32 1.0, %v5599_v43  ;;  %v673_v54 = vmul.f32 %v5599_v43, %v642_v25 }
 0x11a   :  { %v5603_v38 = vpop.eup %5602  ;;  %v600_v58 = vsub.f32 1.0, %v5601_v24  ;;  %v674_v61 = vmul.f32 %v5601_v24, %v656_v41 }
 0x11b   :  { %v601_v48 = vsub.f32 1.0, %v5603_v38  ;;  %v675_v49 = vmul.f32 %v5603_v38, %v658_v34 }
 0x11d   :  { %v5605_v22 = vpop.eup %5604 }
 0x11e   :  { %v5607_v0 = vpop.eup %5606  ;;  %v603_v32 = vmul.f32 %v5605_v22, %v595_v33 }
 0x11f   :  { %v5609_v21 = vpop.eup %5608  ;;  %v602_v53 = vsub.f32 1.0, %v5607_v0  ;;  %v676_v22 = vmul.f32 %v5607_v0, %v660_v19 }
 0x120   :  { %v5611_v31 = vpop.eup %5610  ;;  %v604_v42 = vmul.f32 %v5609_v21, %v596_v47  ;;  %v6860_v56 = vadd.f32 %v669_v36, %v603_v32  ;;  %v8860_v36 = vmov 0.0  }
 0x121   :  { %v5613_v50 = vpop.eup %5612  ;;  %v605_v30 = vmul.f32 %v5611_v31, %v597_v46 }
 0x122   :  { %v5615_v17 = vpop.eup %5614  ;;  %v606_v18 = vmul.f32 %v5613_v50, %v598_v44  ;;  %v6858_v37 = vadd.f32 %v670_v63, %v604_v42  ;;  %v8879_v63 = vld [vmem:[#allocation16_spill] sm:$0xff] }
 0x123   :  { %v5617_v40 = vpop.eup %5616  ;;  %v607_v51 = vmul.f32 %v5615_v17, %v599_v35  ;;  %v6862_v28 = vadd.f32 %v671_v27, %v605_v30  ;;  %v8880_v50 = vld [vmem:[#allocation28_spill] sm:$0xff]  ;;  %v8881_v35 = vld [vmem:[#allocation17_spill] sm:$0xff]  ;;  %v8882_v30 = vld [vmem:[#allocation19_spill] sm:$0xff] }
 0x124   :  { %v5619_v57 = vpop.eup %5618  ;;  %v608_v3 = vmul.f32 %v5617_v40, %v600_v58  ;;  %v6864_v45 = vadd.f32 %v672_v52, %v606_v18  ;;  %v709_v43 = vcombine.low %v6860_v56, %v6858_v37  ;;  %v8883_v27 = vld [vmem:[#allocation29_spill] sm:$0xff]  ;;  %v8884_v52 = vld [vmem:[#allocation20_spill] sm:$0xff]  ;;  %v8885_v17 = vld [vmem:[#allocation22_spill] sm:$0xff] }
 0x125   :  { %v5621_v55 = vpop.eup %5620  ;;  %v609_v39 = vmul.f32 %v5619_v57, %v601_v48  ;;  %v6868_v60 = vadd.f32 %v673_v54, %v607_v51  ;;  %v8886_v58 = vld [vmem:[#allocation30_spill] sm:$0xff]  ;;  %v8887_v18 = vld [vmem:[#allocation23_spill] sm:$0xff]  ;;  %v8888_v54 = vld [vmem:[#allocation25_spill] sm:$0xff] }
 0x126   :  { %v610_v25 = vmul.f32 %v5621_v55, %v602_v53  ;;  %v6870_v24 = vadd.f32 %v674_v61, %v608_v3  ;;  %v710_v41 = vcombine.low %v6862_v28, %v6864_v45  ;;  %v719_v21 = vrot.slane %v709_v43, %v6750_v59  ;;  %v8889_v40 = vld [vmem:[#allocation31_spill] sm:$0xff]  ;;  %v6956_v48 = vld [vmem:[%s8725_s2 + $0x170] sm:$0xff]  ;;  %v8890_v57 = vld [vmem:[#allocation32_spill] sm:$0xff] }
 0x127   :  { %v6874_v62 = vadd.f32 %v675_v49, %v609_v39  ;;  %v6972_v43 = vld [vmem:[%s8728_s0 + $0x19] ss:$8 sm:$0x7] }
 0x128   :  { %v6876_v33 = vadd.f32 %v676_v22, %v610_v25  ;;  %v711_v47 = vcombine.low %v6868_v60, %v6870_v24  ;;  %v726_v38 = vrot.slane %v710_v41, %v6750_v59  ;;  %v6967_v22 = vld [vmem:[%s8728_s0 + $0x1] ss:$8 sm:$0x7] }
 0x12a   :  { %v712_v0 = vcombine.low %v6874_v62, %v6876_v33  ;;  %v733_v34 = vrot.slane %v711_v47, %v6750_v59  ;;  %v741_v46 = vcombine.low %v719_v21, %v726_v38  ;;  %v6979_v38 = vld [vmem:[%s8728_s0 + $0x31] ss:$8 sm:$0x7] }
 0x12b   :  { %v8891_v21 = vld [vmem:[#allocation33_spill] sm:$0xff] }
 0x12c   :  { %v740_v19 = vrot.slane %v712_v0, %v6750_v59  ;;  %v749_v31 = vrot.slane %v741_v46, %v6750_v59  ;;  %v6984_v0 = vld [vmem:[%s8728_s0 + $0x49] ss:$8 sm:$0x7] }
 0x12d   :  { %v6995_v46 = vld [vmem:[%s8728_s0 + $0x79] ss:$8 sm:$0x7] }
 0x12e   :  { %v742_v32 = vcombine.low %v733_v34, %v740_v19  ;;  %v6990_v19 = vld [vmem:[%s8728_s0 + $0x61] ss:$8 sm:$0x7] }
 0x130   :  { %v756_v44 = vrot.slane %v742_v32, %v6750_v59 }
 0x132   :  { %v757_v42 = vcombine.low %v749_v31, %v756_v44 }
 0x134   :  { %824 = vmatmul.mubr.f32.vlgmr.msra.gmra.mxu0 %v757_v42  ;;  %5326 = vmatmul.mubr.f32.vlgmr.msra.gmra.mxu1 %v757_v42 }
 0x135   :  { %1357 = vmatpush1.msra.mxu0 %v6362_v1  ;;  %5329 = vmatpush3.msra.mxu1 %v6442_v15  ;;  %v8861_v1 = vld [vmem:[#allocation3_spill] sm:$0xff] }
 0x136   :  { %1358 = vmatprep.subr.mxu0 %v6367_v2  ;;  %5330 = vmatprep.subr.mxu1 %v8860_v36  ;;  %v8862_v2 = vld [vmem:[#allocation15_spill] sm:$0xff] }
 0x137   :  { %1359 = vmatpush1.msra.mxu0 %v6375_v4  ;;  %5331 = vmatpush3.msra.mxu1 %v6447_v16  ;;  %v8863_v4 = vld [vmem:[#allocation4_spill] sm:$0xff]  ;;  %v8873_v15 = vld [vmem:[#allocation11_spill] sm:$0xff]  ;;  %v8874_v16 = vld [vmem:[#allocation26_spill] sm:$0xff] }
 0x138   :  { %1360 = vmatprep.subr.mxu0 %v6383_v5  ;;  %5332 = vmatprep.subr.mxu1 %v8860_v36  ;;  %v8864_v5 = vld [vmem:[#allocation5_spill] sm:$0xff] }
 0x139   :  { %1361 = vmatpush1.msra.mxu0 %v6389_v6  ;;  %5333 = vmatpush3.msra.mxu1 %v6473_v20  ;;  %v8865_v6 = vld [vmem:[#allocation18_spill] sm:$0xff]  ;;  %v8875_v20 = vld [vmem:[#allocation12_spill] sm:$0xff] }
 0x13a   :  { %1362 = vmatprep.subr.mxu0 %v6395_v7  ;;  %5334 = vmatprep.subr.mxu1 %v8860_v36  ;;  %v8866_v7 = vld [vmem:[#allocation6_spill] sm:$0xff] }
 0x13b   :  { %1363 = vmatpush1.msra.mxu0 %v6401_v8  ;;  %5335 = vmatpush3.msra.mxu1 %v6491_v23  ;;  %v8867_v8 = vld [vmem:[#allocation7_spill] sm:$0xff]  ;;  %v8876_v23 = vld [vmem:[#allocation13_spill] sm:$0xff] }
 0x13c   :  { %1364 = vmatprep.subr.mxu0 %v6407_v9  ;;  %5336 = vmatprep.subr.mxu1 %v8860_v36  ;;  %v8868_v9 = vld [vmem:[#allocation21_spill] sm:$0xff] }
 0x13d   :  { %1365 = vmatpush1.msra.mxu0 %v6413_v10  ;;  %5337 = vmatpush3.msra.mxu1 %v6510_v26  ;;  %v8869_v10 = vld [vmem:[#allocation8_spill] sm:$0xff]  ;;  %v8877_v26 = vld [vmem:[#allocation27_spill] sm:$0xff] }
 0x13e   :  { %1366 = vmatprep.subr.mxu0 %v6419_v11  ;;  %5338 = vmatprep.subr.mxu1 %v8860_v36  ;;  %v8870_v11 = vld [vmem:[#allocation9_spill] sm:$0xff] }
 0x13f   :  { %1367 = vmatpush1.msra.mxu0 %v6425_v12  ;;  %5339 = vmatpush3.msra.mxu1 %v6529_v29  ;;  %v8871_v12 = vld [vmem:[#allocation24_spill] sm:$0xff]  ;;  %v8878_v29 = vld [vmem:[#allocation14_spill] sm:$0xff] }
 0x140   :  { %1368 = vmatprep.subr.mxu0 %v6431_v13  ;;  %5340 = vmatprep.subr.mxu1 %v8860_v36  ;;  %v8872_v13 = vld [vmem:[#allocation10_spill] sm:$0xff] }
 0x141   :  { %1369 = vmatpush1.msra.mxu0 %v8861_v1  ;;  %5341 = vmatpush3.msra.mxu1 %v8862_v2  ;;  %v7002_v1 = vld [vmem:[%s8728_s0 + $0x91] ss:$8 sm:$0x7] }
 0x142   :  { %1370 = vmatprep.subr.mxu0 %v8863_v4  ;;  %5342 = vmatprep.subr.mxu1 %v8860_v36  ;;  %v1022_v4 = vrot.slane %v6967_v22, 1 }
 0x143   :  { %1371 = vmatpush1.msra.mxu0 %v8864_v5  ;;  %5343 = vmatpush3.msra.mxu1 %v8865_v6 }
 0x144   :  { %1372 = vmatprep.subr.mxu0 %v8866_v7  ;;  %5344 = vmatprep.subr.mxu1 %v8860_v36 }
 0x145   :  { %1373 = vmatpush1.msra.mxu0 %v8867_v8  ;;  %5345 = vmatpush3.msra.mxu1 %v8868_v9  ;;  %v7011_v9 = vld [vmem:[%s8728_s0 + $0xa9] ss:$8 sm:$0x7] }
 0x146   :  { %1374 = vmatprep.subr.mxu0 %v8869_v10  ;;  %5346 = vmatprep.subr.mxu1 %v8860_v36 }
 0x147   :  { %1375 = vmatpush1.msra.mxu0 %v8870_v11  ;;  %5347 = vmatpush3.msra.mxu1 %v8871_v12 }
 0x148   :  { %1376 = vmatprep.subr.mxu0 %v8872_v13  ;;  %5348 = vmatprep.subr.mxu1 %v8860_v36 }
 0x149   :  { %1377 = vmatpush1.msra.mxu0 %v8873_v15  ;;  %5349 = vmatpush3.msra.mxu1 %v8874_v16 }
 0x14a   :  { %1378 = vmatprep.subr.mxu0 %v8875_v20  ;;  %5350 = vmatprep.subr.mxu1 %v8860_v36 }
 0x14b   :  { %1379 = vmatpush1.msra.mxu0 %v8876_v23  ;;  %5351 = vmatpush3.msra.mxu1 %v8877_v26 }
 0x14c   :  { %1380 = vmatprep.subr.mxu0 %v8878_v29  ;;  %5352 = vmatprep.subr.mxu1 %v8860_v36 }
 0x14d   :  { %1381 = vmatpush1.msra.mxu0 %v8879_v63  ;;  %5353 = vmatpush3.msra.mxu1 %v8880_v50 }
 0x14e   :  { %1382 = vmatprep.subr.mxu0 %v8881_v35  ;;  %5354 = vmatprep.subr.mxu1 %v8860_v36 }
 0x14f   :  { %1383 = vmatpush1.msra.mxu0 %v8882_v30  ;;  %5355 = vmatpush3.msra.mxu1 %v8883_v27  ;;  %v1023_v27 = vrot.slane %v6972_v43, 1 }
 0x150   :  { %1384 = vmatprep.subr.mxu0 %v8884_v52  ;;  %5356 = vmatprep.subr.mxu1 %v8860_v36 }
 0x151   :  { %1385 = vmatpush1.msra.mxu0 %v8885_v17  ;;  %5357 = vmatpush3.msra.mxu1 %v8886_v58  ;;  %v1024_v17 = vrot.slane %v6979_v38, 1  ;;  %v1026_v58 = vrot.slane %v6990_v19, 1 }
 0x152   :  { %1386 = vmatprep.subr.mxu0 %v8887_v18  ;;  %5358 = vmatprep.subr.mxu1 %v8860_v36 }
 0x153   :  { %1387 = vmatpush1.msra.mxu0 %v8888_v54  ;;  %1420 = vmatprep.mubr.f32.mxu0 %v8860_v36  ;;  %v1025_v54 = vrot.slane %v6984_v0, 1 }
 0x154   :  { %5359 = vmatpush3.msra.mxu1 %v8889_v40  ;;  %5360 = vmatprep.mubr.msk.f32.mxu1 %vm6327_vm0, %v8860_v36 }
 0x155   :  { %1953 = vmatprep.subr.mxu0 %v6956_v48  ;;  %5363 = vmatprep.subr.mxu1 %v8860_v36 }
 0x1f4   :  { %v825_v51 = vpop.f32.mrf.mxu0  ;;  %v6960_v61 = vpop.f32.mrf.mxu1 }
 0x1f5   :  { %v826_v53 = vadd.f32 %v825_v51, %v8890_v57 }
 0x1f6   :  { %v5327_v3 = vpop.f32.mrf.mxu1  ;;  %v827_v49 = vpop.f32.mrf.mxu0 }
 0x1f7   :  { %v901_v55 = vcombine.high %v826_v53, %v826_v53  ;;  %v908_v39 = vrot.slane %v826_v53, %v6750_v59  ;;  %v828_v34 = vadd.f32 %v827_v49, %v8891_v21 }
 0x1f9   :  { %v915_v25 = vrot.slane %v901_v55, %v6750_v59  ;;  %v916_v41 = vcombine.high %v908_v39, %v908_v39  ;;  %v924_v47 = vrot.slane %v908_v39, %v6750_v59  ;;  %v1039_v13 = vcombine.high %v828_v34, %v828_v34 }
 0x1fa   :  { %v1046_v63 = vrot.slane %v828_v34, %v6750_v59  ;;  %v1027_v55 = vrot.slane %v6995_v46, 1 }
 0x1fb   :  { %v917_v32 = vcombine.high %v915_v25, %v915_v25  ;;  %v931_v31 = vrot.slane %v915_v25, %v6750_v59  ;;  %v938_v44 = vrot.slane %v916_v41, %v6750_v59  ;;  %v946_v42 = vcombine.high %v924_v47, %v924_v47 }
 0x1fc   :  { %v958_v2 = vadd.f32 %v6967_v22, %v924_v47  ;;  %v1053_v40 = vrot.slane %v1039_v13, %v6750_v59  ;;  %v1054_v53 = vcombine.high %v1046_v63, %v1046_v63  ;;  %v1062_v3 = vrot.slane %v1046_v63, %v6750_v59 }
 0x1fd   :  { %v945_v5 = vrot.slane %v917_v32, %v6750_v59  ;;  %v947_v6 = vcombine.high %v931_v31, %v931_v31  ;;  %v948_v7 = vcombine.high %v938_v44, %v938_v44  ;;  %v959_v8 = vadd.f32 %v6972_v43, %v938_v44 }
 0x1fe   :  { %v960_v10 = vadd.f32 %v6979_v38, %v946_v42  ;;  %v962_v11 = vadd.f32 %v6990_v19, %v931_v31  ;;  %v4962_v12 = vmul.f32 -1.442695, %v958_v2  ;;  %v1055_v39 = vcombine.high %v1053_v40, %v1053_v40 }
 0x1ff   :  { %v949_v15 = vcombine.high %v945_v5, %v945_v5  ;;  %v961_v16 = vadd.f32 %v6984_v0, %v948_v7  ;;  %v963_v20 = vadd.f32 %v6995_v46, %v945_v5  ;;  %v964_v23 = vadd.f32 %v7002_v1, %v947_v6 }
 0x200   :  { %5622 = vpow2.f32 %v4962_v12  ;;  %v4963_v26 = vmul.f32 -1.442695, %v959_v8  ;;  %v4964_v29 = vmul.f32 -1.442695, %v960_v10  ;;  %v4966_v30 = vmul.f32 -1.442695, %v962_v11 }
 0x201   :  { %v965_v50 = vadd.f32 %v7011_v9, %v949_v15  ;;  %v4965_v35 = vmul.f32 -1.442695, %v961_v16  ;;  %v4967_v52 = vmul.f32 -1.442695, %v963_v20  ;;  %v4968_v18 = vmul.f32 -1.442695, %v964_v23 }
 0x202   :  { %5624 = vpow2.f32 %v4963_v26  ;;  %v1069_v49 = vrot.slane %v1053_v40, %v6750_v59  ;;  %v1076_v25 = vrot.slane %v1054_v53, %v6750_v59  ;;  %v1084_v41 = vcombine.high %v1062_v3, %v1062_v3 }
 0x203   :  { %5626 = vpow2.f32 %v4964_v29  ;;  %v4969_v51 = vmul.f32 -1.442695, %v965_v50  ;;  %v1096_v47 = vadd.f32 %v1062_v3, %v1022_v4  ;;  %v1083_v34 = vrot.slane %v1055_v39, %v6750_v59 }
 0x204   :  { %5628 = vpow2.f32 %v4965_v35  ;;  %v1100_v32 = vadd.f32 %v1069_v49, %v1026_v58  ;;  %v1086_v31 = vcombine.high %v1076_v25, %v1076_v25  ;;  %v1097_v44 = vadd.f32 %v1076_v25, %v1023_v27 }
 0x205   :  { %5630 = vpow2.f32 %v4966_v30  ;;  %v1098_v42 = vadd.f32 %v1084_v41, %v1024_v17  ;;  %v1101_v2 = vadd.f32 %v1083_v34, %v1027_v55  ;;  %v4970_v5 = vmul.f32 -1.442695, %v1096_v47 }
 0x206   :  { %5632 = vpow2.f32 %v4967_v52  ;;  %v1099_v6 = vadd.f32 %v1086_v31, %v1025_v54  ;;  %v4971_v7 = vmul.f32 -1.442695, %v1097_v44  ;;  %v4974_v10 = vmul.f32 -1.442695, %v1100_v32 }
 0x207   :  { %5634 = vpow2.f32 %v4968_v18  ;;  %v4972_v8 = vmul.f32 -1.442695, %v1098_v42  ;;  %v1028_v4 = vrot.slane %v7002_v1, 1  ;;  %v1085_v13 = vcombine.high %v1069_v49, %v1069_v49 }
 0x208   :  { %5636 = vpow2.f32 %v4969_v51  ;;  %v4973_v11 = vmul.f32 -1.442695, %v1099_v6  ;;  %v4975_v15 = vmul.f32 -1.442695, %v1101_v2  ;;  %v1029_v20 = vrot.slane %v7011_v9, 1 }
 0x209   :  { %5638 = vpow2.f32 %v4970_v5  ;;  %v1087_v23 = vcombine.high %v1083_v34, %v1083_v34  ;;  %v897_v29 = vadd.f32 %v6960_v61, %v6827_v14  ;;  %v1102_v27 = vadd.f32 %v1085_v13, %v1028_v4 }
 0x20a   :  { %5640 = vpow2.f32 %v4971_v7 }
 0x20b   :  { %5642 = vpow2.f32 %v4972_v8  ;;  %v1103_v58 = vadd.f32 %v1087_v23, %v1029_v20  ;;  %v1153_v40 = vcombine.high %v897_v29, %v897_v29  ;;  %v1160_v61 = vrot.slane %v897_v29, %v6750_v59 }
 0x20c   :  { %5644 = vpow2.f32 %v4973_v11  ;;  %v4976_v39 = vmul.f32 -1.442695, %v1102_v27  ;;  %v1218_v11 = vrot.slane %v6967_v22, 2 }
 0x20d   :  { %v5623_v12 = vpop.eup %5622  ;;  %5646 = vpow2.f32 %v4974_v10  ;;  %v4977_v25 = vmul.f32 -1.442695, %v1103_v58  ;;  %v1167_v41 = vrot.slane %v1153_v40, %v6750_v59  ;;  %v1168_v34 = vcombine.high %v1160_v61, %v1160_v61 }
 0x20e   :  { %v990_v16 = vadd.f32 1.0, %v5623_v12  ;;  %v1176_v6 = vrot.slane %v1160_v61, %v6750_v59  ;;  %v1219_v12 = vrot.slane %v6972_v43, 2  ;;  %v1223_v58 = vrot.slane %v6995_v46, 2 }
 0x20f   :  { %v5625_v26 = vpop.eup %5624  ;;  %v1169_v5 = vcombine.high %v1167_v41, %v1167_v41  ;;  %v1190_v10 = vrot.slane %v1168_v34, %v6750_v59  ;;  %v1225_v40 = vrot.slane %v7011_v9, 2 }
 0x210   :  { %v5627_v63 = vpop.eup %5626  ;;  %v991_v50 = vadd.f32 1.0, %v5625_v26  ;;  %5648 = vrcp.f32 %v990_v16  ;;  %v1221_v16 = vrot.slane %v6984_v0, 2  ;;  %v1183_v26 = vrot.slane %v1167_v41, %v6750_v59 }
 0x211   :  { %v5629_v35 = vpop.eup %5628  ;;  %v992_v30 = vadd.f32 1.0, %v5627_v63  ;;  %5650 = vpow2.f32 %v4975_v15  ;;  %v1220_v15 = vrot.slane %v6979_v38, 2  ;;  %v1222_v63 = vrot.slane %v6990_v19, 2 }
 0x212   :  { %v5631_v52 = vpop.eup %5630  ;;  %v993_v17 = vadd.f32 1.0, %v5629_v35  ;;  %5652 = vrcp.f32 %v991_v50  ;;  %v1197_v22 = vrot.slane %v1169_v5, %v6750_v59  ;;  %v1198_v35 = vcombine.high %v1176_v6, %v1176_v6 }
 0x213   :  { %v5633_v18 = vpop.eup %5632  ;;  %v994_v54 = vadd.f32 1.0, %v5631_v52  ;;  %5654 = vrcp.f32 %v992_v30  ;;  %v1200_v27 = vcombine.high %v1190_v10, %v1190_v10  ;;  %v1199_v61 = vcombine.high %v1183_v26, %v1183_v26 }
 0x214   :  { %v5635_v51 = vpop.eup %5634  ;;  %v995_v53 = vadd.f32 1.0, %v5633_v18  ;;  %5656 = vrcp.f32 %v993_v17  ;;  %v1224_v18 = vrot.slane %v7002_v1, 2 }
 0x215   :  { %v5637_v3 = vpop.eup %5636  ;;  %v996_v55 = vadd.f32 1.0, %v5635_v51  ;;  %5658 = vrcp.f32 %v994_v54 }
 0x216   :  { %v997_v49 = vadd.f32 1.0, %v5637_v3  ;;  %5660 = vrcp.f32 %v995_v53  ;;  %v5639_v47 = vpop.eup %5638 }
 0x217   :  { %5662 = vrcp.f32 %v996_v55  ;;  %v5641_v32 = vpop.eup %5640  ;;  %v1128_v31 = vadd.f32 1.0, %v5639_v47 }
 0x218   :  { %5664 = vrcp.f32 %v997_v49  ;;  %v5643_v44 = vpop.eup %5642  ;;  %v1129_v42 = vadd.f32 1.0, %v5641_v32  ;;  %v1201_v49 = vcombine.high %v1197_v22, %v1197_v22 }
 0x219   :  { %5666 = vpow2.f32 %v4976_v39  ;;  %v5645_v2 = vpop.eup %5644  ;;  %v1130_v7 = vadd.f32 1.0, %v5643_v44 }
 0x21a   :  { %5668 = vpow2.f32 %v4977_v25  ;;  %v5647_v8 = vpop.eup %5646  ;;  %v1131_v4 = vadd.f32 1.0, %v5645_v2 }
 0x21b   :  { %v1132_v20 = vadd.f32 1.0, %v5647_v8  ;;  %5670 = vrcp.f32 %v1128_v31 }
 0x21c   :  { %5672 = vrcp.f32 %v1129_v42 }
 0x21d   :  { %v5649_v13 = vpop.eup %5648  ;;  %5674 = vrcp.f32 %v1130_v7 }
 0x21e   :  { %v5651_v23 = vpop.eup %5650  ;;  %v1210_v29 = vmul.f32 %v5649_v13, %v1176_v6  ;;  %5676 = vrcp.f32 %v1131_v4 }
 0x21f   :  { %v5653_v50 = vpop.eup %5652  ;;  %v1133_v43 = vadd.f32 1.0, %v5651_v23  ;;  %5678 = vrcp.f32 %v1132_v20 }
 0x220   :  { %v5655_v30 = vpop.eup %5654  ;;  %v1211_v38 = vmul.f32 %v5653_v50, %v1190_v10  ;;  %v1234_v52 = vadd.f32 %v1218_v11, %v1210_v29 }
 0x221   :  { %v5657_v0 = vpop.eup %5656  ;;  %v1212_v17 = vmul.f32 %v5655_v30, %v1198_v35  ;;  %5680 = vrcp.f32 %v1133_v43 }
 0x222   :  { %v5659_v19 = vpop.eup %5658  ;;  %v1213_v54 = vmul.f32 %v5657_v0, %v1200_v27  ;;  %v1235_v51 = vadd.f32 %v1219_v12, %v1211_v38  ;;  %5682 = vtanh.f32 %v1234_v52 }
 0x223   :  { %v5661_v53 = vpop.eup %5660  ;;  %v1214_v3 = vmul.f32 %v5659_v19, %v1183_v26  ;;  %v1236_v55 = vadd.f32 %v1220_v15, %v1212_v17 }
 0x224   :  { %v5663_v39 = vpop.eup %5662  ;;  %v1215_v25 = vmul.f32 %v5661_v53, %v1197_v22  ;;  %v1237_v41 = vadd.f32 %v1221_v16, %v1213_v54  ;;  %5684 = vtanh.f32 %v1235_v51 }
 0x225   :  { %v5665_v46 = vpop.eup %5664  ;;  %v1216_v47 = vmul.f32 %v5663_v39, %v1199_v61  ;;  %v1238_v1 = vadd.f32 %v1222_v63, %v1214_v3  ;;  %5686 = vtanh.f32 %v1236_v55 }
 0x226   :  { %v5667_v34 = vpop.eup %5666  ;;  %v1217_v32 = vmul.f32 %v5665_v46, %v1201_v49  ;;  %v1239_v31 = vadd.f32 %v1223_v58, %v1215_v25  ;;  %5688 = vtanh.f32 %v1237_v41 }
 0x227   :  { %v5669_v9 = vpop.eup %5668  ;;  %v1240_v44 = vadd.f32 %v1224_v18, %v1216_v47  ;;  %5690 = vtanh.f32 %v1238_v1  ;;  %v1134_v42 = vadd.f32 1.0, %v5667_v34 }
 0x228   :  { %v1241_v2 = vadd.f32 %v1225_v40, %v1217_v32  ;;  %5692 = vtanh.f32 %v1239_v31  ;;  %v1135_v5 = vadd.f32 1.0, %v5669_v9  ;;  %v5671_v6 = vpop.eup %5670 }
 0x229   :  { %5694 = vtanh.f32 %v1240_v44  ;;  %v5673_v7 = vpop.eup %5672  ;;  %v1250_v29 = vsub.f32 1.0, %v5671_v6  ;;  %v1266_v40 = vmul.f32 %v5671_v6, %v6860_v56 }
 0x22a   :  { %5696 = vtanh.f32 %v1241_v2  ;;  %v5675_v8 = vpop.eup %5674  ;;  %v1251_v15 = vsub.f32 1.0, %v5673_v7  ;;  %v1267_v52 = vmul.f32 %v5673_v7, %v6858_v37 }
 0x22b   :  { %5698 = vrcp.f32 %v1134_v42  ;;  %v5677_v10 = vpop.eup %5676  ;;  %v1252_v20 = vsub.f32 1.0, %v5675_v8  ;;  %v1268_v18 = vmul.f32 %v5675_v8, %v6862_v28 }
 0x22c   :  { %5700 = vrcp.f32 %v1135_v5  ;;  %v5679_v11 = vpop.eup %5678  ;;  %v1253_v23 = vsub.f32 1.0, %v5677_v10  ;;  %v1269_v30 = vmul.f32 %v5677_v10, %v6864_v45  ;;  %v7089_v10 = vld [vmem:[%s8725_s2 + $0x168] sm:$0xff] }
 0x22d   :  { %v1254_v17 = vsub.f32 1.0, %v5679_v11  ;;  %v1270_v28 = vmul.f32 %v5679_v11, %v6868_v60  ;;  %v7095_v11 = vld [vmem:[%s8725_s2 + $0x178] sm:$0xff] }
 0x22e   :  { %v5681_v12 = vpop.eup %5680 }
 0x22f   :  { %v5683_v4 = vpop.eup %5682  ;;  %v1255_v22 = vsub.f32 1.0, %v5681_v12  ;;  %v1271_v45 = vmul.f32 %v5681_v12, %v6870_v24  ;;  %v7101_v12 = vld [vmem:[%s8725_s2 + $0x158] sm:$0xff] }
 0x230   :  { %v1258_v38 = vmul.f32 %v5683_v4, %v1250_v29  ;;  %v7108_v4 = vld [vmem:[%s8725_s2 + $0x150] sm:$0xff] }
 0x231   :  { %v5685_v13 = vpop.eup %5684  ;;  %v7152_v29 = vld [vmem:[%s8725_s2 + $0x130] sm:$0xff] }
 0x232   :  { %v5687_v16 = vpop.eup %5686  ;;  %v1259_v63 = vmul.f32 %v5685_v13, %v1251_v15  ;;  %v7059_v39 = vadd.f32 %v1266_v40, %v1258_v38  ;;  %v7114_v13 = vld [vmem:[%s8725_s2 + $0x160] sm:$0xff]  ;;  %v7203_v38 = vld [vmem:[%s8725_s2 + $0xd8] sm:$0xff] }
 0x233   :  { %v5689_v26 = vpop.eup %5688  ;;  %v1260_v35 = vmul.f32 %v5687_v16, %v1252_v20  ;;  %v7120_v15 = vld [vmem:[%s8725_s2 + $0x140] sm:$0xff]  ;;  %v7127_v16 = vld [vmem:[%s8725_s2 + $0x138] sm:$0xff]  ;;  %v7133_v20 = vld [vmem:[%s8725_s2 + $0x148] sm:$0xff]  ;;  %8893 = vst [vmem:[#allocation15_spill] sm:$0xff] %v7203_v38 }
 0x234   :  { %v5691_v50 = vpop.eup %5690  ;;  %v1261_v43 = vmul.f32 %v5689_v26, %v1253_v23  ;;  %v7054_v51 = vadd.f32 %v1267_v52, %v1259_v63  ;;  %v7139_v23 = vld [vmem:[%s8725_s2 + $0x128] sm:$0xff]  ;;  %v7146_v26 = vld [vmem:[%s8725_s2 + $0x120] sm:$0xff]  ;;  %v7158_v63 = vld [vmem:[%s8725_s2 + $0x110] sm:$0xff] }
 0x235   :  { %v5693_v27 = vpop.eup %5692  ;;  %v1262_v61 = vmul.f32 %v5691_v50, %v1254_v17  ;;  %v7057_v3 = vadd.f32 %v1268_v18, %v1260_v35  ;;  %v7165_v50 = vld [vmem:[%s8725_s2 + $0x108] sm:$0xff]  ;;  %v7177_v35 = vld [vmem:[%s8725_s2 + $0xf8] sm:$0xff]  ;;  %v7222_v17 = vld [vmem:[%s8725_s2 + $0xc0] sm:$0xff] }
 0x236   :  { %v5695_v0 = vpop.eup %5694  ;;  %v1263_v58 = vmul.f32 %v5693_v27, %v1255_v22  ;;  %v7051_v19 = vadd.f32 %v1269_v30, %v1261_v43  ;;  %v1306_v46 = vcombine.low %v7059_v39, %v7054_v51  ;;  %v7171_v22 = vld [vmem:[%s8725_s2 + $0x118] sm:$0xff]  ;;  %v7184_v43 = vld [vmem:[%s8725_s2 + $0xf0] sm:$0xff]  ;;  %v7190_v30 = vld [vmem:[%s8725_s2 + $0x100] sm:$0xff]  ;;  %8896 = vst [vmem:[#allocation18_spill] sm:$0xff] %v7222_v17 }
 0x237   :  { %v5697_v54 = vpop.eup %5696  ;;  %v7070_v34 = vadd.f32 %v1270_v28, %v1262_v61  ;;  %v7196_v27 = vld [vmem:[%s8725_s2 + $0xe0] sm:$0xff]  ;;  %v7209_v52 = vld [vmem:[%s8725_s2 + $0xe8] sm:$0xff]  ;;  %v7234_v18 = vld [vmem:[%s8725_s2 + $0xb0] sm:$0xff] }
 0x238   :  { %v5699_v53 = vpop.eup %5698  ;;  %v7062_v25 = vadd.f32 %v1271_v45, %v1263_v58  ;;  %v1307_v56 = vcombine.low %v7057_v3, %v7051_v19  ;;  %v1316_v42 = vrot.slane %v1306_v46, %v6750_v59  ;;  %8892 = vst [vmem:[#allocation3_spill] sm:$0xff] %v7196_v27  ;;  %8894 = vst [vmem:[#allocation4_spill] sm:$0xff] %v7209_v52  ;;  %v7228_v58 = vld [vmem:[%s8725_s2 + $0xd0] sm:$0xff]  ;;  %v7247_v40 = vld [vmem:[%s8725_s2 + $0xb8] sm:$0xff] }
 0x239   :  { %v5701_v55 = vpop.eup %5700  ;;  %v1256_v37 = vsub.f32 1.0, %v5699_v53  ;;  %v1272_v24 = vmul.f32 %v5699_v53, %v6874_v62  ;;  %8897 = vst [vmem:[#allocation6_spill] sm:$0xff] %v7228_v58  ;;  %8898 = vst [vmem:[#allocation7_spill] sm:$0xff] %v7234_v18  ;;  %v7253_v53 = vld [vmem:[%s8725_s2 + $0x98] sm:$0xff]  ;;  %v7260_v61 = vld [vmem:[%s8725_s2 + $0x90] sm:$0xff] }
 0x23a   :  { %v1257_v49 = vsub.f32 1.0, %v5701_v55  ;;  %v1273_v1 = vmul.f32 %v5701_v55, %v6876_v33  ;;  %v1308_v60 = vcombine.low %v7070_v34, %v7062_v25  ;;  %v1323_v9 = vrot.slane %v1307_v56, %v6750_v59  ;;  %8900 = vst [vmem:[#allocation8_spill] sm:$0xff] %v7247_v40  ;;  %8901 = vst [vmem:[#allocation9_spill] sm:$0xff] %v7253_v53  ;;  %v7266_v45 = vld [vmem:[%s8725_s2 + $0xa0] sm:$0xff]  ;;  %v7291_v28 = vld [vmem:[%s8725_s2 + $0x68] sm:$0xff] }
 0x23b   :  { %v1264_v41 = vmul.f32 %v5695_v0, %v1256_v37  ;;  %v7215_v0 = vld [vmem:[%s8725_s2 + $0xc8] sm:$0xff]  ;;  %8902 = vst [vmem:[#allocation24_spill] sm:$0xff] %v7260_v61  ;;  %8903 = vst [vmem:[#allocation10_spill] sm:$0xff] %v7266_v45  ;;  %v7272_v55 = vld [vmem:[%s8725_s2 + $0x80] sm:$0xff] }
 0x23c   :  { %v1265_v47 = vmul.f32 %v5697_v54, %v1257_v49  ;;  %v1330_v62 = vrot.slane %v1308_v60, %v6750_v59  ;;  %v1338_v2 = vcombine.low %v1316_v42, %v1323_v9  ;;  %8895 = vst [vmem:[#allocation5_spill] sm:$0xff] %v7215_v0  ;;  %v7241_v54 = vld [vmem:[%s8725_s2 + $0xa8] sm:$0xff]  ;;  %8904 = vst [vmem:[#allocation11_spill] sm:$0xff] %v7272_v55  ;;  %v7279_v37 = vld [vmem:[%s8725_s2 + $0x78] sm:$0xff] }
 0x23d   :  { %v7072_v32 = vadd.f32 %v1272_v24, %v1264_v41  ;;  %8899 = vst [vmem:[#allocation21_spill] sm:$0xff] %v7241_v54  ;;  %8905 = vst [vmem:[#allocation26_spill] sm:$0xff] %v7279_v37  ;;  %v7285_v49 = vld [vmem:[%s8725_s2 + $0x88] sm:$0xff]  ;;  %v7298_v56 = vld [vmem:[%s8725_s2 + $0x60] sm:$0xff] }
 0x23e   :  { %v7074_v31 = vadd.f32 %v1273_v1, %v1265_v47  ;;  %v1346_v6 = vrot.slane %v1338_v2, %v6750_v59  ;;  %8906 = vst [vmem:[#allocation12_spill] sm:$0xff] %v7285_v49  ;;  %8907 = vst [vmem:[#allocation13_spill] sm:$0xff] %v7291_v28  ;;  %v7304_v41 = vld [vmem:[%s8725_s2 + $0x70] sm:$0xff]  ;;  %v7317_v47 = vld [vmem:[%s8725_s2 + $0x48] sm:$0xff] }
 0x23f   :  { %8908 = vst [vmem:[#allocation27_spill] sm:$0xff] %v7298_v56  ;;  %8909 = vst [vmem:[#allocation14_spill] sm:$0xff] %v7304_v41  ;;  %v7310_v46 = vld [vmem:[%s8725_s2 + $0x50] sm:$0xff]  ;;  %v7323_v24 = vld [vmem:[%s8725_s2 + $0x58] sm:$0xff] }
 0x240   :  { %v1309_v44 = vcombine.low %v7072_v32, %v7074_v31  ;;  %8910 = vst [vmem:[#allocation16_spill] sm:$0xff] %v7310_v46  ;;  %8911 = vst [vmem:[#allocation28_spill] sm:$0xff] %v7317_v47  ;;  %v7329_v1 = vld [vmem:[%s8725_s2 + $0x38] sm:$0xff]  ;;  %v7336_v60 = vld [vmem:[%s8725_s2 + $0x30] sm:$0xff] }
 0x241   :  { %8912 = vst [vmem:[#allocation17_spill] sm:$0xff] %v7323_v24  ;;  %8913 = vst [vmem:[#allocation19_spill] sm:$0xff] %v7329_v1  ;;  %v7342_v9 = vld [vmem:[%s8725_s2 + $0x40] sm:$0xff]  ;;  %v7355_v42 = vld [vmem:[%s8725_s2 + $0x18] sm:$0xff] }
 0x242   :  { %v1337_v33 = vrot.slane %v1309_v44, %v6750_v59  ;;  %8914 = vst [vmem:[#allocation29_spill] sm:$0xff] %v7336_v60  ;;  %8915 = vst [vmem:[#allocation20_spill] sm:$0xff] %v7342_v9  ;;  %v7348_v44 = vld [vmem:[%s8725_s2 + $0x20] sm:$0xff] }
 0x243   :  { %8916 = vst [vmem:[#allocation22_spill] sm:$0xff] %v7348_v44  ;;  %8917 = vst [vmem:[#allocation30_spill] sm:$0xff] %v7355_v42  ;;  %v7374_v2 = vld [vmem:[%s8725_s2] sm:$0xff] }
 0x244   :  { %v1339_v5 = vcombine.low %v1330_v62, %v1337_v33  ;;  %v7361_v62 = vld [vmem:[%s8725_s2 + $0x28] sm:$0xff]  ;;  %8920 = vst [vmem:[#allocation31_spill] sm:$0xff] %v7374_v2 }
 0x245   :  { %8918 = vst [vmem:[#allocation23_spill] sm:$0xff] %v7361_v62  ;;  %v7367_v33 = vld [vmem:[%s8725_s2 + $0x8] sm:$0xff] }
 0x246   :  { %v1353_v7 = vrot.slane %v1339_v5, %v6750_v59  ;;  %8919 = vst [vmem:[#allocation25_spill] sm:$0xff] %v7367_v33  ;;  %v7381_v5 = vld [vmem:[%s8725_s2 + $0x10] sm:$0xff] }
 0x247   :  { %8921 = vst [vmem:[#allocation34_spill] sm:$0xff] %v7381_v5 }
 0x248   :  { %v1354_v8 = vcombine.low %v1346_v6, %v1353_v7 }
 0x24a   :  { %1421 = vmatmul.mubr.f32.vlgmr.msra.gmra.mxu0 %v1354_v8  ;;  %5361 = vmatmul.mubr.f32.vlgmr.msra.gmra.mxu1 %v1354_v8 }
 0x24b   :  { %1954 = vmatpush1.msra.mxu0 %v7089_v10  ;;  %5364 = vmatpush3.msra.mxu1 %v7095_v11 }
 0x24c   :  { %1955 = vmatprep.subr.mxu0 %v7101_v12  ;;  %5365 = vmatprep.subr.mxu1 %v8860_v36 }
 0x24d   :  { %1956 = vmatpush1.msra.mxu0 %v7108_v4  ;;  %5366 = vmatpush3.msra.mxu1 %v7114_v13 }
 0x24e   :  { %1957 = vmatprep.subr.mxu0 %v7120_v15  ;;  %5367 = vmatprep.subr.mxu1 %v8860_v36 }
 0x24f   :  { %1958 = vmatpush1.msra.mxu0 %v7127_v16  ;;  %5368 = vmatpush3.msra.mxu1 %v7133_v20 }
 0x250   :  { %1959 = vmatprep.subr.mxu0 %v7139_v23  ;;  %5369 = vmatprep.subr.mxu1 %v8860_v36 }
 0x251   :  { %1960 = vmatpush1.msra.mxu0 %v7146_v26  ;;  %5370 = vmatpush3.msra.mxu1 %v7152_v29 }
 0x252   :  { %1961 = vmatprep.subr.mxu0 %v7158_v63  ;;  %5371 = vmatprep.subr.mxu1 %v8860_v36 }
 0x253   :  { %1962 = vmatpush1.msra.mxu0 %v7165_v50  ;;  %5372 = vmatpush3.msra.mxu1 %v7171_v22 }
 0x254   :  { %1963 = vmatprep.subr.mxu0 %v7177_v35  ;;  %5373 = vmatprep.subr.mxu1 %v8860_v36 }
 0x255   :  { %1964 = vmatpush1.msra.mxu0 %v7184_v43  ;;  %5374 = vmatpush3.msra.mxu1 %v7190_v30 }
 0x256   :  { %1965 = vmatprep.subr.mxu0 %v7196_v27  ;;  %5375 = vmatprep.subr.mxu1 %v8860_v36 }
 0x257   :  { %1966 = vmatpush1.msra.mxu0 %v7203_v38  ;;  %5376 = vmatpush3.msra.mxu1 %v7209_v52 }
 0x258   :  { %1967 = vmatprep.subr.mxu0 %v7215_v0  ;;  %5377 = vmatprep.subr.mxu1 %v8860_v36 }
 0x259   :  { %1968 = vmatpush1.msra.mxu0 %v7222_v17  ;;  %5378 = vmatpush3.msra.mxu1 %v7228_v58 }
 0x25a   :  { %1969 = vmatprep.subr.mxu0 %v7234_v18  ;;  %5379 = vmatprep.subr.mxu1 %v8860_v36 }
 0x25b   :  { %1970 = vmatpush1.msra.mxu0 %v7241_v54  ;;  %5380 = vmatpush3.msra.mxu1 %v7247_v40 }
 0x25c   :  { %1971 = vmatprep.subr.mxu0 %v7253_v53  ;;  %5381 = vmatprep.subr.mxu1 %v8860_v36 }
 0x25d   :  { %1972 = vmatpush1.msra.mxu0 %v7260_v61  ;;  %5382 = vmatpush3.msra.mxu1 %v7266_v45 }
 0x25e   :  { %1973 = vmatprep.subr.mxu0 %v7272_v55  ;;  %5383 = vmatprep.subr.mxu1 %v8860_v36 }
 0x25f   :  { %1974 = vmatpush1.msra.mxu0 %v7279_v37  ;;  %5384 = vmatpush3.msra.mxu1 %v7285_v49 }
 0x260   :  { %1975 = vmatprep.subr.mxu0 %v7291_v28  ;;  %5385 = vmatprep.subr.mxu1 %v8860_v36 }
 0x261   :  { %1976 = vmatpush1.msra.mxu0 %v7298_v56  ;;  %5386 = vmatpush3.msra.mxu1 %v7304_v41 }
 0x262   :  { %1977 = vmatprep.subr.mxu0 %v7310_v46  ;;  %5387 = vmatprep.subr.mxu1 %v8860_v36 }
 0x263   :  { %1978 = vmatpush1.msra.mxu0 %v7317_v47  ;;  %5388 = vmatpush3.msra.mxu1 %v7323_v24 }
 0x264   :  { %1979 = vmatprep.subr.mxu0 %v7329_v1  ;;  %5389 = vmatprep.subr.mxu1 %v8860_v36 }
 0x265   :  { %1980 = vmatpush1.msra.mxu0 %v7336_v60  ;;  %5390 = vmatpush3.msra.mxu1 %v7342_v9  ;;  %v7418_v60 = vld [vmem:[%s8728_s0 + $0x62] ss:$8 sm:$0x7] }
 0x266   :  { %1981 = vmatprep.subr.mxu0 %v7348_v44  ;;  %5391 = vmatprep.subr.mxu1 %v8860_v36 }
 0x267   :  { %1982 = vmatpush1.msra.mxu0 %v7355_v42  ;;  %5392 = vmatpush3.msra.mxu1 %v7361_v62 }
 0x268   :  { %1983 = vmatprep.subr.mxu0 %v7367_v33  ;;  %5393 = vmatprep.subr.mxu1 %v8860_v36 }
 0x269   :  { %1984 = vmatpush1.msra.mxu0 %v7374_v2  ;;  %2017 = vmatprep.mubr.f32.mxu0 %v8860_v36 }
 0x26a   :  { %5394 = vmatpush3.msra.mxu1 %v7381_v5  ;;  %5395 = vmatprep.mubr.msk.f32.mxu1 %vm6327_vm0, %v8860_v36  ;;  %v7395_v5 = vld [vmem:[%s8728_s0 + $0x2] ss:$8 sm:$0x7] }
 0x26b   :  { %2550 = vmatprep.subr.mxu0 %v6956_v48  ;;  %5398 = vmatprep.subr.mxu1 %v8860_v36  ;;  %v7400_v48 = vld [vmem:[%s8728_s0 + $0x1a] ss:$8 sm:$0x7]  ;;  %v1619_v46 = vrot.slane %v7395_v5, 1 }
 0x30a   :  { %v1422_v6 = vpop.f32.mrf.mxu0  ;;  %v7388_v7 = vpop.f32.mrf.mxu1 }
 0x30b   :  { %v1423_v8 = vadd.f32 %v1422_v6, %v8890_v57 }
 0x30c   :  { %v5362_v2 = vpop.f32.mrf.mxu1  ;;  %v1424_v42 = vpop.f32.mrf.mxu0 }
 0x30d   :  { %v1498_v33 = vcombine.high %v1423_v8, %v1423_v8  ;;  %v1505_v62 = vrot.slane %v1423_v8, %v6750_v59  ;;  %v7407_v2 = vld [vmem:[%s8728_s0 + $0x32] ss:$8 sm:$0x7]  ;;  %v1425_v57 = vadd.f32 %v1424_v42, %v8891_v21 }
 0x30e   :  { %v7412_v8 = vld [vmem:[%s8728_s0 + $0x4a] ss:$8 sm:$0x7]  ;;  %v1621_v17 = vrot.slane %v7407_v2, 1 }
 0x30f   :  { %v1512_v44 = vrot.slane %v1498_v33, %v6750_v59  ;;  %v1513_v9 = vcombine.high %v1505_v62, %v1505_v62  ;;  %v1521_v6 = vrot.slane %v1505_v62, %v6750_v59  ;;  %v7423_v62 = vld [vmem:[%s8728_s0 + $0x7a] ss:$8 sm:$0x7]  ;;  %v1636_v45 = vcombine.high %v1425_v57, %v1425_v57 }
 0x310   :  { %v7430_v42 = vld [vmem:[%s8728_s0 + $0x92] ss:$8 sm:$0x7]  ;;  %v1643_v54 = vrot.slane %v1425_v57, %v6750_v59 }
 0x311   :  { %v1514_v33 = vcombine.high %v1512_v44, %v1512_v44  ;;  %v1528_v1 = vrot.slane %v1512_v44, %v6750_v59  ;;  %v1535_v24 = vrot.slane %v1513_v9, %v6750_v59  ;;  %v1543_v47 = vcombine.high %v1521_v6, %v1521_v6  ;;  %v7439_v9 = vld [vmem:[%s8728_s0 + $0xaa] ss:$8 sm:$0x7] }
 0x312   :  { %v1555_v21 = vadd.f32 %v7395_v5, %v1521_v6 }
 0x313   :  { %v1542_v41 = vrot.slane %v1514_v33, %v6750_v59  ;;  %v1544_v56 = vcombine.high %v1528_v1, %v1528_v1  ;;  %v1545_v28 = vcombine.high %v1535_v24, %v1535_v24  ;;  %v1556_v49 = vadd.f32 %v7400_v48, %v1535_v24 }
 0x314   :  { %v1557_v44 = vadd.f32 %v7407_v2, %v1543_v47  ;;  %v1559_v37 = vadd.f32 %v7418_v60, %v1528_v1  ;;  %v4986_v55 = vmul.f32 -1.442695, %v1555_v21  ;;  %v1620_v1 = vrot.slane %v7400_v48, 1 }
 0x315   :  { %v1546_v6 = vcombine.high %v1542_v41, %v1542_v41  ;;  %v1558_v61 = vadd.f32 %v7412_v8, %v1545_v28  ;;  %v1560_v33 = vadd.f32 %v7423_v62, %v1542_v41  ;;  %v1561_v53 = vadd.f32 %v7430_v42, %v1544_v56 }
 0x316   :  { %5702 = vpow2.f32 %v4986_v55  ;;  %v4987_v24 = vmul.f32 -1.442695, %v1556_v49  ;;  %v4988_v40 = vmul.f32 -1.442695, %v1557_v44  ;;  %v4990_v47 = vmul.f32 -1.442695, %v1559_v37 }
 0x317   :  { %v1562_v18 = vadd.f32 %v7439_v9, %v1546_v6  ;;  %v4989_v58 = vmul.f32 -1.442695, %v1558_v61  ;;  %v4991_v21 = vmul.f32 -1.442695, %v1560_v33  ;;  %v1623_v28 = vrot.slane %v7418_v60, 1 }
 0x318   :  { %5704 = vpow2.f32 %v4987_v24  ;;  %v4992_v41 = vmul.f32 -1.442695, %v1561_v53  ;;  %v1622_v55 = vrot.slane %v7412_v8, 1  ;;  %v1650_v49 = vrot.slane %v1636_v45, %v6750_v59 }
 0x319   :  { %5706 = vpow2.f32 %v4988_v40  ;;  %v4993_v57 = vmul.f32 -1.442695, %v1562_v18  ;;  %v1651_v56 = vcombine.high %v1643_v54, %v1643_v54  ;;  %v1659_v61 = vrot.slane %v1643_v54, %v6750_v59 }
 0x31a   :  { %5708 = vpow2.f32 %v4989_v58  ;;  %v1624_v37 = vrot.slane %v7423_v62, 1  ;;  %v1652_v44 = vcombine.high %v1650_v49, %v1650_v49  ;;  %v1666_v6 = vrot.slane %v1650_v49, %v6750_v59 }
 0x31b   :  { %5710 = vpow2.f32 %v4990_v47  ;;  %v1673_v33 = vrot.slane %v1651_v56, %v6750_v59  ;;  %v1681_v40 = vcombine.high %v1659_v61, %v1659_v61  ;;  %v1693_v53 = vadd.f32 %v1659_v61, %v1619_v46 }
 0x31c   :  { %5712 = vpow2.f32 %v4991_v21  ;;  %v1680_v24 = vrot.slane %v1652_v44, %v6750_v59  ;;  %v1697_v45 = vadd.f32 %v1666_v6, %v1623_v28  ;;  %v1625_v46 = vrot.slane %v7430_v42, 1 }
 0x31d   :  { %5714 = vpow2.f32 %v4992_v41  ;;  %v1683_v58 = vcombine.high %v1673_v33, %v1673_v33  ;;  %v1694_v18 = vadd.f32 %v1673_v33, %v1620_v1  ;;  %v1695_v0 = vadd.f32 %v1681_v40, %v1621_v17 }
 0x31e   :  { %5716 = vpow2.f32 %v4993_v57  ;;  %v1698_v54 = vadd.f32 %v1680_v24, %v1624_v37  ;;  %v4994_v47 = vmul.f32 -1.442695, %v1693_v53  ;;  %v4998_v49 = vmul.f32 -1.442695, %v1697_v45 }
 0x31f   :  { %v1696_v52 = vadd.f32 %v1683_v58, %v1622_v55  ;;  %v4995_v38 = vmul.f32 -1.442695, %v1694_v18  ;;  %v4996_v27 = vmul.f32 -1.442695, %v1695_v0  ;;  %v1682_v41 = vcombine.high %v1666_v6, %v1666_v6 }
 0x320   :  { %5718 = vpow2.f32 %v4994_v47  ;;  %v4999_v61 = vmul.f32 -1.442695, %v1698_v54  ;;  %v1626_v57 = vrot.slane %v7439_v9, 1  ;;  %v1684_v1 = vcombine.high %v1680_v24, %v1680_v24 }
 0x321   :  { %5720 = vpow2.f32 %v4995_v38  ;;  %v4997_v21 = vmul.f32 -1.442695, %v1696_v52  ;;  %v1494_v55 = vadd.f32 %v7388_v7, %v6827_v14  ;;  %v1699_v44 = vadd.f32 %v1682_v41, %v1625_v46 }
 0x322   :  { %5722 = vpow2.f32 %v4996_v27  ;;  %v1700_v33 = vadd.f32 %v1684_v1, %v1626_v57 }
 0x323   :  { %v5703_v56 = vpop.eup %5702  ;;  %5724 = vpow2.f32 %v4997_v21  ;;  %v1750_v24 = vcombine.high %v1494_v55, %v1494_v55  ;;  %v1757_v7 = vrot.slane %v1494_v55, %v6750_v59  ;;  %v5000_v47 = vmul.f32 -1.442695, %v1699_v44 }
 0x324   :  { %v1587_v28 = vadd.f32 1.0, %v5703_v56  ;;  %5726 = vpow2.f32 %v4998_v49  ;;  %v5001_v21 = vmul.f32 -1.442695, %v1700_v33  ;;  %v1815_v44 = vrot.slane %v7395_v5, 2 }
 0x325   :  { %v5705_v17 = vpop.eup %5704  ;;  %v1764_v56 = vrot.slane %v1750_v24, %v6750_v59  ;;  %v1765_v41 = vcombine.high %v1757_v7, %v1757_v7 }
 0x326   :  { %v5707_v0 = vpop.eup %5706  ;;  %v1588_v37 = vadd.f32 1.0, %v5705_v17  ;;  %5728 = vrcp.f32 %v1587_v28 }
 0x327   :  { %v5709_v38 = vpop.eup %5708  ;;  %v1589_v52 = vadd.f32 1.0, %v5707_v0  ;;  %5730 = vpow2.f32 %v4999_v61  ;;  %v1766_v55 = vcombine.high %v1764_v56, %v1764_v56  ;;  %v1773_v0 = vrot.slane %v1757_v7, %v6750_v59 }
 0x328   :  { %v5711_v6 = vpop.eup %5710  ;;  %v1590_v27 = vadd.f32 1.0, %v5709_v38  ;;  %5732 = vrcp.f32 %v1588_v37 }
 0x329   :  { %v5713_v40 = vpop.eup %5712  ;;  %v1591_v53 = vadd.f32 1.0, %v5711_v6  ;;  %5734 = vrcp.f32 %v1589_v52  ;;  %v1787_v52 = vrot.slane %v1765_v41, %v6750_v59  ;;  %v1816_v6 = vrot.slane %v7400_v48, 2 }
 0x32a   :  { %v5715_v45 = vpop.eup %5714  ;;  %v1592_v58 = vadd.f32 1.0, %v5713_v40  ;;  %5736 = vrcp.f32 %v1590_v27  ;;  %v1817_v40 = vrot.slane %v7407_v2, 2  ;;  %v1794_v5 = vrot.slane %v1766_v55, %v6750_v59 }
 0x32b   :  { %v5717_v18 = vpop.eup %5716  ;;  %v1593_v54 = vadd.f32 1.0, %v5715_v45  ;;  %5738 = vrcp.f32 %v1591_v53  ;;  %v1818_v53 = vrot.slane %v7412_v8, 2 }
 0x32c   :  { %v1594_v49 = vadd.f32 1.0, %v5717_v18  ;;  %5740 = vrcp.f32 %v1592_v58  ;;  %v1780_v58 = vrot.slane %v1764_v56, %v6750_v59  ;;  %v1819_v18 = vrot.slane %v7418_v60, 2 }
 0x32d   :  { %5742 = vrcp.f32 %v1593_v54  ;;  %v5719_v46 = vpop.eup %5718  ;;  %v1821_v56 = vrot.slane %v7430_v42, 2 }
 0x32e   :  { %5744 = vrcp.f32 %v1594_v49  ;;  %v5721_v61 = vpop.eup %5720  ;;  %v1725_v28 = vadd.f32 1.0, %v5719_v46  ;;  %v1796_v55 = vcombine.high %v1780_v58, %v1780_v58 }
 0x32f   :  { %5746 = vpow2.f32 %v5000_v47  ;;  %v5723_v57 = vpop.eup %5722  ;;  %v1726_v1 = vadd.f32 1.0, %v5721_v61  ;;  %v1795_v47 = vcombine.high %v1773_v0, %v1773_v0  ;;  %v1820_v61 = vrot.slane %v7423_v62, 2 }
 0x330   :  { %5748 = vpow2.f32 %v5001_v21  ;;  %v5725_v17 = vpop.eup %5724  ;;  %v1727_v37 = vadd.f32 1.0, %v5723_v57  ;;  %v1797_v21 = vcombine.high %v1787_v52, %v1787_v52  ;;  %v1822_v57 = vrot.slane %v7439_v9, 2 }
 0x331   :  { %v5727_v38 = vpop.eup %5726  ;;  %v1728_v27 = vadd.f32 1.0, %v5725_v17  ;;  %5750 = vrcp.f32 %v1725_v28 }
 0x332   :  { %v1729_v24 = vadd.f32 1.0, %v5727_v38  ;;  %5752 = vrcp.f32 %v1726_v1 }
 0x333   :  { %v5729_v33 = vpop.eup %5728  ;;  %5754 = vrcp.f32 %v1727_v37 }
 0x334   :  { %v5731_v45 = vpop.eup %5730  ;;  %v1807_v7 = vmul.f32 %v5729_v33, %v1773_v0  ;;  %5756 = vrcp.f32 %v1728_v27 }
 0x335   :  { %v5733_v54 = vpop.eup %5732  ;;  %v1730_v48 = vadd.f32 1.0, %v5731_v45  ;;  %5758 = vrcp.f32 %v1729_v24 }
 0x336   :  { %v5735_v49 = vpop.eup %5734  ;;  %v1808_v2 = vmul.f32 %v5733_v54, %v1787_v52  ;;  %v1831_v46 = vadd.f32 %v1815_v44, %v1807_v7  ;;  %v1798_v52 = vcombine.high %v1794_v5, %v1794_v5 }
 0x337   :  { %v5737_v8 = vpop.eup %5736  ;;  %v1809_v41 = vmul.f32 %v5735_v49, %v1795_v47  ;;  %5760 = vrcp.f32 %v1730_v48 }
 0x338   :  { %v5739_v60 = vpop.eup %5738  ;;  %v1810_v28 = vmul.f32 %v5737_v8, %v1797_v21  ;;  %v1832_v1 = vadd.f32 %v1816_v6, %v1808_v2  ;;  %5762 = vtanh.f32 %v1831_v46 }
 0x339   :  { %v5741_v17 = vpop.eup %5740  ;;  %v1811_v0 = vmul.f32 %v5739_v60, %v1780_v58  ;;  %v1833_v37 = vadd.f32 %v1817_v40, %v1809_v41 }
 0x33a   :  { %v5743_v38 = vpop.eup %5742  ;;  %v1812_v44 = vmul.f32 %v5741_v17, %v1794_v5  ;;  %v1834_v27 = vadd.f32 %v1818_v53, %v1810_v28  ;;  %5764 = vtanh.f32 %v1832_v1 }
 0x33b   :  { %v5745_v62 = vpop.eup %5744  ;;  %v1813_v33 = vmul.f32 %v5743_v38, %v1796_v55  ;;  %v1835_v42 = vadd.f32 %v1819_v18, %v1811_v0  ;;  %5766 = vtanh.f32 %v1833_v37 }
 0x33c   :  { %v5747_v24 = vpop.eup %5746  ;;  %v1814_v45 = vmul.f32 %v5745_v62, %v1798_v52  ;;  %v1836_v7 = vadd.f32 %v1820_v61, %v1812_v44  ;;  %5768 = vtanh.f32 %v1834_v27 }
 0x33d   :  { %v5749_v9 = vpop.eup %5748  ;;  %v1837_v6 = vadd.f32 %v1821_v56, %v1813_v33  ;;  %5770 = vtanh.f32 %v1835_v42  ;;  %v1731_v54 = vadd.f32 1.0, %v5747_v24 }
 0x33e   :  { %v1838_v58 = vadd.f32 %v1822_v57, %v1814_v45  ;;  %5772 = vtanh.f32 %v1836_v7  ;;  %v1732_v40 = vadd.f32 1.0, %v5749_v9  ;;  %v5751_v47 = vpop.eup %5750 }
 0x33f   :  { %5774 = vtanh.f32 %v1837_v6  ;;  %v5753_v53 = vpop.eup %5752  ;;  %v1847_v60 = vsub.f32 1.0, %v5751_v47  ;;  %v1863_v45 = vmul.f32 %v5751_v47, %v7059_v39 }
 0x340   :  { %5776 = vtanh.f32 %v1838_v58  ;;  %v5755_v5 = vpop.eup %5754  ;;  %v1848_v46 = vsub.f32 1.0, %v5753_v53  ;;  %v1864_v52 = vmul.f32 %v5753_v53, %v7054_v51 }
 0x341   :  { %5778 = vrcp.f32 %v1731_v54  ;;  %v5757_v18 = vpop.eup %5756  ;;  %v1849_v41 = vsub.f32 1.0, %v5755_v5  ;;  %v1865_v33 = vmul.f32 %v5755_v5, %v7057_v3 }
 0x342   :  { %5780 = vrcp.f32 %v1732_v40  ;;  %v5759_v48 = vpop.eup %5758  ;;  %v1850_v61 = vsub.f32 1.0, %v5757_v18  ;;  %v1866_v0 = vmul.f32 %v5757_v18, %v7051_v19 }
 0x343   :  { %v1851_v27 = vsub.f32 1.0, %v5759_v48  ;;  %v1867_v3 = vmul.f32 %v5759_v48, %v7070_v34 }
 0x344   :  { %v5761_v49 = vpop.eup %5760 }
 0x345   :  { %v5763_v21 = vpop.eup %5762  ;;  %v1852_v1 = vsub.f32 1.0, %v5761_v49  ;;  %v1868_v19 = vmul.f32 %v5761_v49, %v7062_v25 }
 0x346   :  { %v1855_v38 = vmul.f32 %v5763_v21, %v1847_v60 }
 0x347   :  { %v5765_v2 = vpop.eup %5764 }
 0x348   :  { %v5767_v8 = vpop.eup %5766  ;;  %v1856_v28 = vmul.f32 %v5765_v2, %v1848_v46  ;;  %v7487_v40 = vadd.f32 %v1863_v45, %v1855_v38  ;;  %v8943_v38 = vld [vmem:[#allocation19_spill] sm:$0xff] }
 0x349   :  { %v5769_v56 = vpop.eup %5768  ;;  %v1857_v17 = vmul.f32 %v5767_v8, %v1849_v41  ;;  %v8950_v45 = vld [vmem:[#allocation31_spill] sm:$0xff] }
 0x34a   :  { %v5771_v57 = vpop.eup %5770  ;;  %v1858_v55 = vmul.f32 %v5769_v56, %v1850_v61  ;;  %v7482_v7 = vadd.f32 %v1864_v52, %v1856_v28  ;;  %v8944_v52 = vld [vmem:[#allocation29_spill] sm:$0xff] }
 0x34b   :  { %v5773_v37 = vpop.eup %5772  ;;  %v1859_v6 = vmul.f32 %v5771_v57, %v1851_v27  ;;  %v7485_v54 = vadd.f32 %v1865_v33, %v1857_v17  ;;  %v8939_v17 = vld [vmem:[#allocation14_spill] sm:$0xff]  ;;  %v8948_v33 = vld [vmem:[#allocation23_spill] sm:$0xff] }
 0x34c   :  { %v5775_v44 = vpop.eup %5774  ;;  %v1860_v62 = vmul.f32 %v5773_v37, %v1852_v1  ;;  %v7479_v42 = vadd.f32 %v1866_v0, %v1858_v55  ;;  %v1903_v18 = vcombine.low %v7487_v40, %v7482_v7  ;;  %v8940_v55 = vld [vmem:[#allocation16_spill] sm:$0xff]  ;;  %v8942_v37 = vld [vmem:[#allocation17_spill] sm:$0xff]  ;;  %v8946_v27 = vld [vmem:[#allocation22_spill] sm:$0xff] }
 0x34d   :  { %v5777_v24 = vpop.eup %5776  ;;  %v7498_v2 = vadd.f32 %v1867_v3, %v1859_v6  ;;  %v8941_v0 = vld [vmem:[#allocation28_spill] sm:$0xff]  ;;  %v7582_v6 = vld [vmem:[%s8725_s2 + $0x170] sm:$0xff] }
 0x34e   :  { %v5779_v9 = vpop.eup %5778  ;;  %v7490_v5 = vadd.f32 %v1868_v19, %v1860_v62  ;;  %v1904_v39 = vcombine.low %v7485_v54, %v7479_v42  ;;  %v1913_v61 = vrot.slane %v1903_v18, %v6750_v59  ;;  %v8947_v62 = vld [vmem:[#allocation30_spill] sm:$0xff] }
 0x34f   :  { %v5781_v58 = vpop.eup %5780  ;;  %v1853_v51 = vsub.f32 1.0, %v5779_v9  ;;  %v1869_v25 = vmul.f32 %v5779_v9, %v7072_v32  ;;  %v8951_v9 = vld [vmem:[#allocation34_spill] sm:$0xff] }
 0x350   :  { %v1854_v53 = vsub.f32 1.0, %v5781_v58  ;;  %v1870_v49 = vmul.f32 %v5781_v58, %v7074_v31  ;;  %v1905_v34 = vcombine.low %v7498_v2, %v7490_v5  ;;  %v1920_v48 = vrot.slane %v1904_v39, %v6750_v59 }
 0x351   :  { %v1861_v47 = vmul.f32 %v5775_v44, %v1853_v51  ;;  %v8945_v44 = vld [vmem:[#allocation20_spill] sm:$0xff] }
 0x352   :  { %v1862_v21 = vmul.f32 %v5777_v24, %v1854_v53  ;;  %v1927_v32 = vrot.slane %v1905_v34, %v6750_v59  ;;  %v1935_v56 = vcombine.low %v1913_v61, %v1920_v48  ;;  %v8949_v24 = vld [vmem:[#allocation25_spill] sm:$0xff]  ;;  %v8952_v51 = vld [vmem:[#allocation32_spill] sm:$0xff] }
 0x353   :  { %v7500_v46 = vadd.f32 %v1869_v25, %v1861_v47  ;;  %v7598_v25 = vld [vmem:[%s8728_s0 + $0x1b] ss:$8 sm:$0x7] }
 0x354   :  { %v7502_v8 = vadd.f32 %v1870_v49, %v1862_v21  ;;  %v1943_v28 = vrot.slane %v1935_v56, %v6750_v59  ;;  %v7593_v21 = vld [vmem:[%s8728_s0 + $0x3] ss:$8 sm:$0x7] }
 0x355   :  { %v7610_v61 = vld [vmem:[%s8728_s0 + $0x4b] ss:$8 sm:$0x7] }
 0x356   :  { %v1906_v41 = vcombine.low %v7500_v46, %v7502_v8  ;;  %v7616_v56 = vld [vmem:[%s8728_s0 + $0x63] ss:$8 sm:$0x7] }
 0x358   :  { %v1934_v31 = vrot.slane %v1906_v41, %v6750_v59  ;;  %v7605_v41 = vld [vmem:[%s8728_s0 + $0x33] ss:$8 sm:$0x7] }
 0x35a   :  { %v1936_v60 = vcombine.low %v1927_v32, %v1934_v31  ;;  %v8953_v32 = vld [vmem:[#allocation33_spill] sm:$0xff] }
 0x35c   :  { %v1950_v57 = vrot.slane %v1936_v60, %v6750_v59  ;;  %v7621_v60 = vld [vmem:[%s8728_s0 + $0x7b] ss:$8 sm:$0x7] }
 0x35e   :  { %v1951_v1 = vcombine.low %v1943_v28, %v1950_v57 }
 0x360   :  { %2018 = vmatmul.mubr.f32.vlgmr.msra.gmra.mxu0 %v1951_v1  ;;  %5396 = vmatmul.mubr.f32.vlgmr.msra.gmra.mxu1 %v1951_v1 }
 0x361   :  { %2551 = vmatpush1.msra.mxu0 %v7089_v10  ;;  %5399 = vmatpush3.msra.mxu1 %v7095_v11  ;;  %v8922_v10 = vld [vmem:[#allocation3_spill] sm:$0xff] }
 0x362   :  { %2552 = vmatprep.subr.mxu0 %v7101_v12  ;;  %5400 = vmatprep.subr.mxu1 %v8860_v36  ;;  %v8923_v11 = vld [vmem:[#allocation15_spill] sm:$0xff]  ;;  %v8924_v12 = vld [vmem:[#allocation4_spill] sm:$0xff] }
 0x363   :  { %2553 = vmatpush1.msra.mxu0 %v7108_v4  ;;  %5401 = vmatpush3.msra.mxu1 %v7114_v13  ;;  %v8925_v4 = vld [vmem:[#allocation5_spill] sm:$0xff]  ;;  %v8926_v13 = vld [vmem:[#allocation18_spill] sm:$0xff] }
 0x364   :  { %2554 = vmatprep.subr.mxu0 %v7120_v15  ;;  %5402 = vmatprep.subr.mxu1 %v8860_v36  ;;  %v8927_v15 = vld [vmem:[#allocation6_spill] sm:$0xff] }
 0x365   :  { %2555 = vmatpush1.msra.mxu0 %v7127_v16  ;;  %5403 = vmatpush3.msra.mxu1 %v7133_v20  ;;  %v8928_v16 = vld [vmem:[#allocation7_spill] sm:$0xff]  ;;  %v8929_v20 = vld [vmem:[#allocation21_spill] sm:$0xff] }
 0x366   :  { %2556 = vmatprep.subr.mxu0 %v7139_v23  ;;  %5404 = vmatprep.subr.mxu1 %v8860_v36  ;;  %v8930_v23 = vld [vmem:[#allocation8_spill] sm:$0xff] }
 0x367   :  { %2557 = vmatpush1.msra.mxu0 %v7146_v26  ;;  %5405 = vmatpush3.msra.mxu1 %v7152_v29  ;;  %v8931_v26 = vld [vmem:[#allocation9_spill] sm:$0xff]  ;;  %v8932_v29 = vld [vmem:[#allocation24_spill] sm:$0xff] }
 0x368   :  { %2558 = vmatprep.subr.mxu0 %v7158_v63  ;;  %5406 = vmatprep.subr.mxu1 %v8860_v36  ;;  %v8933_v63 = vld [vmem:[#allocation10_spill] sm:$0xff] }
 0x369   :  { %2559 = vmatpush1.msra.mxu0 %v7165_v50  ;;  %5407 = vmatpush3.msra.mxu1 %v7171_v22  ;;  %v8934_v50 = vld [vmem:[#allocation11_spill] sm:$0xff]  ;;  %v8935_v22 = vld [vmem:[#allocation26_spill] sm:$0xff] }
 0x36a   :  { %2560 = vmatprep.subr.mxu0 %v7177_v35  ;;  %5408 = vmatprep.subr.mxu1 %v8860_v36  ;;  %v8936_v35 = vld [vmem:[#allocation12_spill] sm:$0xff] }
 0x36b   :  { %2561 = vmatpush1.msra.mxu0 %v7184_v43  ;;  %5409 = vmatpush3.msra.mxu1 %v7190_v30  ;;  %v8937_v43 = vld [vmem:[#allocation13_spill] sm:$0xff]  ;;  %v8938_v30 = vld [vmem:[#allocation27_spill] sm:$0xff] }
 0x36c   :  { %2562 = vmatprep.subr.mxu0 %v8922_v10  ;;  %5410 = vmatprep.subr.mxu1 %v8860_v36 }
 0x36d   :  { %2563 = vmatpush1.msra.mxu0 %v8923_v11  ;;  %5411 = vmatpush3.msra.mxu1 %v8924_v12  ;;  %v7628_v11 = vld [vmem:[%s8728_s0 + $0x93] ss:$8 sm:$0x7] }
 0x36e   :  { %2564 = vmatprep.subr.mxu0 %v8925_v4  ;;  %5412 = vmatprep.subr.mxu1 %v8860_v36  ;;  %v2216_v4 = vrot.slane %v7593_v21, 1 }
 0x36f   :  { %2565 = vmatpush1.msra.mxu0 %v8926_v13  ;;  %5413 = vmatpush3.msra.mxu1 %v8927_v15 }
 0x370   :  { %2566 = vmatprep.subr.mxu0 %v8928_v16  ;;  %5414 = vmatprep.subr.mxu1 %v8860_v36 }
 0x371   :  { %2567 = vmatpush1.msra.mxu0 %v8929_v20  ;;  %5415 = vmatpush3.msra.mxu1 %v8930_v23  ;;  %v7637_v23 = vld [vmem:[%s8728_s0 + $0xab] ss:$8 sm:$0x7] }
 0x372   :  { %2568 = vmatprep.subr.mxu0 %v8931_v26  ;;  %5416 = vmatprep.subr.mxu1 %v8860_v36 }
 0x373   :  { %2569 = vmatpush1.msra.mxu0 %v8932_v29  ;;  %5417 = vmatpush3.msra.mxu1 %v8933_v63 }
 0x374   :  { %2570 = vmatprep.subr.mxu0 %v8934_v50  ;;  %5418 = vmatprep.subr.mxu1 %v8860_v36 }
 0x375   :  { %2571 = vmatpush1.msra.mxu0 %v8935_v22  ;;  %5419 = vmatpush3.msra.mxu1 %v8936_v35 }
 0x376   :  { %2572 = vmatprep.subr.mxu0 %v8937_v43  ;;  %5420 = vmatprep.subr.mxu1 %v8860_v36 }
 0x377   :  { %2573 = vmatpush1.msra.mxu0 %v8938_v30  ;;  %5421 = vmatpush3.msra.mxu1 %v8939_v17 }
 0x378   :  { %2574 = vmatprep.subr.mxu0 %v8940_v55  ;;  %5422 = vmatprep.subr.mxu1 %v8860_v36 }
 0x379   :  { %2575 = vmatpush1.msra.mxu0 %v8941_v0  ;;  %5423 = vmatpush3.msra.mxu1 %v8942_v37 }
 0x37a   :  { %2576 = vmatprep.subr.mxu0 %v8943_v38  ;;  %5424 = vmatprep.subr.mxu1 %v8860_v36 }
 0x37b   :  { %2577 = vmatpush1.msra.mxu0 %v8944_v52  ;;  %5425 = vmatpush3.msra.mxu1 %v8945_v44  ;;  %v2217_v44 = vrot.slane %v7598_v25, 1 }
 0x37c   :  { %2578 = vmatprep.subr.mxu0 %v8946_v27  ;;  %5426 = vmatprep.subr.mxu1 %v8860_v36 }
 0x37d   :  { %2579 = vmatpush1.msra.mxu0 %v8947_v62  ;;  %5427 = vmatpush3.msra.mxu1 %v8948_v33  ;;  %v2218_v62 = vrot.slane %v7605_v41, 1  ;;  %v2220_v33 = vrot.slane %v7616_v56, 1 }
 0x37e   :  { %2580 = vmatprep.subr.mxu0 %v8949_v24  ;;  %5428 = vmatprep.subr.mxu1 %v8860_v36 }
 0x37f   :  { %2581 = vmatpush1.msra.mxu0 %v8950_v45  ;;  %2614 = vmatprep.mubr.f32.mxu0 %v8860_v36  ;;  %v2219_v45 = vrot.slane %v7610_v61, 1 }
 0x380   :  { %5429 = vmatpush3.msra.mxu1 %v8951_v9  ;;  %5430 = vmatprep.mubr.msk.f32.mxu1 %vm6327_vm0, %v8860_v36 }
 0x381   :  { %3147 = vmatprep.subr.mxu0 %v7582_v6  ;;  %5433 = vmatprep.subr.mxu1 %v8860_v36 }
 0x420   :  { %v2019_v19 = vpop.f32.mrf.mxu0  ;;  %v7586_v58 = vpop.f32.mrf.mxu1 }
 0x421   :  { %v2020_v53 = vadd.f32 %v2019_v19, %v8952_v51 }
 0x422   :  { %v5397_v3 = vpop.f32.mrf.mxu1  ;;  %v2021_v18 = vpop.f32.mrf.mxu0 }
 0x423   :  { %v2095_v39 = vcombine.high %v2020_v53, %v2020_v53  ;;  %v2102_v47 = vrot.slane %v2020_v53, %v6750_v59  ;;  %v2022_v31 = vadd.f32 %v2021_v18, %v8953_v32 }
 0x425   :  { %v2109_v49 = vrot.slane %v2095_v39, %v6750_v59  ;;  %v2110_v34 = vcombine.high %v2102_v47, %v2102_v47  ;;  %v2118_v48 = vrot.slane %v2102_v47, %v6750_v59  ;;  %v2233_v50 = vcombine.high %v2022_v31, %v2022_v31 }
 0x426   :  { %v2240_v0 = vrot.slane %v2022_v31, %v6750_v59  ;;  %v2221_v39 = vrot.slane %v7621_v60, 1 }
 0x427   :  { %v2111_v28 = vcombine.high %v2109_v49, %v2109_v49  ;;  %v2125_v57 = vrot.slane %v2109_v49, %v6750_v59  ;;  %v2132_v1 = vrot.slane %v2110_v34, %v6750_v59  ;;  %v2140_v10 = vcombine.high %v2118_v48, %v2118_v48 }
 0x428   :  { %v2152_v12 = vadd.f32 %v7593_v21, %v2118_v48  ;;  %v2247_v9 = vrot.slane %v2233_v50, %v6750_v59  ;;  %v2248_v53 = vcombine.high %v2240_v0, %v2240_v0  ;;  %v2256_v3 = vrot.slane %v2240_v0, %v6750_v59 }
 0x429   :  { %v2139_v13 = vrot.slane %v2111_v28, %v6750_v59  ;;  %v2141_v15 = vcombine.high %v2125_v57, %v2125_v57  ;;  %v2142_v16 = vcombine.high %v2132_v1, %v2132_v1  ;;  %v2153_v20 = vadd.f32 %v7598_v25, %v2132_v1 }
 0x42a   :  { %v2154_v26 = vadd.f32 %v7605_v41, %v2140_v10  ;;  %v2156_v29 = vadd.f32 %v7616_v56, %v2125_v57  ;;  %v5010_v63 = vmul.f32 -1.442695, %v2152_v12  ;;  %v2249_v47 = vcombine.high %v2247_v9, %v2247_v9 }
 0x42b   :  { %v2143_v22 = vcombine.high %v2139_v13, %v2139_v13  ;;  %v2155_v35 = vadd.f32 %v7610_v61, %v2142_v16  ;;  %v2157_v43 = vadd.f32 %v7621_v60, %v2139_v13  ;;  %v2158_v30 = vadd.f32 %v7628_v11, %v2141_v15 }
 0x42c   :  { %5782 = vpow2.f32 %v5010_v63  ;;  %v5011_v17 = vmul.f32 -1.442695, %v2153_v20  ;;  %v5012_v55 = vmul.f32 -1.442695, %v2154_v26  ;;  %v5014_v52 = vmul.f32 -1.442695, %v2156_v29 }
 0x42d   :  { %v2159_v37 = vadd.f32 %v7637_v23, %v2143_v22  ;;  %v5013_v38 = vmul.f32 -1.442695, %v2155_v35  ;;  %v5015_v27 = vmul.f32 -1.442695, %v2157_v43  ;;  %v5016_v24 = vmul.f32 -1.442695, %v2158_v30 }
 0x42e   :  { %5784 = vpow2.f32 %v5011_v17  ;;  %v2263_v18 = vrot.slane %v2247_v9, %v6750_v59  ;;  %v2270_v49 = vrot.slane %v2248_v53, %v6750_v59  ;;  %v2278_v34 = vcombine.high %v2256_v3, %v2256_v3 }
 0x42f   :  { %5786 = vpow2.f32 %v5012_v55  ;;  %v5017_v19 = vmul.f32 -1.442695, %v2159_v37  ;;  %v2290_v48 = vadd.f32 %v2256_v3, %v2216_v4  ;;  %v2277_v31 = vrot.slane %v2249_v47, %v6750_v59 }
 0x430   :  { %5788 = vpow2.f32 %v5013_v38  ;;  %v2294_v28 = vadd.f32 %v2263_v18, %v2220_v33  ;;  %v2280_v57 = vcombine.high %v2270_v49, %v2270_v49  ;;  %v2291_v1 = vadd.f32 %v2270_v49, %v2217_v44 }
 0x431   :  { %5790 = vpow2.f32 %v5014_v52  ;;  %v2292_v10 = vadd.f32 %v2278_v34, %v2218_v62  ;;  %v2295_v12 = vadd.f32 %v2277_v31, %v2221_v39  ;;  %v5018_v13 = vmul.f32 -1.442695, %v2290_v48 }
 0x432   :  { %5792 = vpow2.f32 %v5015_v27  ;;  %v2293_v15 = vadd.f32 %v2280_v57, %v2219_v45  ;;  %v5019_v16 = vmul.f32 -1.442695, %v2291_v1  ;;  %v5022_v26 = vmul.f32 -1.442695, %v2294_v28 }
 0x433   :  { %5794 = vpow2.f32 %v5016_v24  ;;  %v5020_v20 = vmul.f32 -1.442695, %v2292_v10  ;;  %v2222_v4 = vrot.slane %v7628_v11, 1  ;;  %v2279_v50 = vcombine.high %v2263_v18, %v2263_v18 }
 0x434   :  { %5796 = vpow2.f32 %v5017_v19  ;;  %v5021_v29 = vmul.f32 -1.442695, %v2293_v15  ;;  %v5023_v22 = vmul.f32 -1.442695, %v2295_v12  ;;  %v2223_v43 = vrot.slane %v7637_v23, 1 }
 0x435   :  { %5798 = vpow2.f32 %v5018_v13  ;;  %v2281_v30 = vcombine.high %v2277_v31, %v2277_v31  ;;  %v2091_v55 = vadd.f32 %v7586_v58, %v6827_v14  ;;  %v2296_v44 = vadd.f32 %v2279_v50, %v2222_v4 }
 0x436   :  { %5800 = vpow2.f32 %v5019_v16 }
 0x437   :  { %5802 = vpow2.f32 %v5020_v20  ;;  %v2297_v33 = vadd.f32 %v2281_v30, %v2223_v43  ;;  %v2347_v9 = vcombine.high %v2091_v55, %v2091_v55  ;;  %v2354_v58 = vrot.slane %v2091_v55, %v6750_v59 }
 0x438   :  { %5804 = vpow2.f32 %v5021_v29  ;;  %v5024_v47 = vmul.f32 -1.442695, %v2296_v44  ;;  %v2412_v29 = vrot.slane %v7593_v21, 2 }
 0x439   :  { %v5783_v63 = vpop.eup %5782  ;;  %5806 = vpow2.f32 %v5022_v26  ;;  %v5025_v49 = vmul.f32 -1.442695, %v2297_v33  ;;  %v2361_v34 = vrot.slane %v2347_v9, %v6750_v59  ;;  %v2362_v31 = vcombine.high %v2354_v58, %v2354_v58 }
 0x43a   :  { %v2184_v35 = vadd.f32 1.0, %v5783_v63  ;;  %v2370_v15 = vrot.slane %v2354_v58, %v6750_v59  ;;  %v2413_v63 = vrot.slane %v7598_v25, 2  ;;  %v2417_v33 = vrot.slane %v7621_v60, 2 }
 0x43b   :  { %v5785_v17 = vpop.eup %5784  ;;  %v2363_v13 = vcombine.high %v2361_v34, %v2361_v34  ;;  %v2384_v26 = vrot.slane %v2362_v31, %v6750_v59  ;;  %v2419_v9 = vrot.slane %v7637_v23, 2 }
 0x43c   :  { %v5787_v0 = vpop.eup %5786  ;;  %v2185_v37 = vadd.f32 1.0, %v5785_v17  ;;  %5808 = vrcp.f32 %v2184_v35  ;;  %v2415_v35 = vrot.slane %v7610_v61, 2  ;;  %v2377_v17 = vrot.slane %v2361_v34, %v6750_v59 }
 0x43d   :  { %v5789_v38 = vpop.eup %5788  ;;  %v2186_v52 = vadd.f32 1.0, %v5787_v0  ;;  %5810 = vpow2.f32 %v5023_v22  ;;  %v2414_v22 = vrot.slane %v7605_v41, 2  ;;  %v2416_v0 = vrot.slane %v7616_v56, 2 }
 0x43e   :  { %v5791_v27 = vpop.eup %5790  ;;  %v2187_v62 = vadd.f32 1.0, %v5789_v38  ;;  %5812 = vrcp.f32 %v2185_v37  ;;  %v2391_v21 = vrot.slane %v2363_v13, %v6750_v59  ;;  %v2392_v38 = vcombine.high %v2370_v15, %v2370_v15 }
 0x43f   :  { %v5793_v24 = vpop.eup %5792  ;;  %v2188_v45 = vadd.f32 1.0, %v5791_v27  ;;  %5814 = vrcp.f32 %v2186_v52  ;;  %v2394_v44 = vcombine.high %v2384_v26, %v2384_v26  ;;  %v2393_v58 = vcombine.high %v2377_v17, %v2377_v17 }
 0x440   :  { %v5795_v19 = vpop.eup %5794  ;;  %v2189_v53 = vadd.f32 1.0, %v5793_v24  ;;  %5816 = vrcp.f32 %v2187_v62  ;;  %v2418_v24 = vrot.slane %v7628_v11, 2 }
 0x441   :  { %v5797_v3 = vpop.eup %5796  ;;  %v2190_v39 = vadd.f32 1.0, %v5795_v19  ;;  %5818 = vrcp.f32 %v2188_v45 }
 0x442   :  { %v2191_v18 = vadd.f32 1.0, %v5797_v3  ;;  %5820 = vrcp.f32 %v2189_v53  ;;  %v5799_v48 = vpop.eup %5798 }
 0x443   :  { %5822 = vrcp.f32 %v2190_v39  ;;  %v5801_v28 = vpop.eup %5800  ;;  %v2322_v57 = vadd.f32 1.0, %v5799_v48 }
 0x444   :  { %5824 = vrcp.f32 %v2191_v18  ;;  %v5803_v1 = vpop.eup %5802  ;;  %v2323_v10 = vadd.f32 1.0, %v5801_v28  ;;  %v2395_v18 = vcombine.high %v2391_v21, %v2391_v21 }
 0x445   :  { %5826 = vpow2.f32 %v5024_v47  ;;  %v5805_v12 = vpop.eup %5804  ;;  %v2324_v16 = vadd.f32 1.0, %v5803_v1 }
 0x446   :  { %5828 = vpow2.f32 %v5025_v49  ;;  %v5807_v20 = vpop.eup %5806  ;;  %v2325_v4 = vadd.f32 1.0, %v5805_v12 }
 0x447   :  { %v2326_v43 = vadd.f32 1.0, %v5807_v20  ;;  %5830 = vrcp.f32 %v2322_v57 }
 0x448   :  { %5832 = vrcp.f32 %v2323_v10 }
 0x449   :  { %v5809_v50 = vpop.eup %5808  ;;  %5834 = vrcp.f32 %v2324_v16 }
 0x44a   :  { %v5811_v30 = vpop.eup %5810  ;;  %v2404_v55 = vmul.f32 %v5809_v50, %v2370_v15  ;;  %5836 = vrcp.f32 %v2325_v4 }
 0x44b   :  { %v5813_v37 = vpop.eup %5812  ;;  %v2327_v25 = vadd.f32 1.0, %v5811_v30  ;;  %5838 = vrcp.f32 %v2326_v43 }
 0x44c   :  { %v5815_v52 = vpop.eup %5814  ;;  %v2405_v41 = vmul.f32 %v5813_v37, %v2384_v26  ;;  %v2428_v27 = vadd.f32 %v2412_v29, %v2404_v55 }
 0x44d   :  { %v5817_v61 = vpop.eup %5816  ;;  %v2406_v62 = vmul.f32 %v5815_v52, %v2392_v38  ;;  %5840 = vrcp.f32 %v2327_v25 }
 0x44e   :  { %v5819_v56 = vpop.eup %5818  ;;  %v2407_v45 = vmul.f32 %v5817_v61, %v2394_v44  ;;  %v2429_v19 = vadd.f32 %v2413_v63, %v2405_v41  ;;  %5842 = vtanh.f32 %v2428_v27 }
 0x44f   :  { %v5821_v53 = vpop.eup %5820  ;;  %v2408_v3 = vmul.f32 %v5819_v56, %v2377_v17  ;;  %v2430_v39 = vadd.f32 %v2414_v22, %v2406_v62 }
 0x450   :  { %v5823_v47 = vpop.eup %5822  ;;  %v2409_v49 = vmul.f32 %v5821_v53, %v2391_v21  ;;  %v2431_v34 = vadd.f32 %v2415_v35, %v2407_v45  ;;  %5844 = vtanh.f32 %v2429_v19 }
 0x451   :  { %v5825_v60 = vpop.eup %5824  ;;  %v2410_v48 = vmul.f32 %v5823_v47, %v2393_v58  ;;  %v2432_v11 = vadd.f32 %v2416_v0, %v2408_v3  ;;  %5846 = vtanh.f32 %v2430_v39 }
 0x452   :  { %v5827_v31 = vpop.eup %5826  ;;  %v2411_v28 = vmul.f32 %v5825_v60, %v2395_v18  ;;  %v2433_v57 = vadd.f32 %v2417_v33, %v2409_v49  ;;  %5848 = vtanh.f32 %v2431_v34 }
 0x453   :  { %v5829_v23 = vpop.eup %5828  ;;  %v2434_v1 = vadd.f32 %v2418_v24, %v2410_v48  ;;  %5850 = vtanh.f32 %v2432_v11  ;;  %v2328_v10 = vadd.f32 1.0, %v5827_v31 }
 0x454   :  { %v2435_v12 = vadd.f32 %v2419_v9, %v2411_v28  ;;  %5852 = vtanh.f32 %v2433_v57  ;;  %v2329_v13 = vadd.f32 1.0, %v5829_v23  ;;  %v5831_v15 = vpop.eup %5830 }
 0x455   :  { %5854 = vtanh.f32 %v2434_v1  ;;  %v5833_v16 = vpop.eup %5832  ;;  %v2444_v55 = vsub.f32 1.0, %v5831_v15  ;;  %v2460_v9 = vmul.f32 %v5831_v15, %v7487_v40 }
 0x456   :  { %5856 = vtanh.f32 %v2435_v12  ;;  %v5835_v20 = vpop.eup %5834  ;;  %v2445_v22 = vsub.f32 1.0, %v5833_v16  ;;  %v2461_v27 = vmul.f32 %v5833_v16, %v7482_v7 }
 0x457   :  { %5858 = vrcp.f32 %v2328_v10  ;;  %v5837_v26 = vpop.eup %5836  ;;  %v2446_v43 = vsub.f32 1.0, %v5835_v20  ;;  %v2462_v24 = vmul.f32 %v5835_v20, %v7485_v54 }
 0x458   :  { %5860 = vrcp.f32 %v2329_v13  ;;  %v5839_v29 = vpop.eup %5838  ;;  %v2447_v30 = vsub.f32 1.0, %v5837_v26  ;;  %v2463_v52 = vmul.f32 %v5837_v26, %v7479_v42  ;;  %v7715_v26 = vld [vmem:[%s8725_s2 + $0x168] sm:$0xff] }
 0x459   :  { %v2448_v62 = vsub.f32 1.0, %v5839_v29  ;;  %v2464_v54 = vmul.f32 %v5839_v29, %v7498_v2  ;;  %v7721_v29 = vld [vmem:[%s8725_s2 + $0x178] sm:$0xff] }
 0x45a   :  { %v5841_v63 = vpop.eup %5840 }
 0x45b   :  { %v5843_v4 = vpop.eup %5842  ;;  %v2449_v21 = vsub.f32 1.0, %v5841_v63  ;;  %v2465_v42 = vmul.f32 %v5841_v63, %v7490_v5  ;;  %v7727_v63 = vld [vmem:[%s8725_s2 + $0x158] sm:$0xff] }
 0x45c   :  { %v2452_v41 = vmul.f32 %v5843_v4, %v2444_v55  ;;  %v7734_v4 = vld [vmem:[%s8725_s2 + $0x150] sm:$0xff] }
 0x45d   :  { %v5845_v50 = vpop.eup %5844  ;;  %v7778_v55 = vld [vmem:[%s8725_s2 + $0x130] sm:$0xff] }
 0x45e   :  { %v5847_v35 = vpop.eup %5846  ;;  %v2453_v0 = vmul.f32 %v5845_v50, %v2445_v22  ;;  %v7685_v47 = vadd.f32 %v2460_v9, %v2452_v41  ;;  %v7740_v50 = vld [vmem:[%s8725_s2 + $0x160] sm:$0xff]  ;;  %v7829_v41 = vld [vmem:[%s8725_s2 + $0xd8] sm:$0xff] }
 0x45f   :  { %v5849_v17 = vpop.eup %5848  ;;  %v2454_v38 = vmul.f32 %v5847_v35, %v2446_v43  ;;  %v7746_v22 = vld [vmem:[%s8725_s2 + $0x140] sm:$0xff]  ;;  %v7753_v35 = vld [vmem:[%s8725_s2 + $0x138] sm:$0xff]  ;;  %v7759_v43 = vld [vmem:[%s8725_s2 + $0x148] sm:$0xff]  ;;  %8955 = vst [vmem:[#allocation15_spill] sm:$0xff] %v7829_v41 }
 0x460   :  { %v5851_v37 = vpop.eup %5850  ;;  %v2455_v25 = vmul.f32 %v5849_v17, %v2447_v30  ;;  %v7680_v19 = vadd.f32 %v2461_v27, %v2453_v0  ;;  %v7765_v30 = vld [vmem:[%s8725_s2 + $0x128] sm:$0xff]  ;;  %v7772_v17 = vld [vmem:[%s8725_s2 + $0x120] sm:$0xff]  ;;  %v7784_v0 = vld [vmem:[%s8725_s2 + $0x110] sm:$0xff] }
 0x461   :  { %v5853_v44 = vpop.eup %5852  ;;  %v2456_v58 = vmul.f32 %v5851_v37, %v2448_v62  ;;  %v7683_v3 = vadd.f32 %v2462_v24, %v2454_v38  ;;  %v7791_v37 = vld [vmem:[%s8725_s2 + $0x108] sm:$0xff]  ;;  %v7803_v38 = vld [vmem:[%s8725_s2 + $0xf8] sm:$0xff]  ;;  %v7848_v62 = vld [vmem:[%s8725_s2 + $0xc0] sm:$0xff] }
 0x462   :  { %v5855_v61 = vpop.eup %5854  ;;  %v2457_v33 = vmul.f32 %v5853_v44, %v2449_v21  ;;  %v7677_v56 = vadd.f32 %v2463_v52, %v2455_v25  ;;  %v2500_v60 = vcombine.low %v7685_v47, %v7680_v19  ;;  %v7797_v21 = vld [vmem:[%s8725_s2 + $0x118] sm:$0xff]  ;;  %v7810_v25 = vld [vmem:[%s8725_s2 + $0xf0] sm:$0xff]  ;;  %v7816_v52 = vld [vmem:[%s8725_s2 + $0x100] sm:$0xff]  ;;  %8958 = vst [vmem:[#allocation18_spill] sm:$0xff] %v7848_v62 }
 0x463   :  { %v5857_v45 = vpop.eup %5856  ;;  %v7696_v31 = vadd.f32 %v2464_v54, %v2456_v58  ;;  %v7822_v44 = vld [vmem:[%s8725_s2 + $0xe0] sm:$0xff]  ;;  %v7835_v27 = vld [vmem:[%s8725_s2 + $0xe8] sm:$0xff]  ;;  %v7860_v24 = vld [vmem:[%s8725_s2 + $0xb0] sm:$0xff] }
 0x464   :  { %v5859_v53 = vpop.eup %5858  ;;  %v7688_v49 = vadd.f32 %v2465_v42, %v2457_v33  ;;  %v2501_v40 = vcombine.low %v7683_v3, %v7677_v56  ;;  %v2510_v10 = vrot.slane %v2500_v60, %v6750_v59  ;;  %8954 = vst [vmem:[#allocation3_spill] sm:$0xff] %v7822_v44  ;;  %8956 = vst [vmem:[#allocation4_spill] sm:$0xff] %v7835_v27  ;;  %v7854_v33 = vld [vmem:[%s8725_s2 + $0xd0] sm:$0xff]  ;;  %v7873_v9 = vld [vmem:[%s8725_s2 + $0xb8] sm:$0xff] }
 0x465   :  { %v5861_v39 = vpop.eup %5860  ;;  %v2450_v7 = vsub.f32 1.0, %v5859_v53  ;;  %v2466_v5 = vmul.f32 %v5859_v53, %v7500_v46  ;;  %8959 = vst [vmem:[#allocation6_spill] sm:$0xff] %v7854_v33  ;;  %8960 = vst [vmem:[#allocation7_spill] sm:$0xff] %v7860_v24  ;;  %v7879_v53 = vld [vmem:[%s8725_s2 + $0x98] sm:$0xff]  ;;  %v7886_v58 = vld [vmem:[%s8725_s2 + $0x90] sm:$0xff] }
 0x466   :  { %v2451_v18 = vsub.f32 1.0, %v5861_v39  ;;  %v2467_v11 = vmul.f32 %v5861_v39, %v7502_v8  ;;  %v2502_v2 = vcombine.low %v7696_v31, %v7688_v49  ;;  %v2517_v23 = vrot.slane %v2501_v40, %v6750_v59  ;;  %8962 = vst [vmem:[#allocation8_spill] sm:$0xff] %v7873_v9  ;;  %8963 = vst [vmem:[#allocation9_spill] sm:$0xff] %v7879_v53  ;;  %v7892_v42 = vld [vmem:[%s8725_s2 + $0xa0] sm:$0xff]  ;;  %v7917_v54 = vld [vmem:[%s8725_s2 + $0x68] sm:$0xff] }
 0x467   :  { %v2458_v34 = vmul.f32 %v5855_v61, %v2450_v7  ;;  %v7841_v61 = vld [vmem:[%s8725_s2 + $0xc8] sm:$0xff]  ;;  %8964 = vst [vmem:[#allocation24_spill] sm:$0xff] %v7886_v58  ;;  %8965 = vst [vmem:[#allocation10_spill] sm:$0xff] %v7892_v42  ;;  %v7898_v39 = vld [vmem:[%s8725_s2 + $0x80] sm:$0xff] }
 0x468   :  { %v2459_v48 = vmul.f32 %v5857_v45, %v2451_v18  ;;  %v2524_v46 = vrot.slane %v2502_v2, %v6750_v59  ;;  %v2532_v12 = vcombine.low %v2510_v10, %v2517_v23  ;;  %8957 = vst [vmem:[#allocation5_spill] sm:$0xff] %v7841_v61  ;;  %v7867_v45 = vld [vmem:[%s8725_s2 + $0xa8] sm:$0xff]  ;;  %8966 = vst [vmem:[#allocation11_spill] sm:$0xff] %v7898_v39  ;;  %v7905_v7 = vld [vmem:[%s8725_s2 + $0x78] sm:$0xff] }
 0x469   :  { %v7698_v28 = vadd.f32 %v2466_v5, %v2458_v34  ;;  %8961 = vst [vmem:[#allocation21_spill] sm:$0xff] %v7867_v45  ;;  %8967 = vst [vmem:[#allocation26_spill] sm:$0xff] %v7905_v7  ;;  %v7911_v18 = vld [vmem:[%s8725_s2 + $0x88] sm:$0xff]  ;;  %v7924_v40 = vld [vmem:[%s8725_s2 + $0x60] sm:$0xff] }
 0x46a   :  { %v7700_v57 = vadd.f32 %v2467_v11, %v2459_v48  ;;  %v2540_v15 = vrot.slane %v2532_v12, %v6750_v59  ;;  %8968 = vst [vmem:[#allocation12_spill] sm:$0xff] %v7911_v18  ;;  %8969 = vst [vmem:[#allocation13_spill] sm:$0xff] %v7917_v54  ;;  %v7930_v34 = vld [vmem:[%s8725_s2 + $0x70] sm:$0xff]  ;;  %v7943_v48 = vld [vmem:[%s8725_s2 + $0x48] sm:$0xff] }
 0x46b   :  { %8970 = vst [vmem:[#allocation27_spill] sm:$0xff] %v7924_v40  ;;  %8971 = vst [vmem:[#allocation14_spill] sm:$0xff] %v7930_v34  ;;  %v7936_v60 = vld [vmem:[%s8725_s2 + $0x50] sm:$0xff]  ;;  %v7949_v5 = vld [vmem:[%s8725_s2 + $0x58] sm:$0xff] }
 0x46c   :  { %v2503_v1 = vcombine.low %v7698_v28, %v7700_v57  ;;  %8972 = vst [vmem:[#allocation16_spill] sm:$0xff] %v7936_v60  ;;  %8973 = vst [vmem:[#allocation28_spill] sm:$0xff] %v7943_v48  ;;  %v7955_v11 = vld [vmem:[%s8725_s2 + $0x38] sm:$0xff]  ;;  %v7962_v2 = vld [vmem:[%s8725_s2 + $0x30] sm:$0xff] }
 0x46d   :  { %8974 = vst [vmem:[#allocation17_spill] sm:$0xff] %v7949_v5  ;;  %8975 = vst [vmem:[#allocation19_spill] sm:$0xff] %v7955_v11  ;;  %v7968_v23 = vld [vmem:[%s8725_s2 + $0x40] sm:$0xff]  ;;  %v7981_v10 = vld [vmem:[%s8725_s2 + $0x18] sm:$0xff] }
 0x46e   :  { %v2531_v8 = vrot.slane %v2503_v1, %v6750_v59  ;;  %8976 = vst [vmem:[#allocation29_spill] sm:$0xff] %v7962_v2  ;;  %8977 = vst [vmem:[#allocation20_spill] sm:$0xff] %v7968_v23  ;;  %v7974_v1 = vld [vmem:[%s8725_s2 + $0x20] sm:$0xff] }
 0x46f   :  { %8978 = vst [vmem:[#allocation22_spill] sm:$0xff] %v7974_v1  ;;  %8979 = vst [vmem:[#allocation30_spill] sm:$0xff] %v7981_v10  ;;  %v8000_v12 = vld [vmem:[%s8725_s2] sm:$0xff] }
 0x470   :  { %v2533_v13 = vcombine.low %v2524_v46, %v2531_v8  ;;  %v7987_v46 = vld [vmem:[%s8725_s2 + $0x28] sm:$0xff]  ;;  %8982 = vst [vmem:[#allocation31_spill] sm:$0xff] %v8000_v12 }
 0x471   :  { %8980 = vst [vmem:[#allocation23_spill] sm:$0xff] %v7987_v46  ;;  %v7993_v8 = vld [vmem:[%s8725_s2 + $0x8] sm:$0xff] }
 0x472   :  { %v2547_v16 = vrot.slane %v2533_v13, %v6750_v59  ;;  %8981 = vst [vmem:[#allocation25_spill] sm:$0xff] %v7993_v8  ;;  %v8007_v13 = vld [vmem:[%s8725_s2 + $0x10] sm:$0xff] }
 0x473   :  { %8983 = vst [vmem:[#allocation34_spill] sm:$0xff] %v8007_v13 }
 0x474   :  { %v2548_v20 = vcombine.low %v2540_v15, %v2547_v16 }
 0x476   :  { %2615 = vmatmul.mubr.f32.vlgmr.msra.gmra.mxu0 %v2548_v20  ;;  %5431 = vmatmul.mubr.f32.vlgmr.msra.gmra.mxu1 %v2548_v20 }
 0x477   :  { %3148 = vmatpush1.msra.mxu0 %v7715_v26  ;;  %5434 = vmatpush3.msra.mxu1 %v7721_v29 }
 0x478   :  { %3149 = vmatprep.subr.mxu0 %v7727_v63  ;;  %5435 = vmatprep.subr.mxu1 %v8860_v36 }
 0x479   :  { %3150 = vmatpush1.msra.mxu0 %v7734_v4  ;;  %5436 = vmatpush3.msra.mxu1 %v7740_v50 }
 0x47a   :  { %3151 = vmatprep.subr.mxu0 %v7746_v22  ;;  %5437 = vmatprep.subr.mxu1 %v8860_v36 }
 0x47b   :  { %3152 = vmatpush1.msra.mxu0 %v7753_v35  ;;  %5438 = vmatpush3.msra.mxu1 %v7759_v43 }
 0x47c   :  { %3153 = vmatprep.subr.mxu0 %v7765_v30  ;;  %5439 = vmatprep.subr.mxu1 %v8860_v36 }
 0x47d   :  { %3154 = vmatpush1.msra.mxu0 %v7772_v17  ;;  %5440 = vmatpush3.msra.mxu1 %v7778_v55 }
 0x47e   :  { %3155 = vmatprep.subr.mxu0 %v7784_v0  ;;  %5441 = vmatprep.subr.mxu1 %v8860_v36 }
 0x47f   :  { %3156 = vmatpush1.msra.mxu0 %v7791_v37  ;;  %5442 = vmatpush3.msra.mxu1 %v7797_v21 }
 0x480   :  { %3157 = vmatprep.subr.mxu0 %v7803_v38  ;;  %5443 = vmatprep.subr.mxu1 %v8860_v36 }
 0x481   :  { %3158 = vmatpush1.msra.mxu0 %v7810_v25  ;;  %5444 = vmatpush3.msra.mxu1 %v7816_v52 }
 0x482   :  { %3159 = vmatprep.subr.mxu0 %v7822_v44  ;;  %5445 = vmatprep.subr.mxu1 %v8860_v36 }
 0x483   :  { %3160 = vmatpush1.msra.mxu0 %v7829_v41  ;;  %5446 = vmatpush3.msra.mxu1 %v7835_v27 }
 0x484   :  { %3161 = vmatprep.subr.mxu0 %v7841_v61  ;;  %5447 = vmatprep.subr.mxu1 %v8860_v36 }
 0x485   :  { %3162 = vmatpush1.msra.mxu0 %v7848_v62  ;;  %5448 = vmatpush3.msra.mxu1 %v7854_v33 }
 0x486   :  { %3163 = vmatprep.subr.mxu0 %v7860_v24  ;;  %5449 = vmatprep.subr.mxu1 %v8860_v36 }
 0x487   :  { %3164 = vmatpush1.msra.mxu0 %v7867_v45  ;;  %5450 = vmatpush3.msra.mxu1 %v7873_v9 }
 0x488   :  { %3165 = vmatprep.subr.mxu0 %v7879_v53  ;;  %5451 = vmatprep.subr.mxu1 %v8860_v36 }
 0x489   :  { %3166 = vmatpush1.msra.mxu0 %v7886_v58  ;;  %5452 = vmatpush3.msra.mxu1 %v7892_v42 }
 0x48a   :  { %3167 = vmatprep.subr.mxu0 %v7898_v39  ;;  %5453 = vmatprep.subr.mxu1 %v8860_v36 }
 0x48b   :  { %3168 = vmatpush1.msra.mxu0 %v7905_v7  ;;  %5454 = vmatpush3.msra.mxu1 %v7911_v18 }
 0x48c   :  { %3169 = vmatprep.subr.mxu0 %v7917_v54  ;;  %5455 = vmatprep.subr.mxu1 %v8860_v36 }
 0x48d   :  { %3170 = vmatpush1.msra.mxu0 %v7924_v40  ;;  %5456 = vmatpush3.msra.mxu1 %v7930_v34 }
 0x48e   :  { %3171 = vmatprep.subr.mxu0 %v7936_v60  ;;  %5457 = vmatprep.subr.mxu1 %v8860_v36 }
 0x48f   :  { %3172 = vmatpush1.msra.mxu0 %v7943_v48  ;;  %5458 = vmatpush3.msra.mxu1 %v7949_v5 }
 0x490   :  { %3173 = vmatprep.subr.mxu0 %v7955_v11  ;;  %5459 = vmatprep.subr.mxu1 %v8860_v36 }
 0x491   :  { %3174 = vmatpush1.msra.mxu0 %v7962_v2  ;;  %5460 = vmatpush3.msra.mxu1 %v7968_v23  ;;  %v8044_v2 = vld [vmem:[%s8728_s0 + $0x64] ss:$8 sm:$0x7] }
 0x492   :  { %3175 = vmatprep.subr.mxu0 %v7974_v1  ;;  %5461 = vmatprep.subr.mxu1 %v8860_v36 }
 0x493   :  { %3176 = vmatpush1.msra.mxu0 %v7981_v10  ;;  %5462 = vmatpush3.msra.mxu1 %v7987_v46 }
 0x494   :  { %3177 = vmatprep.subr.mxu0 %v7993_v8  ;;  %5463 = vmatprep.subr.mxu1 %v8860_v36 }
 0x495   :  { %3178 = vmatpush1.msra.mxu0 %v8000_v12  ;;  %3211 = vmatprep.mubr.f32.mxu0 %v8860_v36 }
 0x496   :  { %5464 = vmatpush3.msra.mxu1 %v8007_v13  ;;  %5465 = vmatprep.mubr.msk.f32.mxu1 %vm6327_vm0, %v8860_v36  ;;  %v8021_v13 = vld [vmem:[%s8728_s0 + $0x4] ss:$8 sm:$0x7] }
 0x497   :  { %3744 = vmatprep.subr.mxu0 %v7582_v6  ;;  %5468 = vmatprep.subr.mxu1 %v8860_v36  ;;  %v8026_v6 = vld [vmem:[%s8728_s0 + $0x1c] ss:$8 sm:$0x7]  ;;  %v2813_v60 = vrot.slane %v8021_v13, 1 }
 0x536   :  { %v2616_v15 = vpop.f32.mrf.mxu0  ;;  %v8014_v16 = vpop.f32.mrf.mxu1 }
 0x537   :  { %v2617_v20 = vadd.f32 %v2616_v15, %v8952_v51 }
 0x538   :  { %v5432_v12 = vpop.f32.mrf.mxu1  ;;  %v2618_v10 = vpop.f32.mrf.mxu0 }
 0x539   :  { %v2692_v8 = vcombine.high %v2617_v20, %v2617_v20  ;;  %v2699_v46 = vrot.slane %v2617_v20, %v6750_v59  ;;  %v8033_v12 = vld [vmem:[%s8728_s0 + $0x34] ss:$8 sm:$0x7]  ;;  %v2619_v51 = vadd.f32 %v2618_v10, %v8953_v32 }
 0x53a   :  { %v8038_v20 = vld [vmem:[%s8728_s0 + $0x4c] ss:$8 sm:$0x7]  ;;  %v2815_v62 = vrot.slane %v8033_v12, 1 }
 0x53b   :  { %v2706_v1 = vrot.slane %v2692_v8, %v6750_v59  ;;  %v2707_v23 = vcombine.high %v2699_v46, %v2699_v46  ;;  %v2715_v15 = vrot.slane %v2699_v46, %v6750_v59  ;;  %v8049_v46 = vld [vmem:[%s8728_s0 + $0x7c] ss:$8 sm:$0x7]  ;;  %v2830_v42 = vcombine.high %v2619_v51, %v2619_v51 }
 0x53c   :  { %v8056_v10 = vld [vmem:[%s8728_s0 + $0x94] ss:$8 sm:$0x7]  ;;  %v2837_v45 = vrot.slane %v2619_v51, %v6750_v59 }
 0x53d   :  { %v2708_v8 = vcombine.high %v2706_v1, %v2706_v1  ;;  %v2722_v11 = vrot.slane %v2706_v1, %v6750_v59  ;;  %v2729_v5 = vrot.slane %v2707_v23, %v6750_v59  ;;  %v2737_v48 = vcombine.high %v2715_v15, %v2715_v15  ;;  %v8065_v23 = vld [vmem:[%s8728_s0 + $0xac] ss:$8 sm:$0x7] }
 0x53e   :  { %v2749_v32 = vadd.f32 %v8021_v13, %v2715_v15 }
 0x53f   :  { %v2736_v34 = vrot.slane %v2708_v8, %v6750_v59  ;;  %v2738_v40 = vcombine.high %v2722_v11, %v2722_v11  ;;  %v2739_v54 = vcombine.high %v2729_v5, %v2729_v5  ;;  %v2750_v18 = vadd.f32 %v8026_v6, %v2729_v5 }
 0x540   :  { %v2751_v1 = vadd.f32 %v8033_v12, %v2737_v48  ;;  %v2753_v7 = vadd.f32 %v8044_v2, %v2722_v11  ;;  %v5034_v39 = vmul.f32 -1.442695, %v2749_v32  ;;  %v2814_v11 = vrot.slane %v8026_v6, 1 }
 0x541   :  { %v2740_v15 = vcombine.high %v2736_v34, %v2736_v34  ;;  %v2752_v58 = vadd.f32 %v8038_v20, %v2739_v54  ;;  %v2754_v8 = vadd.f32 %v8049_v46, %v2736_v34  ;;  %v2755_v53 = vadd.f32 %v8056_v10, %v2738_v40 }
 0x542   :  { %5862 = vpow2.f32 %v5034_v39  ;;  %v5035_v5 = vmul.f32 -1.442695, %v2750_v18  ;;  %v5036_v9 = vmul.f32 -1.442695, %v2751_v1  ;;  %v5038_v48 = vmul.f32 -1.442695, %v2753_v7 }
 0x543   :  { %v2756_v24 = vadd.f32 %v8065_v23, %v2740_v15  ;;  %v5037_v33 = vmul.f32 -1.442695, %v2752_v58  ;;  %v5039_v32 = vmul.f32 -1.442695, %v2754_v8  ;;  %v2817_v54 = vrot.slane %v8044_v2, 1 }
 0x544   :  { %5864 = vpow2.f32 %v5035_v5  ;;  %v5040_v34 = vmul.f32 -1.442695, %v2755_v53  ;;  %v2816_v39 = vrot.slane %v8038_v20, 1  ;;  %v2844_v18 = vrot.slane %v2830_v42, %v6750_v59 }
 0x545   :  { %5866 = vpow2.f32 %v5036_v9  ;;  %v5041_v51 = vmul.f32 -1.442695, %v2756_v24  ;;  %v2845_v40 = vcombine.high %v2837_v45, %v2837_v45  ;;  %v2853_v58 = vrot.slane %v2837_v45, %v6750_v59 }
 0x546   :  { %5868 = vpow2.f32 %v5037_v33  ;;  %v2818_v7 = vrot.slane %v8049_v46, 1  ;;  %v2846_v1 = vcombine.high %v2844_v18, %v2844_v18  ;;  %v2860_v15 = vrot.slane %v2844_v18, %v6750_v59 }
 0x547   :  { %5870 = vpow2.f32 %v5038_v48  ;;  %v2867_v8 = vrot.slane %v2845_v40, %v6750_v59  ;;  %v2875_v9 = vcombine.high %v2853_v58, %v2853_v58  ;;  %v2887_v53 = vadd.f32 %v2853_v58, %v2813_v60 }
 0x548   :  { %5872 = vpow2.f32 %v5039_v32  ;;  %v2874_v5 = vrot.slane %v2846_v1, %v6750_v59  ;;  %v2891_v42 = vadd.f32 %v2860_v15, %v2817_v54  ;;  %v2819_v60 = vrot.slane %v8056_v10, 1 }
 0x549   :  { %5874 = vpow2.f32 %v5040_v34  ;;  %v2877_v33 = vcombine.high %v2867_v8, %v2867_v8  ;;  %v2888_v24 = vadd.f32 %v2867_v8, %v2814_v11  ;;  %v2889_v61 = vadd.f32 %v2875_v9, %v2815_v62 }
 0x54a   :  { %5876 = vpow2.f32 %v5041_v51  ;;  %v2892_v45 = vadd.f32 %v2874_v5, %v2818_v7  ;;  %v5042_v48 = vmul.f32 -1.442695, %v2887_v53  ;;  %v5046_v18 = vmul.f32 -1.442695, %v2891_v42 }
 0x54b   :  { %v2890_v27 = vadd.f32 %v2877_v33, %v2816_v39  ;;  %v5043_v41 = vmul.f32 -1.442695, %v2888_v24  ;;  %v5044_v44 = vmul.f32 -1.442695, %v2889_v61  ;;  %v2876_v34 = vcombine.high %v2860_v15, %v2860_v15 }
 0x54c   :  { %5878 = vpow2.f32 %v5042_v48  ;;  %v5047_v58 = vmul.f32 -1.442695, %v2892_v45  ;;  %v2820_v51 = vrot.slane %v8065_v23, 1  ;;  %v2878_v11 = vcombine.high %v2874_v5, %v2874_v5 }
 0x54d   :  { %5880 = vpow2.f32 %v5043_v41  ;;  %v5045_v32 = vmul.f32 -1.442695, %v2890_v27  ;;  %v2688_v39 = vadd.f32 %v8014_v16, %v6827_v14  ;;  %v2893_v1 = vadd.f32 %v2876_v34, %v2819_v60 }
 0x54e   :  { %5882 = vpow2.f32 %v5044_v44  ;;  %v2894_v8 = vadd.f32 %v2878_v11, %v2820_v51 }
 0x54f   :  { %v5863_v40 = vpop.eup %5862  ;;  %5884 = vpow2.f32 %v5045_v32  ;;  %v2944_v5 = vcombine.high %v2688_v39, %v2688_v39  ;;  %v2951_v16 = vrot.slane %v2688_v39, %v6750_v59  ;;  %v5048_v48 = vmul.f32 -1.442695, %v2893_v1 }
 0x550   :  { %v2781_v54 = vadd.f32 1.0, %v5863_v40  ;;  %5886 = vpow2.f32 %v5046_v18  ;;  %v5049_v32 = vmul.f32 -1.442695, %v2894_v8  ;;  %v3009_v1 = vrot.slane %v8021_v13, 2 }
 0x551   :  { %v5865_v62 = vpop.eup %5864  ;;  %v2958_v40 = vrot.slane %v2944_v5, %v6750_v59  ;;  %v2959_v34 = vcombine.high %v2951_v16, %v2951_v16 }
 0x552   :  { %v5867_v61 = vpop.eup %5866  ;;  %v2782_v7 = vadd.f32 1.0, %v5865_v62  ;;  %5888 = vrcp.f32 %v2781_v54 }
 0x553   :  { %v5869_v41 = vpop.eup %5868  ;;  %v2783_v27 = vadd.f32 1.0, %v5867_v61  ;;  %5890 = vpow2.f32 %v5047_v58  ;;  %v2960_v39 = vcombine.high %v2958_v40, %v2958_v40  ;;  %v2967_v61 = vrot.slane %v2951_v16, %v6750_v59 }
 0x554   :  { %v5871_v15 = vpop.eup %5870  ;;  %v2784_v44 = vadd.f32 1.0, %v5869_v41  ;;  %5892 = vrcp.f32 %v2782_v7 }
 0x555   :  { %v5873_v9 = vpop.eup %5872  ;;  %v2785_v53 = vadd.f32 1.0, %v5871_v15  ;;  %5894 = vrcp.f32 %v2783_v27  ;;  %v2981_v27 = vrot.slane %v2959_v34, %v6750_v59  ;;  %v3010_v15 = vrot.slane %v8026_v6, 2 }
 0x556   :  { %v5875_v42 = vpop.eup %5874  ;;  %v2786_v33 = vadd.f32 1.0, %v5873_v9  ;;  %5896 = vrcp.f32 %v2784_v44  ;;  %v3011_v9 = vrot.slane %v8033_v12, 2  ;;  %v2988_v13 = vrot.slane %v2960_v39, %v6750_v59 }
 0x557   :  { %v5877_v24 = vpop.eup %5876  ;;  %v2787_v45 = vadd.f32 1.0, %v5875_v42  ;;  %5898 = vrcp.f32 %v2785_v53  ;;  %v3012_v53 = vrot.slane %v8038_v20, 2 }
 0x558   :  { %v2788_v18 = vadd.f32 1.0, %v5877_v24  ;;  %5900 = vrcp.f32 %v2786_v33  ;;  %v2974_v33 = vrot.slane %v2958_v40, %v6750_v59  ;;  %v3013_v24 = vrot.slane %v8044_v2, 2 }
 0x559   :  { %5902 = vrcp.f32 %v2787_v45  ;;  %v5879_v60 = vpop.eup %5878  ;;  %v3015_v40 = vrot.slane %v8056_v10, 2 }
 0x55a   :  { %5904 = vrcp.f32 %v2788_v18  ;;  %v5881_v58 = vpop.eup %5880  ;;  %v2919_v54 = vadd.f32 1.0, %v5879_v60  ;;  %v2990_v39 = vcombine.high %v2974_v33, %v2974_v33 }
 0x55b   :  { %5906 = vpow2.f32 %v5048_v48  ;;  %v5883_v51 = vpop.eup %5882  ;;  %v2920_v11 = vadd.f32 1.0, %v5881_v58  ;;  %v2989_v48 = vcombine.high %v2967_v61, %v2967_v61  ;;  %v3014_v58 = vrot.slane %v8049_v46, 2 }
 0x55c   :  { %5908 = vpow2.f32 %v5049_v32  ;;  %v5885_v62 = vpop.eup %5884  ;;  %v2921_v7 = vadd.f32 1.0, %v5883_v51  ;;  %v2991_v32 = vcombine.high %v2981_v27, %v2981_v27  ;;  %v3016_v51 = vrot.slane %v8065_v23, 2 }
 0x55d   :  { %v5887_v41 = vpop.eup %5886  ;;  %v2922_v44 = vadd.f32 1.0, %v5885_v62  ;;  %5910 = vrcp.f32 %v2919_v54 }
 0x55e   :  { %v2923_v5 = vadd.f32 1.0, %v5887_v41  ;;  %5912 = vrcp.f32 %v2920_v11 }
 0x55f   :  { %v5889_v8 = vpop.eup %5888  ;;  %5914 = vrcp.f32 %v2921_v7 }
 0x560   :  { %v5891_v42 = vpop.eup %5890  ;;  %v3001_v16 = vmul.f32 %v5889_v8, %v2967_v61  ;;  %5916 = vrcp.f32 %v2922_v44 }
 0x561   :  { %v5893_v45 = vpop.eup %5892  ;;  %v2924_v6 = vadd.f32 1.0, %v5891_v42  ;;  %5918 = vrcp.f32 %v2923_v5 }
 0x562   :  { %v5895_v18 = vpop.eup %5894  ;;  %v3002_v12 = vmul.f32 %v5893_v45, %v2981_v27  ;;  %v3025_v60 = vadd.f32 %v3009_v1, %v3001_v16  ;;  %v2992_v27 = vcombine.high %v2988_v13, %v2988_v13 }
 0x563   :  { %v5897_v20 = vpop.eup %5896  ;;  %v3003_v34 = vmul.f32 %v5895_v18, %v2989_v48  ;;  %5920 = vrcp.f32 %v2924_v6 }
 0x564   :  { %v5899_v2 = vpop.eup %5898  ;;  %v3004_v54 = vmul.f32 %v5897_v20, %v2991_v32  ;;  %v3026_v11 = vadd.f32 %v3010_v15, %v3002_v12  ;;  %5922 = vtanh.f32 %v3025_v60 }
 0x565   :  { %v5901_v62 = vpop.eup %5900  ;;  %v3005_v61 = vmul.f32 %v5899_v2, %v2974_v33  ;;  %v3027_v7 = vadd.f32 %v3011_v9, %v3003_v34 }
 0x566   :  { %v5903_v41 = vpop.eup %5902  ;;  %v3006_v1 = vmul.f32 %v5901_v62, %v2988_v13  ;;  %v3028_v44 = vadd.f32 %v3012_v53, %v3004_v54  ;;  %5924 = vtanh.f32 %v3026_v11 }
 0x567   :  { %v5905_v46 = vpop.eup %5904  ;;  %v3007_v8 = vmul.f32 %v5903_v41, %v2990_v39  ;;  %v3029_v10 = vadd.f32 %v3013_v24, %v3005_v61  ;;  %5926 = vtanh.f32 %v3027_v7 }
 0x568   :  { %v5907_v5 = vpop.eup %5906  ;;  %v3008_v42 = vmul.f32 %v5905_v46, %v2992_v27  ;;  %v3030_v16 = vadd.f32 %v3014_v58, %v3006_v1  ;;  %5928 = vtanh.f32 %v3028_v44 }
 0x569   :  { %v5909_v23 = vpop.eup %5908  ;;  %v3031_v15 = vadd.f32 %v3015_v40, %v3007_v8  ;;  %5930 = vtanh.f32 %v3029_v10  ;;  %v2925_v45 = vadd.f32 1.0, %v5907_v5 }
 0x56a   :  { %v3032_v33 = vadd.f32 %v3016_v51, %v3008_v42  ;;  %5932 = vtanh.f32 %v3030_v16  ;;  %v2926_v9 = vadd.f32 1.0, %v5909_v23  ;;  %v5911_v48 = vpop.eup %5910 }
 0x56b   :  { %5934 = vtanh.f32 %v3031_v15  ;;  %v5913_v53 = vpop.eup %5912  ;;  %v3041_v2 = vsub.f32 1.0, %v5911_v48  ;;  %v3057_v42 = vmul.f32 %v5911_v48, %v7685_v47 }
 0x56c   :  { %5936 = vtanh.f32 %v3032_v33  ;;  %v5915_v13 = vpop.eup %5914  ;;  %v3042_v60 = vsub.f32 1.0, %v5913_v53  ;;  %v3058_v27 = vmul.f32 %v5913_v53, %v7680_v19 }
 0x56d   :  { %5938 = vrcp.f32 %v2925_v45  ;;  %v5917_v24 = vpop.eup %5916  ;;  %v3043_v34 = vsub.f32 1.0, %v5915_v13  ;;  %v3059_v8 = vmul.f32 %v5915_v13, %v7683_v3 }
 0x56e   :  { %5940 = vrcp.f32 %v2926_v9  ;;  %v5919_v6 = vpop.eup %5918  ;;  %v3044_v58 = vsub.f32 1.0, %v5917_v24  ;;  %v3060_v61 = vmul.f32 %v5917_v24, %v7677_v56 }
 0x56f   :  { %v3045_v44 = vsub.f32 1.0, %v5919_v6  ;;  %v3061_v3 = vmul.f32 %v5919_v6, %v7696_v31 }
 0x570   :  { %v5921_v18 = vpop.eup %5920 }
 0x571   :  { %v5923_v32 = vpop.eup %5922  ;;  %v3046_v11 = vsub.f32 1.0, %v5921_v18  ;;  %v3062_v56 = vmul.f32 %v5921_v18, %v7688_v49 }
 0x572   :  { %v3049_v41 = vmul.f32 %v5923_v32, %v3041_v2 }
 0x573   :  { %v5925_v12 = vpop.eup %5924 }
 0x574   :  { %v5927_v20 = vpop.eup %5926  ;;  %v3050_v54 = vmul.f32 %v5925_v12, %v3042_v60  ;;  %v8113_v9 = vadd.f32 %v3057_v42, %v3049_v41  ;;  %v9005_v41 = vld [vmem:[#allocation19_spill] sm:$0xff] }
 0x575   :  { %v5929_v40 = vpop.eup %5928  ;;  %v3051_v62 = vmul.f32 %v5927_v20, %v3043_v34  ;;  %v9012_v42 = vld [vmem:[#allocation31_spill] sm:$0xff] }
 0x576   :  { %v5931_v51 = vpop.eup %5930  ;;  %v3052_v39 = vmul.f32 %v5929_v40, %v3044_v58  ;;  %v8108_v16 = vadd.f32 %v3058_v27, %v3050_v54  ;;  %v9006_v27 = vld [vmem:[#allocation29_spill] sm:$0xff] }
 0x577   :  { %v5933_v7 = vpop.eup %5932  ;;  %v3053_v15 = vmul.f32 %v5931_v51, %v3045_v44  ;;  %v8111_v45 = vadd.f32 %v3059_v8, %v3051_v62  ;;  %v9001_v62 = vld [vmem:[#allocation14_spill] sm:$0xff]  ;;  %v9010_v8 = vld [vmem:[#allocation23_spill] sm:$0xff] }
 0x578   :  { %v5935_v1 = vpop.eup %5934  ;;  %v3054_v46 = vmul.f32 %v5933_v7, %v3046_v11  ;;  %v8105_v10 = vadd.f32 %v3060_v61, %v3052_v39  ;;  %v3097_v24 = vcombine.low %v8113_v9, %v8108_v16  ;;  %v9002_v39 = vld [vmem:[#allocation16_spill] sm:$0xff]  ;;  %v9004_v7 = vld [vmem:[#allocation17_spill] sm:$0xff]  ;;  %v9008_v44 = vld [vmem:[#allocation22_spill] sm:$0xff] }
 0x579   :  { %v5937_v5 = vpop.eup %5936  ;;  %v8124_v12 = vadd.f32 %v3061_v3, %v3053_v15  ;;  %v9003_v61 = vld [vmem:[#allocation28_spill] sm:$0xff]  ;;  %v6278_v15 = vld [vmem:[%s8725_s2 + $0x170] sm:$0xff] }
 0x57a   :  { %v5939_v23 = vpop.eup %5938  ;;  %v8116_v13 = vadd.f32 %v3062_v56, %v3054_v46  ;;  %v3098_v47 = vcombine.low %v8111_v45, %v8105_v10  ;;  %v3107_v58 = vrot.slane %v3097_v24, %v6750_v59  ;;  %v9009_v46 = vld [vmem:[#allocation30_spill] sm:$0xff] }
 0x57b   :  { %v5941_v33 = vpop.eup %5940  ;;  %v3047_v19 = vsub.f32 1.0, %v5939_v23  ;;  %v3063_v49 = vmul.f32 %v5939_v23, %v7698_v28  ;;  %v9013_v23 = vld [vmem:[#allocation34_spill] sm:$0xff] }
 0x57c   :  { %v3048_v53 = vsub.f32 1.0, %v5941_v33  ;;  %v3064_v18 = vmul.f32 %v5941_v33, %v7700_v57  ;;  %v3099_v31 = vcombine.low %v8124_v12, %v8116_v13  ;;  %v3114_v6 = vrot.slane %v3098_v47, %v6750_v59 }
 0x57d   :  { %v3055_v48 = vmul.f32 %v5935_v1, %v3047_v19  ;;  %v9007_v1 = vld [vmem:[#allocation20_spill] sm:$0xff] }
 0x57e   :  { %v3056_v32 = vmul.f32 %v5937_v5, %v3048_v53  ;;  %v3121_v28 = vrot.slane %v3099_v31, %v6750_v59  ;;  %v3129_v40 = vcombine.low %v3107_v58, %v3114_v6  ;;  %v9011_v5 = vld [vmem:[#allocation25_spill] sm:$0xff]  ;;  %v9014_v19 = vld [vmem:[#allocation32_spill] sm:$0xff] }
 0x57f   :  { %v8126_v60 = vadd.f32 %v3063_v49, %v3055_v48  ;;  %v8221_v49 = vld [vmem:[%s8728_s0 + $0x1d] ss:$8 sm:$0x7] }
 0x580   :  { %v8128_v20 = vadd.f32 %v3064_v18, %v3056_v32  ;;  %v3137_v54 = vrot.slane %v3129_v40, %v6750_v59  ;;  %v8216_v32 = vld [vmem:[%s8728_s0 + $0x5] ss:$8 sm:$0x7] }
 0x581   :  { %v8233_v58 = vld [vmem:[%s8728_s0 + $0x4d] ss:$8 sm:$0x7] }
 0x582   :  { %v3100_v34 = vcombine.low %v8126_v60, %v8128_v20  ;;  %v8239_v40 = vld [vmem:[%s8728_s0 + $0x65] ss:$8 sm:$0x7] }
 0x584   :  { %v3128_v57 = vrot.slane %v3100_v34, %v6750_v59  ;;  %v8228_v34 = vld [vmem:[%s8728_s0 + $0x35] ss:$8 sm:$0x7] }
 0x586   :  { %v3130_v2 = vcombine.low %v3121_v28, %v3128_v57  ;;  %v9015_v28 = vld [vmem:[#allocation33_spill] sm:$0xff] }
 0x588   :  { %v3144_v51 = vrot.slane %v3130_v2, %v6750_v59  ;;  %v8244_v2 = vld [vmem:[%s8728_s0 + $0x7d] ss:$8 sm:$0x7] }
 0x58a   :  { %v3145_v11 = vcombine.low %v3137_v54, %v3144_v51 }
 0x58c   :  { %3212 = vmatmul.mubr.f32.vlgmr.msra.gmra.mxu0 %v3145_v11  ;;  %5466 = vmatmul.mubr.f32.vlgmr.msra.gmra.mxu1 %v3145_v11 }
 0x58d   :  { %3745 = vmatpush1.msra.mxu0 %v7715_v26  ;;  %5469 = vmatpush3.msra.mxu1 %v7721_v29  ;;  %v8984_v26 = vld [vmem:[#allocation3_spill] sm:$0xff] }
 0x58e   :  { %3746 = vmatprep.subr.mxu0 %v7727_v63  ;;  %5470 = vmatprep.subr.mxu1 %v8860_v36  ;;  %v8985_v29 = vld [vmem:[#allocation15_spill] sm:$0xff]  ;;  %v8986_v63 = vld [vmem:[#allocation4_spill] sm:$0xff] }
 0x58f   :  { %3747 = vmatpush1.msra.mxu0 %v7734_v4  ;;  %5471 = vmatpush3.msra.mxu1 %v7740_v50  ;;  %v8987_v4 = vld [vmem:[#allocation5_spill] sm:$0xff]  ;;  %v8988_v50 = vld [vmem:[#allocation18_spill] sm:$0xff] }
 0x590   :  { %3748 = vmatprep.subr.mxu0 %v7746_v22  ;;  %5472 = vmatprep.subr.mxu1 %v8860_v36  ;;  %v8989_v22 = vld [vmem:[#allocation6_spill] sm:$0xff] }
 0x591   :  { %3749 = vmatpush1.msra.mxu0 %v7753_v35  ;;  %5473 = vmatpush3.msra.mxu1 %v7759_v43  ;;  %v8990_v35 = vld [vmem:[#allocation7_spill] sm:$0xff]  ;;  %v8991_v43 = vld [vmem:[#allocation21_spill] sm:$0xff] }
 0x592   :  { %3750 = vmatprep.subr.mxu0 %v7765_v30  ;;  %5474 = vmatprep.subr.mxu1 %v8860_v36  ;;  %v8992_v30 = vld [vmem:[#allocation8_spill] sm:$0xff] }
 0x593   :  { %3751 = vmatpush1.msra.mxu0 %v7772_v17  ;;  %5475 = vmatpush3.msra.mxu1 %v7778_v55  ;;  %v8993_v17 = vld [vmem:[#allocation9_spill] sm:$0xff]  ;;  %v8994_v55 = vld [vmem:[#allocation24_spill] sm:$0xff] }
 0x594   :  { %3752 = vmatprep.subr.mxu0 %v7784_v0  ;;  %5476 = vmatprep.subr.mxu1 %v8860_v36  ;;  %v8995_v0 = vld [vmem:[#allocation10_spill] sm:$0xff] }
 0x595   :  { %3753 = vmatpush1.msra.mxu0 %v7791_v37  ;;  %5477 = vmatpush3.msra.mxu1 %v7797_v21  ;;  %v8996_v37 = vld [vmem:[#allocation11_spill] sm:$0xff]  ;;  %v8997_v21 = vld [vmem:[#allocation26_spill] sm:$0xff] }
 0x596   :  { %3754 = vmatprep.subr.mxu0 %v7803_v38  ;;  %5478 = vmatprep.subr.mxu1 %v8860_v36  ;;  %v8998_v38 = vld [vmem:[#allocation12_spill] sm:$0xff] }
 0x597   :  { %3755 = vmatpush1.msra.mxu0 %v7810_v25  ;;  %5479 = vmatpush3.msra.mxu1 %v7816_v52  ;;  %v8999_v25 = vld [vmem:[#allocation13_spill] sm:$0xff]  ;;  %v9000_v52 = vld [vmem:[#allocation27_spill] sm:$0xff] }
 0x598   :  { %3756 = vmatprep.subr.mxu0 %v8984_v26  ;;  %5480 = vmatprep.subr.mxu1 %v8860_v36 }
 0x599   :  { %3757 = vmatpush1.msra.mxu0 %v8985_v29  ;;  %5481 = vmatpush3.msra.mxu1 %v8986_v63  ;;  %v8251_v29 = vld [vmem:[%s8728_s0 + $0x95] ss:$8 sm:$0x7] }
 0x59a   :  { %3758 = vmatprep.subr.mxu0 %v8987_v4  ;;  %5482 = vmatprep.subr.mxu1 %v8860_v36  ;;  %v3410_v4 = vrot.slane %v8216_v32, 1 }
 0x59b   :  { %3759 = vmatpush1.msra.mxu0 %v8988_v50  ;;  %5483 = vmatpush3.msra.mxu1 %v8989_v22 }
 0x59c   :  { %3760 = vmatprep.subr.mxu0 %v8990_v35  ;;  %5484 = vmatprep.subr.mxu1 %v8860_v36 }
 0x59d   :  { %3761 = vmatpush1.msra.mxu0 %v8991_v43  ;;  %5485 = vmatpush3.msra.mxu1 %v8992_v30  ;;  %v8260_v30 = vld [vmem:[%s8728_s0 + $0xad] ss:$8 sm:$0x7] }
 0x59e   :  { %3762 = vmatprep.subr.mxu0 %v8993_v17  ;;  %5486 = vmatprep.subr.mxu1 %v8860_v36 }
 0x59f   :  { %3763 = vmatpush1.msra.mxu0 %v8994_v55  ;;  %5487 = vmatpush3.msra.mxu1 %v8995_v0 }
 0x5a0   :  { %3764 = vmatprep.subr.mxu0 %v8996_v37  ;;  %5488 = vmatprep.subr.mxu1 %v8860_v36 }
 0x5a1   :  { %3765 = vmatpush1.msra.mxu0 %v8997_v21  ;;  %5489 = vmatpush3.msra.mxu1 %v8998_v38 }
 0x5a2   :  { %3766 = vmatprep.subr.mxu0 %v8999_v25  ;;  %5490 = vmatprep.subr.mxu1 %v8860_v36 }
 0x5a3   :  { %3767 = vmatpush1.msra.mxu0 %v9000_v52  ;;  %5491 = vmatpush3.msra.mxu1 %v9001_v62 }
 0x5a4   :  { %3768 = vmatprep.subr.mxu0 %v9002_v39  ;;  %5492 = vmatprep.subr.mxu1 %v8860_v36 }
 0x5a5   :  { %3769 = vmatpush1.msra.mxu0 %v9003_v61  ;;  %5493 = vmatpush3.msra.mxu1 %v9004_v7 }
 0x5a6   :  { %3770 = vmatprep.subr.mxu0 %v9005_v41  ;;  %5494 = vmatprep.subr.mxu1 %v8860_v36 }
 0x5a7   :  { %3771 = vmatpush1.msra.mxu0 %v9006_v27  ;;  %5495 = vmatpush3.msra.mxu1 %v9007_v1  ;;  %v3411_v1 = vrot.slane %v8221_v49, 1 }
 0x5a8   :  { %3772 = vmatprep.subr.mxu0 %v9008_v44  ;;  %5496 = vmatprep.subr.mxu1 %v8860_v36 }
 0x5a9   :  { %3773 = vmatpush1.msra.mxu0 %v9009_v46  ;;  %5497 = vmatpush3.msra.mxu1 %v9010_v8  ;;  %v3412_v46 = vrot.slane %v8228_v34, 1  ;;  %v3414_v8 = vrot.slane %v8239_v40, 1 }
 0x5aa   :  { %3774 = vmatprep.subr.mxu0 %v9011_v5  ;;  %5498 = vmatprep.subr.mxu1 %v8860_v36 }
 0x5ab   :  { %3775 = vmatpush1.msra.mxu0 %v9012_v42  ;;  %3808 = vmatprep.mubr.f32.mxu0 %v8860_v36  ;;  %v3413_v42 = vrot.slane %v8233_v58, 1 }
 0x5ac   :  { %5499 = vmatpush3.msra.mxu1 %v9013_v23  ;;  %5500 = vmatprep.mubr.msk.f32.mxu1 %vm6327_vm0, %v8860_v36 }
 0x5ad   :  { %4341 = vmatprep.subr.mxu0 %v6278_v15  ;;  %5503 = vmatprep.subr.mxu1 %v8860_v36 }
 0x64c   :  { %v3213_v56 = vpop.f32.mrf.mxu0  ;;  %v8209_v33 = vpop.f32.mrf.mxu1 }
 0x64d   :  { %v3214_v53 = vadd.f32 %v3213_v56, %v9014_v19 }
 0x64e   :  { %v5467_v3 = vpop.f32.mrf.mxu1  ;;  %v3215_v24 = vpop.f32.mrf.mxu0 }
 0x64f   :  { %v3289_v47 = vcombine.high %v3214_v53, %v3214_v53  ;;  %v3296_v48 = vrot.slane %v3214_v53, %v6750_v59  ;;  %v3216_v57 = vadd.f32 %v3215_v24, %v9015_v28  ;;  %v3415_v3 = vrot.slane %v8244_v2, 1 }
 0x651   :  { %v3303_v18 = vrot.slane %v3289_v47, %v6750_v59  ;;  %v3304_v31 = vcombine.high %v3296_v48, %v3296_v48  ;;  %v3312_v6 = vrot.slane %v3296_v48, %v6750_v59  ;;  %v3427_v37 = vcombine.high %v3216_v57, %v3216_v57 }
 0x652   :  { %v3434_v61 = vrot.slane %v3216_v57, %v6750_v59 }
 0x653   :  { %v3305_v54 = vcombine.high %v3303_v18, %v3303_v18  ;;  %v3319_v51 = vrot.slane %v3303_v18, %v6750_v59  ;;  %v3326_v11 = vrot.slane %v3304_v31, %v6750_v59  ;;  %v3334_v26 = vcombine.high %v3312_v6, %v3312_v6 }
 0x654   :  { %v3346_v63 = vadd.f32 %v8216_v32, %v3312_v6  ;;  %v3441_v23 = vrot.slane %v3427_v37, %v6750_v59  ;;  %v3442_v56 = vcombine.high %v3434_v61, %v3434_v61  ;;  %v3450_v53 = vrot.slane %v3434_v61, %v6750_v59 }
 0x655   :  { %v3333_v50 = vrot.slane %v3305_v54, %v6750_v59  ;;  %v3335_v22 = vcombine.high %v3319_v51, %v3319_v51  ;;  %v3336_v35 = vcombine.high %v3326_v11, %v3326_v11  ;;  %v3347_v43 = vadd.f32 %v8221_v49, %v3326_v11 }
 0x656   :  { %v3348_v17 = vadd.f32 %v8228_v34, %v3334_v26  ;;  %v3350_v55 = vadd.f32 %v8239_v40, %v3319_v51  ;;  %v5058_v0 = vmul.f32 -1.442695, %v3346_v63  ;;  %v3443_v47 = vcombine.high %v3441_v23, %v3441_v23 }
 0x657   :  { %v3337_v21 = vcombine.high %v3333_v50, %v3333_v50  ;;  %v3349_v38 = vadd.f32 %v8233_v58, %v3336_v35  ;;  %v3351_v25 = vadd.f32 %v8244_v2, %v3333_v50  ;;  %v3352_v52 = vadd.f32 %v8251_v29, %v3335_v22 }
 0x658   :  { %5942 = vpow2.f32 %v5058_v0  ;;  %v5059_v62 = vmul.f32 -1.442695, %v3347_v43  ;;  %v5060_v39 = vmul.f32 -1.442695, %v3348_v17  ;;  %v5062_v27 = vmul.f32 -1.442695, %v3350_v55 }
 0x659   :  { %v3353_v7 = vadd.f32 %v8260_v30, %v3337_v21  ;;  %v5061_v41 = vmul.f32 -1.442695, %v3349_v38  ;;  %v5063_v44 = vmul.f32 -1.442695, %v3351_v25  ;;  %v5064_v5 = vmul.f32 -1.442695, %v3352_v52 }
 0x65a   :  { %5944 = vpow2.f32 %v5059_v62  ;;  %v3457_v48 = vrot.slane %v3441_v23, %v6750_v59  ;;  %v3464_v24 = vrot.slane %v3442_v56, %v6750_v59  ;;  %v3472_v18 = vcombine.high %v3450_v53, %v3450_v53 }
 0x65b   :  { %5946 = vpow2.f32 %v5060_v39  ;;  %v5065_v15 = vmul.f32 -1.442695, %v3353_v7  ;;  %v3484_v31 = vadd.f32 %v3450_v53, %v3410_v4  ;;  %v3471_v6 = vrot.slane %v3443_v47, %v6750_v59 }
 0x65c   :  { %5948 = vpow2.f32 %v5061_v41  ;;  %v3488_v57 = vadd.f32 %v3457_v48, %v3414_v8  ;;  %v3474_v54 = vcombine.high %v3464_v24, %v3464_v24  ;;  %v3485_v51 = vadd.f32 %v3464_v24, %v3411_v1 }
 0x65d   :  { %5950 = vpow2.f32 %v5062_v27  ;;  %v3486_v11 = vadd.f32 %v3472_v18, %v3412_v46  ;;  %v3489_v26 = vadd.f32 %v3471_v6, %v3415_v3  ;;  %v5066_v63 = vmul.f32 -1.442695, %v3484_v31 }
 0x65e   :  { %5952 = vpow2.f32 %v5063_v44  ;;  %v3487_v50 = vadd.f32 %v3474_v54, %v3413_v42  ;;  %v5067_v22 = vmul.f32 -1.442695, %v3485_v51  ;;  %v5070_v43 = vmul.f32 -1.442695, %v3488_v57 }
 0x65f   :  { %5954 = vpow2.f32 %v5064_v5  ;;  %v5068_v35 = vmul.f32 -1.442695, %v3486_v11  ;;  %v3416_v4 = vrot.slane %v8251_v29, 1  ;;  %v3473_v0 = vcombine.high %v3457_v48, %v3457_v48 }
 0x660   :  { %5956 = vpow2.f32 %v5065_v15  ;;  %v5069_v17 = vmul.f32 -1.442695, %v3487_v50  ;;  %v5071_v37 = vmul.f32 -1.442695, %v3489_v26  ;;  %v3417_v38 = vrot.slane %v8260_v30, 1 }
 0x661   :  { %5958 = vpow2.f32 %v5066_v63  ;;  %v3475_v25 = vcombine.high %v3471_v6, %v3471_v6  ;;  %v3285_v62 = vadd.f32 %v8209_v33, %v6827_v14  ;;  %v3490_v27 = vadd.f32 %v3473_v0, %v3416_v4 }
 0x662   :  { %5960 = vpow2.f32 %v5067_v22  ;;  %v3608_v0 = vrot.slane %v8228_v34, 2 }
 0x663   :  { %5962 = vpow2.f32 %v5068_v35  ;;  %v3491_v46 = vadd.f32 %v3475_v25, %v3417_v38  ;;  %v3541_v42 = vcombine.high %v3285_v62, %v3285_v62  ;;  %v3548_v33 = vrot.slane %v3285_v62, %v6750_v59 }
 0x664   :  { %5964 = vpow2.f32 %v5069_v17  ;;  %v5072_v3 = vmul.f32 -1.442695, %v3490_v27  ;;  %v3607_v17 = vrot.slane %v8221_v49, 2  ;;  %v3610_v62 = vrot.slane %v8239_v40, 2 }
 0x665   :  { %v5943_v55 = vpop.eup %5942  ;;  %5966 = vpow2.f32 %v5070_v43  ;;  %v5073_v48 = vmul.f32 -1.442695, %v3491_v46  ;;  %v3555_v24 = vrot.slane %v3541_v42, %v6750_v59  ;;  %v3556_v31 = vcombine.high %v3548_v33, %v3548_v33 }
 0x666   :  { %v3378_v21 = vadd.f32 1.0, %v5943_v55  ;;  %v3564_v63 = vrot.slane %v3548_v33, %v6750_v59  ;;  %v3606_v43 = vrot.slane %v8216_v32, 2  ;;  %v3612_v46 = vrot.slane %v8251_v29, 2 }
 0x667   :  { %v5945_v52 = vpop.eup %5944  ;;  %v3557_v26 = vcombine.high %v3555_v24, %v3555_v24  ;;  %v3578_v35 = vrot.slane %v3556_v31, %v6750_v59  ;;  %v3571_v25 = vrot.slane %v3555_v24, %v6750_v59 }
 0x668   :  { %v5947_v39 = vpop.eup %5946  ;;  %v3379_v61 = vadd.f32 1.0, %v5945_v52  ;;  %5968 = vrcp.f32 %v3378_v21 }
 0x669   :  { %v5949_v7 = vpop.eup %5948  ;;  %v3380_v41 = vadd.f32 1.0, %v5947_v39  ;;  %5970 = vpow2.f32 %v5071_v37  ;;  %v3609_v37 = vrot.slane %v8233_v58, 2  ;;  %v3585_v32 = vrot.slane %v3557_v26, %v6750_v59 }
 0x66a   :  { %v5951_v1 = vpop.eup %5950  ;;  %v3381_v44 = vadd.f32 1.0, %v5949_v7  ;;  %5972 = vrcp.f32 %v3379_v61  ;;  %v3586_v61 = vcombine.high %v3564_v63, %v3564_v63 }
 0x66b   :  { %v5953_v8 = vpop.eup %5952  ;;  %v3382_v5 = vadd.f32 1.0, %v5951_v1  ;;  %5974 = vrcp.f32 %v3380_v41  ;;  %v3588_v41 = vcombine.high %v3578_v35, %v3578_v35 }
 0x66c   :  { %v5955_v23 = vpop.eup %5954  ;;  %v3383_v15 = vadd.f32 1.0, %v5953_v8  ;;  %5976 = vrcp.f32 %v3381_v44  ;;  %v3611_v44 = vrot.slane %v8244_v2, 2 }
 0x66d   :  { %v5957_v56 = vpop.eup %5956  ;;  %v3384_v53 = vadd.f32 1.0, %v5955_v23  ;;  %5978 = vrcp.f32 %v3382_v5  ;;  %v3613_v5 = vrot.slane %v8260_v30, 2 }
 0x66e   :  { %v3385_v47 = vadd.f32 1.0, %v5957_v56  ;;  %5980 = vrcp.f32 %v3383_v15  ;;  %v5959_v18 = vpop.eup %5958  ;;  %v3587_v15 = vcombine.high %v3571_v25, %v3571_v25 }
 0x66f   :  { %5982 = vrcp.f32 %v3384_v53  ;;  %v5961_v6 = vpop.eup %5960  ;;  %v3516_v57 = vadd.f32 1.0, %v5959_v18 }
 0x670   :  { %5984 = vrcp.f32 %v3385_v47  ;;  %v5963_v54 = vpop.eup %5962  ;;  %v3517_v51 = vadd.f32 1.0, %v5961_v6 }
 0x671   :  { %5986 = vpow2.f32 %v5072_v3  ;;  %v5965_v11 = vpop.eup %5964  ;;  %v3518_v50 = vadd.f32 1.0, %v5963_v54  ;;  %v3589_v3 = vcombine.high %v3585_v32, %v3585_v32 }
 0x672   :  { %5988 = vpow2.f32 %v5073_v48  ;;  %v5967_v22 = vpop.eup %5966  ;;  %v3519_v55 = vadd.f32 1.0, %v5965_v11 }
 0x673   :  { %v3520_v21 = vadd.f32 1.0, %v5967_v22  ;;  %5990 = vrcp.f32 %v3516_v57 }
 0x674   :  { %5992 = vrcp.f32 %v3517_v51 }
 0x675   :  { %v5969_v4 = vpop.eup %5968  ;;  %5994 = vrcp.f32 %v3518_v50 }
 0x676   :  { %v5971_v38 = vpop.eup %5970  ;;  %v3598_v52 = vmul.f32 %v5969_v4, %v3564_v63  ;;  %5996 = vrcp.f32 %v3519_v55 }
 0x677   :  { %v5973_v39 = vpop.eup %5972  ;;  %v3521_v49 = vadd.f32 1.0, %v5971_v38  ;;  %5998 = vrcp.f32 %v3520_v21 }
 0x678   :  { %v5975_v7 = vpop.eup %5974  ;;  %v3599_v34 = vmul.f32 %v5973_v39, %v3578_v35  ;;  %v3622_v27 = vadd.f32 %v3606_v43, %v3598_v52 }
 0x679   :  { %v5977_v58 = vpop.eup %5976  ;;  %v3600_v1 = vmul.f32 %v5975_v7, %v3586_v61  ;;  %6000 = vrcp.f32 %v3521_v49 }
 0x67a   :  { %v5979_v40 = vpop.eup %5978  ;;  %v3601_v8 = vmul.f32 %v5977_v58, %v3588_v41  ;;  %v3623_v42 = vadd.f32 %v3607_v17, %v3599_v34  ;;  %6002 = vtanh.f32 %v3622_v27 }
 0x67b   :  { %v5981_v23 = vpop.eup %5980  ;;  %v3602_v33 = vmul.f32 %v5979_v40, %v3571_v25  ;;  %v3624_v56 = vadd.f32 %v3608_v0, %v3600_v1 }
 0x67c   :  { %v5983_v53 = vpop.eup %5982  ;;  %v3603_v47 = vmul.f32 %v5981_v23, %v3585_v32  ;;  %v3625_v48 = vadd.f32 %v3609_v37, %v3601_v8  ;;  %6004 = vtanh.f32 %v3623_v42 }
 0x67d   :  { %v5985_v2 = vpop.eup %5984  ;;  %v3604_v24 = vmul.f32 %v5983_v53, %v3587_v15  ;;  %v3626_v29 = vadd.f32 %v3610_v62, %v3602_v33  ;;  %6006 = vtanh.f32 %v3624_v56 }
 0x67e   :  { %v5987_v18 = vpop.eup %5986  ;;  %v3605_v31 = vmul.f32 %v5985_v2, %v3589_v3  ;;  %v3627_v6 = vadd.f32 %v3611_v44, %v3603_v47  ;;  %6008 = vtanh.f32 %v3625_v48 }
 0x67f   :  { %v5989_v30 = vpop.eup %5988  ;;  %v3628_v57 = vadd.f32 %v3612_v46, %v3604_v24  ;;  %6010 = vtanh.f32 %v3626_v29  ;;  %v3522_v54 = vadd.f32 1.0, %v5987_v18 }
 0x680   :  { %v3629_v51 = vadd.f32 %v3613_v5, %v3605_v31  ;;  %6012 = vtanh.f32 %v3627_v6  ;;  %v3523_v11 = vadd.f32 1.0, %v5989_v30  ;;  %v5991_v26 = vpop.eup %5990 }
 0x681   :  { %6014 = vtanh.f32 %v3628_v57  ;;  %v5993_v63 = vpop.eup %5992  ;;  %v3638_v25 = vsub.f32 1.0, %v5991_v26  ;;  %v3654_v8 = vmul.f32 %v5991_v26, %v8113_v9 }
 0x682   :  { %6016 = vtanh.f32 %v3629_v51  ;;  %v5995_v50 = vpop.eup %5994  ;;  %v3639_v4 = vsub.f32 1.0, %v5993_v63  ;;  %v3655_v34 = vmul.f32 %v5993_v63, %v8108_v16 }
 0x683   :  { %6018 = vrcp.f32 %v3522_v54  ;;  %v5997_v22 = vpop.eup %5996  ;;  %v3640_v37 = vsub.f32 1.0, %v5995_v50  ;;  %v3656_v44 = vmul.f32 %v5995_v50, %v8111_v45  ;;  %v6279_v50 = vld [vmem:[%s8725_s2 + $0x168] sm:$0xff] }
 0x684   :  { %6020 = vrcp.f32 %v3523_v11  ;;  %v5999_v35 = vpop.eup %5998  ;;  %v3641_v21 = vsub.f32 1.0, %v5997_v22  ;;  %v3657_v49 = vmul.f32 %v5997_v22, %v8105_v10  ;;  %v6280_v22 = vld [vmem:[%s8725_s2 + $0x178] sm:$0xff] }
 0x685   :  { %v3642_v58 = vsub.f32 1.0, %v5999_v35  ;;  %v3658_v45 = vmul.f32 %v5999_v35, %v8124_v12  ;;  %v6281_v35 = vld [vmem:[%s8725_s2 + $0x158] sm:$0xff] }
 0x686   :  { %v6001_v43 = vpop.eup %6000 }
 0x687   :  { %v6003_v17 = vpop.eup %6002  ;;  %v3643_v39 = vsub.f32 1.0, %v6001_v43  ;;  %v3659_v10 = vmul.f32 %v6001_v43, %v8116_v13  ;;  %v6282_v43 = vld [vmem:[%s8725_s2 + $0x150] sm:$0xff] }
 0x688   :  { %v3646_v41 = vmul.f32 %v6003_v17, %v3638_v25  ;;  %v6283_v17 = vld [vmem:[%s8725_s2 + $0x160] sm:$0xff]  ;;  %v6290_v25 = vld [vmem:[%s8725_s2 + $0x110] sm:$0xff] }
 0x689   :  { %v6005_v55 = vpop.eup %6004 }
 0x68a   :  { %v6007_v0 = vpop.eup %6006  ;;  %v3647_v52 = vmul.f32 %v6005_v55, %v3639_v4  ;;  %v8308_v56 = vadd.f32 %v3654_v8, %v3646_v41  ;;  %v6284_v55 = vld [vmem:[%s8725_s2 + $0x140] sm:$0xff]  ;;  %v6285_v4 = vld [vmem:[%s8725_s2 + $0x138] sm:$0xff]  ;;  %v6298_v41 = vld [vmem:[%s8725_s2 + $0xe8] sm:$0xff] }
 0x68b   :  { %v6009_v38 = vpop.eup %6008  ;;  %v3648_v32 = vmul.f32 %v6007_v0, %v3640_v37  ;;  %v6286_v0 = vld [vmem:[%s8725_s2 + $0x148] sm:$0xff]  ;;  %v6305_v8 = vld [vmem:[%s8725_s2 + $0x98] sm:$0xff] }
 0x68c   :  { %v6011_v62 = vpop.eup %6010  ;;  %v3649_v61 = vmul.f32 %v6009_v38, %v3641_v21  ;;  %v8303_v5 = vadd.f32 %v3655_v34, %v3647_v52  ;;  %v6287_v37 = vld [vmem:[%s8725_s2 + $0x128] sm:$0xff]  ;;  %v6288_v21 = vld [vmem:[%s8725_s2 + $0x120] sm:$0xff]  ;;  %v6289_v38 = vld [vmem:[%s8725_s2 + $0x130] sm:$0xff] }
 0x68d   :  { %v6013_v7 = vpop.eup %6012  ;;  %v3650_v23 = vmul.f32 %v6011_v62, %v3642_v58  ;;  %v8306_v15 = vadd.f32 %v3656_v44, %v3648_v32  ;;  %v6291_v52 = vld [vmem:[%s8725_s2 + $0x108] sm:$0xff]  ;;  %v6292_v62 = vld [vmem:[%s8725_s2 + $0x118] sm:$0xff]  ;;  %v6294_v32 = vld [vmem:[%s8725_s2 + $0xf0] sm:$0xff] }
 0x68e   :  { %v6015_v27 = vpop.eup %6014  ;;  %v3651_v1 = vmul.f32 %v6013_v7, %v3643_v39  ;;  %v8300_v46 = vadd.f32 %v3657_v49, %v3649_v61  ;;  %v3694_v48 = vcombine.low %v8308_v56, %v8303_v5  ;;  %v6293_v39 = vld [vmem:[%s8725_s2 + $0xf8] sm:$0xff]  ;;  %v6295_v61 = vld [vmem:[%s8725_s2 + $0x100] sm:$0xff]  ;;  %v6299_v34 = vld [vmem:[%s8725_s2 + $0xc8] sm:$0xff] }
 0x68f   :  { %v6017_v40 = vpop.eup %6016  ;;  %v8319_v29 = vadd.f32 %v3658_v45, %v3650_v23  ;;  %v6296_v49 = vld [vmem:[%s8725_s2 + $0xe0] sm:$0xff]  ;;  %v6297_v7 = vld [vmem:[%s8725_s2 + $0xd8] sm:$0xff]  ;;  %v6301_v58 = vld [vmem:[%s8725_s2 + $0xd0] sm:$0xff] }
 0x690   :  { %v6019_v42 = vpop.eup %6018  ;;  %v8311_v3 = vadd.f32 %v3659_v10, %v3651_v1  ;;  %v3695_v9 = vcombine.low %v8306_v15, %v8300_v46  ;;  %v3704_v57 = vrot.slane %v3694_v48, %v6750_v59  ;;  %v6302_v1 = vld [vmem:[%s8725_s2 + $0xb0] sm:$0xff]  ;;  %v6303_v44 = vld [vmem:[%s8725_s2 + $0xa8] sm:$0xff]  ;;  %v6307_v23 = vld [vmem:[%s8725_s2 + $0xa0] sm:$0xff] }
 0x691   :  { %v6021_v33 = vpop.eup %6020  ;;  %v3644_v16 = vsub.f32 1.0, %v6019_v42  ;;  %v3660_v13 = vmul.f32 %v6019_v42, %v8126_v60  ;;  %v6306_v42 = vld [vmem:[%s8725_s2 + $0x90] sm:$0xff]  ;;  %v6308_v10 = vld [vmem:[%s8725_s2 + $0x80] sm:$0xff]  ;;  %v6315_v48 = vld [vmem:[%s8725_s2 + $0x48] sm:$0xff] }
 0x692   :  { %v3645_v53 = vsub.f32 1.0, %v6021_v33  ;;  %v3661_v24 = vmul.f32 %v6021_v33, %v8128_v20  ;;  %v3696_v12 = vcombine.low %v8319_v29, %v8311_v3  ;;  %v3711_v6 = vrot.slane %v3695_v9, %v6750_v59  ;;  %v6309_v33 = vld [vmem:[%s8725_s2 + $0x78] sm:$0xff]  ;;  %v6312_v45 = vld [vmem:[%s8725_s2 + $0x60] sm:$0xff]  ;;  %v6313_v9 = vld [vmem:[%s8725_s2 + $0x70] sm:$0xff] }
 0x693   :  { %v3652_v47 = vmul.f32 %v6015_v27, %v3644_v16  ;;  %v6300_v27 = vld [vmem:[%s8725_s2 + $0xc0] sm:$0xff]  ;;  %v6310_v16 = vld [vmem:[%s8725_s2 + $0x88] sm:$0xff] }
 0x694   :  { %v3653_v2 = vmul.f32 %v6017_v40, %v3645_v53  ;;  %v3718_v60 = vrot.slane %v3696_v12, %v6750_v59  ;;  %v3726_v54 = vcombine.low %v3704_v57, %v3711_v6  ;;  %v6304_v40 = vld [vmem:[%s8725_s2 + $0xb8] sm:$0xff]  ;;  %v6311_v53 = vld [vmem:[%s8725_s2 + $0x68] sm:$0xff]  ;;  %v6319_v12 = vld [vmem:[%s8725_s2 + $0x40] sm:$0xff] }
 0x695   :  { %v8321_v18 = vadd.f32 %v3660_v13, %v3652_v47  ;;  %v6314_v47 = vld [vmem:[%s8725_s2 + $0x50] sm:$0xff]  ;;  %v6317_v13 = vld [vmem:[%s8725_s2 + $0x38] sm:$0xff]  ;;  %v6320_v6 = vld [vmem:[%s8725_s2 + $0x20] sm:$0xff] }
 0x696   :  { %v8323_v31 = vadd.f32 %v3661_v24, %v3653_v2  ;;  %v3734_v11 = vrot.slane %v3726_v54, %v6750_v59  ;;  %v6316_v2 = vld [vmem:[%s8725_s2 + $0x58] sm:$0xff]  ;;  %v6318_v24 = vld [vmem:[%s8725_s2 + $0x30] sm:$0xff]  ;;  %v6322_v57 = vld [vmem:[%s8725_s2 + $0x28] sm:$0xff] }
 0x697   :  { %v6325_v54 = vld [vmem:[%s8725_s2 + $0x10] sm:$0xff] }
 0x698   :  { %v3697_v30 = vcombine.low %v8321_v18, %v8323_v31 }
 0x69a   :  { %v3725_v20 = vrot.slane %v3697_v30, %v6750_v59  ;;  %v6321_v30 = vld [vmem:[%s8725_s2 + $0x18] sm:$0xff] }
 0x69c   :  { %v3727_v51 = vcombine.low %v3718_v60, %v3725_v20  ;;  %v6323_v60 = vld [vmem:[%s8725_s2 + $0x8] sm:$0xff]  ;;  %v6324_v20 = vld [vmem:[%s8725_s2] sm:$0xff] }
 0x69e   :  { %v3741_v26 = vrot.slane %v3727_v51, %v6750_v59 }
 0x6a0   :  { %v3742_v63 = vcombine.low %v3734_v11, %v3741_v26 }
 0x6a2   :  { %3809 = vmatmul.mubr.f32.vlgmr.msra.gmra.mxu0 %v3742_v63  ;;  %5501 = vmatmul.mubr.f32.vlgmr.msra.gmra.mxu1 %v3742_v63 }
 0x6a3   :  { %4342 = vmatpush1.msra.mxu0 %v6279_v50  ;;  %5504 = vmatpush3.msra.mxu1 %v6280_v22 }
 0x6a4   :  { %4343 = vmatprep.subr.mxu0 %v6281_v35  ;;  %5505 = vmatprep.subr.mxu1 %v8860_v36 }
 0x6a5   :  { %4344 = vmatpush1.msra.mxu0 %v6282_v43  ;;  %5506 = vmatpush3.msra.mxu1 %v6283_v17  ;;  %v8501_v43 = vld [vmem:[%s8728_s0 + $0x6] ss:$8 sm:$0x7] }
 0x6a6   :  { %4345 = vmatprep.subr.mxu0 %v6284_v55  ;;  %5507 = vmatprep.subr.mxu1 %v8860_v36  ;;  %v8506_v17 = vld [vmem:[%s8728_s0 + $0x1e] ss:$8 sm:$0x7] }
 0x6a7   :  { %4346 = vmatpush1.msra.mxu0 %v6285_v4  ;;  %5508 = vmatpush3.msra.mxu1 %v6286_v0  ;;  %v8513_v0 = vld [vmem:[%s8728_s0 + $0x36] ss:$8 sm:$0x7] }
 0x6a8   :  { %4347 = vmatprep.subr.mxu0 %v6287_v37  ;;  %5509 = vmatprep.subr.mxu1 %v8860_v36  ;;  %v8518_v37 = vld [vmem:[%s8728_s0 + $0x4e] ss:$8 sm:$0x7] }
 0x6a9   :  { %4348 = vmatpush1.msra.mxu0 %v6288_v21  ;;  %5510 = vmatpush3.msra.mxu1 %v6289_v38  ;;  %v8524_v38 = vld [vmem:[%s8728_s0 + $0x66] ss:$8 sm:$0x7] }
 0x6aa   :  { %4349 = vmatprep.subr.mxu0 %v6290_v25  ;;  %5511 = vmatprep.subr.mxu1 %v8860_v36  ;;  %v8529_v25 = vld [vmem:[%s8728_s0 + $0x7e] ss:$8 sm:$0x7] }
 0x6ab   :  { %4350 = vmatpush1.msra.mxu0 %v6291_v52  ;;  %5512 = vmatpush3.msra.mxu1 %v6292_v62 }
 0x6ac   :  { %4351 = vmatprep.subr.mxu0 %v6293_v39  ;;  %5513 = vmatprep.subr.mxu1 %v8860_v36 }
 0x6ad   :  { %4352 = vmatpush1.msra.mxu0 %v6294_v32  ;;  %5514 = vmatpush3.msra.mxu1 %v6295_v61  ;;  %v8536_v61 = vld [vmem:[%s8728_s0 + $0x96] ss:$8 sm:$0x7] }
 0x6ae   :  { %4353 = vmatprep.subr.mxu0 %v6296_v49  ;;  %5515 = vmatprep.subr.mxu1 %v8860_v36 }
 0x6af   :  { %4354 = vmatpush1.msra.mxu0 %v6297_v7  ;;  %5516 = vmatpush3.msra.mxu1 %v6298_v41  ;;  %v4007_v7 = vrot.slane %v8501_v43, 1 }
 0x6b0   :  { %4355 = vmatprep.subr.mxu0 %v6299_v34  ;;  %5517 = vmatprep.subr.mxu1 %v8860_v36 }
 0x6b1   :  { %4356 = vmatpush1.msra.mxu0 %v6300_v27  ;;  %5518 = vmatpush3.msra.mxu1 %v6301_v58 }
 0x6b2   :  { %4357 = vmatprep.subr.mxu0 %v6302_v1  ;;  %5519 = vmatprep.subr.mxu1 %v8860_v36  ;;  %v8545_v1 = vld [vmem:[%s8728_s0 + $0xae] ss:$8 sm:$0x7] }
 0x6b3   :  { %4358 = vmatpush1.msra.mxu0 %v6303_v44  ;;  %5520 = vmatpush3.msra.mxu1 %v6304_v40 }
 0x6b4   :  { %4359 = vmatprep.subr.mxu0 %v6305_v8  ;;  %5521 = vmatprep.subr.mxu1 %v8860_v36 }
 0x6b5   :  { %4360 = vmatpush1.msra.mxu0 %v6306_v42  ;;  %5522 = vmatpush3.msra.mxu1 %v6307_v23 }
 0x6b6   :  { %4361 = vmatprep.subr.mxu0 %v6308_v10  ;;  %5523 = vmatprep.subr.mxu1 %v8860_v36 }
 0x6b7   :  { %4362 = vmatpush1.msra.mxu0 %v6309_v33  ;;  %5524 = vmatpush3.msra.mxu1 %v6310_v16 }
 0x6b8   :  { %4363 = vmatprep.subr.mxu0 %v6311_v53  ;;  %5525 = vmatprep.subr.mxu1 %v8860_v36 }
 0x6b9   :  { %4364 = vmatpush1.msra.mxu0 %v6312_v45  ;;  %5526 = vmatpush3.msra.mxu1 %v6313_v9 }
 0x6ba   :  { %4365 = vmatprep.subr.mxu0 %v6314_v47  ;;  %5527 = vmatprep.subr.mxu1 %v8860_v36 }
 0x6bb   :  { %4366 = vmatpush1.msra.mxu0 %v6315_v48  ;;  %5528 = vmatpush3.msra.mxu1 %v6316_v2 }
 0x6bc   :  { %4367 = vmatprep.subr.mxu0 %v6317_v13  ;;  %5529 = vmatprep.subr.mxu1 %v8860_v36  ;;  %v4008_v13 = vrot.slane %v8506_v17, 1 }
 0x6bd   :  { %4368 = vmatpush1.msra.mxu0 %v6318_v24  ;;  %5530 = vmatpush3.msra.mxu1 %v6319_v12  ;;  %v4009_v12 = vrot.slane %v8513_v0, 1 }
 0x6be   :  { %4369 = vmatprep.subr.mxu0 %v6320_v6  ;;  %5531 = vmatprep.subr.mxu1 %v8860_v36  ;;  %v4011_v6 = vrot.slane %v8524_v38, 1 }
 0x6bf   :  { %4370 = vmatpush1.msra.mxu0 %v6321_v30  ;;  %5532 = vmatpush3.msra.mxu1 %v6322_v57  ;;  %v4010_v57 = vrot.slane %v8518_v37, 1 }
 0x6c0   :  { %4371 = vmatprep.subr.mxu0 %v6323_v60  ;;  %5533 = vmatprep.subr.mxu1 %v8860_v36 }
 0x6c1   :  { %4372 = vmatpush1.msra.mxu0 %v6324_v20  ;;  %4405 = vmatprep.mubr.f32.mxu0 %v8860_v36 }
 0x6c2   :  { %5534 = vmatpush3.msra.mxu1 %v6325_v54  ;;  %5535 = vmatprep.mubr.msk.f32.mxu1 %vm6327_vm0, %v8860_v36 }
 0x762   :  { %v3810_v51 = vpop.f32.mrf.mxu0  ;;  %v8494_v11 = vpop.f32.mrf.mxu1 }
 0x763   :  { %v3811_v26 = vadd.f32 %v3810_v51, %v9014_v19 }
 0x764   :  { %v5502_v63 = vpop.f32.mrf.mxu1  ;;  %v3812_v35 = vpop.f32.mrf.mxu0 }
 0x765   :  { %v3886_v50 = vcombine.high %v3811_v26, %v3811_v26  ;;  %v3893_v22 = vrot.slane %v3811_v26, %v6750_v59  ;;  %v3813_v21 = vadd.f32 %v3812_v35, %v9015_v28  ;;  %v4012_v26 = vrot.slane %v8529_v25, 1 }
 0x767   :  { %v3900_v36 = vrot.slane %v3886_v50, %v6750_v59  ;;  %v3901_v55 = vcombine.high %v3893_v22, %v3893_v22  ;;  %v3909_v4 = vrot.slane %v3893_v22, %v6750_v59  ;;  %v4024_v42 = vcombine.high %v3813_v21, %v3813_v21 }
 0x768   :  { %v4031_v9 = vrot.slane %v3813_v21, %v6750_v59 }
 0x769   :  { %v3902_v52 = vcombine.high %v3900_v36, %v3900_v36  ;;  %v3916_v62 = vrot.slane %v3900_v36, %v6750_v59  ;;  %v3923_v39 = vrot.slane %v3901_v55, %v6750_v59  ;;  %v3931_v32 = vcombine.high %v3909_v4, %v3909_v4 }
 0x76a   :  { %v3943_v49 = vadd.f32 %v8501_v43, %v3909_v4  ;;  %v4038_v60 = vrot.slane %v4024_v42, %v6750_v59  ;;  %v4039_v54 = vcombine.high %v4031_v9, %v4031_v9  ;;  %v4047_v51 = vrot.slane %v4031_v9, %v6750_v59 }
 0x76b   :  { %v3930_v41 = vrot.slane %v3902_v52, %v6750_v59  ;;  %v3932_v34 = vcombine.high %v3916_v62, %v3916_v62  ;;  %v3933_v27 = vcombine.high %v3923_v39, %v3923_v39  ;;  %v3944_v58 = vadd.f32 %v8506_v17, %v3923_v39 }
 0x76c   :  { %v3945_v44 = vadd.f32 %v8513_v0, %v3931_v32  ;;  %v3947_v40 = vadd.f32 %v8524_v38, %v3916_v62  ;;  %v5082_v8 = vmul.f32 -1.442695, %v3943_v49  ;;  %v4040_v63 = vcombine.high %v4038_v60, %v4038_v60 }
 0x76d   :  { %v3934_v23 = vcombine.high %v3930_v41, %v3930_v41  ;;  %v3946_v10 = vadd.f32 %v8518_v37, %v3933_v27  ;;  %v3948_v33 = vadd.f32 %v8529_v25, %v3930_v41  ;;  %v3949_v16 = vadd.f32 %v8536_v61, %v3932_v34 }
 0x76e   :  { %6022 = vpow2.f32 %v5082_v8  ;;  %v5083_v53 = vmul.f32 -1.442695, %v3944_v58  ;;  %v5084_v45 = vmul.f32 -1.442695, %v3945_v44  ;;  %v5086_v2 = vmul.f32 -1.442695, %v3947_v40 }
 0x76f   :  { %v3950_v47 = vadd.f32 %v8545_v1, %v3934_v23  ;;  %v5085_v48 = vmul.f32 -1.442695, %v3946_v10  ;;  %v5087_v24 = vmul.f32 -1.442695, %v3948_v33  ;;  %v5088_v30 = vmul.f32 -1.442695, %v3949_v16 }
 0x770   :  { %6024 = vpow2.f32 %v5083_v53  ;;  %v4054_v50 = vrot.slane %v4038_v60, %v6750_v59  ;;  %v4061_v22 = vrot.slane %v4039_v54, %v6750_v59  ;;  %v4069_v35 = vcombine.high %v4047_v51, %v4047_v51 }
 0x771   :  { %6026 = vpow2.f32 %v5084_v45  ;;  %v5089_v20 = vmul.f32 -1.442695, %v3950_v47  ;;  %v4081_v36 = vadd.f32 %v4047_v51, %v4007_v7  ;;  %v4068_v55 = vrot.slane %v4040_v63, %v6750_v59 }
 0x772   :  { %6028 = vpow2.f32 %v5085_v48  ;;  %v4085_v4 = vadd.f32 %v4054_v50, %v4011_v6  ;;  %v4071_v21 = vcombine.high %v4061_v22, %v4061_v22  ;;  %v4082_v52 = vadd.f32 %v4061_v22, %v4008_v13 }
 0x773   :  { %6030 = vpow2.f32 %v5086_v2  ;;  %v4083_v62 = vadd.f32 %v4069_v35, %v4009_v12  ;;  %v4086_v39 = vadd.f32 %v4068_v55, %v4012_v26  ;;  %v5090_v32 = vmul.f32 -1.442695, %v4081_v36 }
 0x774   :  { %6032 = vpow2.f32 %v5087_v24  ;;  %v4084_v49 = vadd.f32 %v4071_v21, %v4010_v57  ;;  %v5091_v41 = vmul.f32 -1.442695, %v4082_v52  ;;  %v5094_v27 = vmul.f32 -1.442695, %v4085_v4 }
 0x775   :  { %6034 = vpow2.f32 %v5088_v30  ;;  %v5092_v34 = vmul.f32 -1.442695, %v4083_v62  ;;  %v4013_v7 = vrot.slane %v8536_v61, 1  ;;  %v4070_v40 = vcombine.high %v4054_v50, %v4054_v50 }
 0x776   :  { %6036 = vpow2.f32 %v5089_v20  ;;  %v5093_v58 = vmul.f32 -1.442695, %v4084_v49  ;;  %v5095_v8 = vmul.f32 -1.442695, %v4086_v39  ;;  %v4014_v23 = vrot.slane %v8545_v1, 1 }
 0x777   :  { %6038 = vpow2.f32 %v5090_v32  ;;  %v4072_v10 = vcombine.high %v4068_v55, %v4068_v55  ;;  %v3882_v16 = vadd.f32 %v8494_v11, %v6827_v14  ;;  %v4087_v48 = vadd.f32 %v4070_v40, %v4013_v7 }
 0x778   :  { %6040 = vpow2.f32 %v5091_v41  ;;  %v4205_v7 = vrot.slane %v8513_v0, 2  ;;  %v4206_v40 = vrot.slane %v8518_v37, 2 }
 0x779   :  { %6042 = vpow2.f32 %v5092_v34  ;;  %v4088_v24 = vadd.f32 %v4072_v10, %v4014_v23  ;;  %v4138_v30 = vcombine.high %v3882_v16, %v3882_v16  ;;  %v4145_v11 = vrot.slane %v3882_v16, %v6750_v59 }
 0x77a   :  { %6044 = vpow2.f32 %v5093_v58  ;;  %v5096_v51 = vmul.f32 -1.442695, %v4087_v48  ;;  %v4203_v34 = vrot.slane %v8501_v43, 2 }
 0x77b   :  { %v6023_v44 = vpop.eup %6022  ;;  %6046 = vpow2.f32 %v5094_v27  ;;  %v5097_v63 = vmul.f32 -1.442695, %v4088_v24  ;;  %v4152_v50 = vrot.slane %v4138_v30, %v6750_v59  ;;  %v4153_v35 = vcombine.high %v4145_v11, %v4145_v11 }
 0x77c   :  { %v3975_v42 = vadd.f32 1.0, %v6023_v44  ;;  %v4161_v39 = vrot.slane %v4145_v11, %v6750_v59  ;;  %v4204_v27 = vrot.slane %v8506_v17, 2 }
 0x77d   :  { %v6025_v33 = vpop.eup %6024  ;;  %v4154_v62 = vcombine.high %v4152_v50, %v4152_v50  ;;  %v4175_v41 = vrot.slane %v4153_v35, %v6750_v59  ;;  %v4168_v23 = vrot.slane %v4152_v50, %v6750_v59 }
 0x77e   :  { %v6027_v53 = vpop.eup %6026  ;;  %v3976_v45 = vadd.f32 1.0, %v6025_v33  ;;  %6048 = vrcp.f32 %v3975_v42  ;;  %v4207_v33 = vrot.slane %v8524_v38, 2 }
 0x77f   :  { %v6029_v9 = vpop.eup %6028  ;;  %v3977_v47 = vadd.f32 1.0, %v6027_v53  ;;  %6050 = vpow2.f32 %v5095_v8  ;;  %v4182_v43 = vrot.slane %v4154_v62, %v6750_v59  ;;  %v4183_v53 = vcombine.high %v4161_v39, %v4161_v39 }
 0x780   :  { %v6031_v2 = vpop.eup %6030  ;;  %v3978_v13 = vadd.f32 1.0, %v6029_v9  ;;  %6052 = vrcp.f32 %v3976_v45  ;;  %v4185_v9 = vcombine.high %v4175_v41, %v4175_v41 }
 0x781   :  { %v6033_v12 = vpop.eup %6032  ;;  %v3979_v6 = vadd.f32 1.0, %v6031_v2  ;;  %6054 = vrcp.f32 %v3977_v47  ;;  %v4208_v2 = vrot.slane %v8529_v25, 2 }
 0x782   :  { %v6035_v57 = vpop.eup %6034  ;;  %v3980_v60 = vadd.f32 1.0, %v6033_v12  ;;  %6056 = vrcp.f32 %v3978_v13  ;;  %v4209_v13 = vrot.slane %v8536_v61, 2  ;;  %v4210_v12 = vrot.slane %v8545_v1, 2 }
 0x783   :  { %v6037_v20 = vpop.eup %6036  ;;  %v3981_v54 = vadd.f32 1.0, %v6035_v57  ;;  %6058 = vrcp.f32 %v3979_v6  ;;  %v4184_v57 = vcombine.high %v4168_v23, %v4168_v23 }
 0x784   :  { %v3982_v26 = vadd.f32 1.0, %v6037_v20  ;;  %6060 = vrcp.f32 %v3980_v60  ;;  %v6039_v22 = vpop.eup %6038 }
 0x785   :  { %6062 = vrcp.f32 %v3981_v54  ;;  %v6041_v36 = vpop.eup %6040  ;;  %v4113_v55 = vadd.f32 1.0, %v6039_v22  ;;  %v4186_v54 = vcombine.high %v4182_v43, %v4182_v43 }
 0x786   :  { %6064 = vrcp.f32 %v3982_v26  ;;  %v6043_v4 = vpop.eup %6042  ;;  %v4114_v21 = vadd.f32 1.0, %v6041_v36 }
 0x787   :  { %6066 = vpow2.f32 %v5096_v51  ;;  %v6045_v52 = vpop.eup %6044  ;;  %v4115_v32 = vadd.f32 1.0, %v6043_v4 }
 0x788   :  { %6068 = vpow2.f32 %v5097_v63  ;;  %v6047_v49 = vpop.eup %6046  ;;  %v4116_v58 = vadd.f32 1.0, %v6045_v52 }
 0x789   :  { %v4117_v8 = vadd.f32 1.0, %v6047_v49  ;;  %6070 = vrcp.f32 %v4113_v55 }
 0x78a   :  { %6072 = vrcp.f32 %v4114_v21 }
 0x78b   :  { %v6049_v44 = vpop.eup %6048  ;;  %6074 = vrcp.f32 %v4115_v32 }
 0x78c   :  { %v6051_v42 = vpop.eup %6050  ;;  %v4195_v10 = vmul.f32 %v6049_v44, %v4161_v39  ;;  %6076 = vrcp.f32 %v4116_v58 }
 0x78d   :  { %v6053_v16 = vpop.eup %6052  ;;  %v4118_v17 = vadd.f32 1.0, %v6051_v42  ;;  %6078 = vrcp.f32 %v4117_v8 }
 0x78e   :  { %v6055_v45 = vpop.eup %6054  ;;  %v4196_v0 = vmul.f32 %v6053_v16, %v4175_v41  ;;  %v4219_v47 = vadd.f32 %v4203_v34, %v4195_v10 }
 0x78f   :  { %v6057_v37 = vpop.eup %6056  ;;  %v4197_v48 = vmul.f32 %v6055_v45, %v4183_v53  ;;  %6080 = vrcp.f32 %v4118_v17 }
 0x790   :  { %v6059_v38 = vpop.eup %6058  ;;  %v4198_v24 = vmul.f32 %v6057_v37, %v4185_v9  ;;  %v4220_v6 = vadd.f32 %v4204_v27, %v4196_v0  ;;  %6082 = vtanh.f32 %v4219_v47 }
 0x791   :  { %v6061_v30 = vpop.eup %6060  ;;  %v4199_v60 = vmul.f32 %v6059_v38, %v4168_v23  ;;  %v4221_v11 = vadd.f32 %v4205_v7, %v4197_v48 }
 0x792   :  { %v6063_v20 = vpop.eup %6062  ;;  %v4200_v51 = vmul.f32 %v6061_v30, %v4182_v43  ;;  %v4222_v26 = vadd.f32 %v4206_v40, %v4198_v24  ;;  %6084 = vtanh.f32 %v4220_v6 }
 0x793   :  { %v6065_v25 = vpop.eup %6064  ;;  %v4201_v63 = vmul.f32 %v6063_v20, %v4184_v57  ;;  %v4223_v61 = vadd.f32 %v4207_v33, %v4199_v60  ;;  %6086 = vtanh.f32 %v4221_v11 }
 0x794   :  { %v6067_v50 = vpop.eup %6066  ;;  %v4202_v22 = vmul.f32 %v6065_v25, %v4186_v54  ;;  %v4224_v35 = vadd.f32 %v4208_v2, %v4200_v51  ;;  %6088 = vtanh.f32 %v4222_v26 }
 0x795   :  { %v6069_v1 = vpop.eup %6068  ;;  %v4225_v36 = vadd.f32 %v4209_v13, %v4201_v63  ;;  %6090 = vtanh.f32 %v4223_v61  ;;  %v4119_v55 = vadd.f32 1.0, %v6067_v50 }
 0x796   :  { %v4226_v4 = vadd.f32 %v4210_v12, %v4202_v22  ;;  %6092 = vtanh.f32 %v4224_v35  ;;  %v4120_v21 = vadd.f32 1.0, %v6069_v1  ;;  %v6071_v52 = vpop.eup %6070 }
 0x797   :  { %6094 = vtanh.f32 %v4225_v36  ;;  %v6073_v62 = vpop.eup %6072  ;;  %v4235_v42 = vsub.f32 1.0, %v6071_v52  ;;  %v4251_v38 = vmul.f32 %v6071_v52, %v8308_v56 }
 0x798   :  { %6096 = vtanh.f32 %v4226_v4  ;;  %v6075_v39 = vpop.eup %6074  ;;  %v4236_v58 = vsub.f32 1.0, %v6073_v62  ;;  %v4252_v9 = vmul.f32 %v6073_v62, %v8303_v5 }
 0x799   :  { %6098 = vrcp.f32 %v4119_v55  ;;  %v6077_v32 = vpop.eup %6076  ;;  %v4237_v7 = vsub.f32 1.0, %v6075_v39  ;;  %v4253_v48 = vmul.f32 %v6075_v39, %v8306_v15 }
 0x79a   :  { %6100 = vrcp.f32 %v4120_v21  ;;  %v6079_v49 = vpop.eup %6078  ;;  %v4238_v40 = vsub.f32 1.0, %v6077_v32  ;;  %v4254_v53 = vmul.f32 %v6077_v32, %v8300_v46 }
 0x79b   :  { %v4239_v47 = vsub.f32 1.0, %v6079_v49  ;;  %v4255_v15 = vmul.f32 %v6079_v49, %v8319_v29 }
 0x79c   :  { %v6081_v41 = vpop.eup %6080 }
 0x79d   :  { %v6083_v34 = vpop.eup %6082  ;;  %v4240_v33 = vsub.f32 1.0, %v6081_v41  ;;  %v4256_v46 = vmul.f32 %v6081_v41, %v8311_v3 }
 0x79e   :  { %v4243_v45 = vmul.f32 %v6083_v34, %v4235_v42  ;;  %v8644_v42 = vld [vmem:[%s8728_s0 + $0x4f] ss:$8 sm:$0x7] }
 0x79f   :  { %v6085_v27 = vpop.eup %6084 }
 0x7a0   :  { %v6087_v44 = vpop.eup %6086  ;;  %v4244_v23 = vmul.f32 %v6085_v27, %v4236_v58  ;;  %v8593_v60 = vadd.f32 %v4251_v38, %v4243_v45  ;;  %v8627_v58 = vld [vmem:[%s8728_s0 + $0x7] ss:$8 sm:$0x7] }
 0x7a1   :  { %v6089_v8 = vpop.eup %6088  ;;  %v4245_v16 = vmul.f32 %v6087_v44, %v4237_v7  ;;  %v8632_v44 = vld [vmem:[%s8728_s0 + $0x1f] ss:$8 sm:$0x7] }
 0x7a2   :  { %v6091_v10 = vpop.eup %6090  ;;  %v4246_v43 = vmul.f32 %v6089_v8, %v4238_v40  ;;  %v8588_v24 = vadd.f32 %v4252_v9, %v4244_v23  ;;  %v8639_v8 = vld [vmem:[%s8728_s0 + $0x37] ss:$8 sm:$0x7]  ;;  %v4604_v9 = vrot.slane %v8627_v58, 1 }
 0x7a3   :  { %v6093_v17 = vpop.eup %6092  ;;  %v4247_v6 = vmul.f32 %v6091_v10, %v4239_v47  ;;  %v8591_v30 = vadd.f32 %v4253_v48, %v4245_v16  ;;  %v8650_v10 = vld [vmem:[%s8728_s0 + $0x67] ss:$8 sm:$0x7] }
 0x7a4   :  { %v6095_v0 = vpop.eup %6094  ;;  %v4248_v37 = vmul.f32 %v6093_v17, %v4240_v33  ;;  %v8585_v2 = vadd.f32 %v4254_v53, %v4246_v43  ;;  %v4291_v51 = vcombine.low %v8593_v60, %v8588_v24  ;;  %v8655_v33 = vld [vmem:[%s8728_s0 + $0x7f] ss:$8 sm:$0x7] }
 0x7a5   :  { %v6097_v13 = vpop.eup %6096  ;;  %v8604_v63 = vadd.f32 %v4255_v15, %v4247_v6 }
 0x7a6   :  { %v6099_v12 = vpop.eup %6098  ;;  %v8596_v20 = vadd.f32 %v4256_v46, %v4248_v37  ;;  %v4292_v56 = vcombine.low %v8591_v30, %v8585_v2  ;;  %v4301_v1 = vrot.slane %v4291_v51, %v6750_v59 }
 0x7a7   :  { %v6101_v57 = vpop.eup %6100  ;;  %v4241_v5 = vsub.f32 1.0, %v6099_v12  ;;  %v4257_v3 = vmul.f32 %v6099_v12, %v8321_v18 }
 0x7a8   :  { %v4242_v11 = vsub.f32 1.0, %v6101_v57  ;;  %v4258_v25 = vmul.f32 %v6101_v57, %v8323_v31  ;;  %v4293_v29 = vcombine.low %v8604_v63, %v8596_v20  ;;  %v4308_v22 = vrot.slane %v4292_v56, %v6750_v59 }
 0x7a9   :  { %v4249_v54 = vmul.f32 %v6095_v0, %v4241_v5 }
 0x7aa   :  { %v4250_v26 = vmul.f32 %v6097_v13, %v4242_v11  ;;  %v4315_v18 = vrot.slane %v4293_v29, %v6750_v59  ;;  %v4323_v36 = vcombine.low %v4301_v1, %v4308_v22  ;;  %v8671_v13 = vld [vmem:[%s8728_s0 + $0xaf] ss:$8 sm:$0x7]  ;;  %v4605_v29 = vrot.slane %v8632_v44, 1 }
 0x7ab   :  { %v8606_v61 = vadd.f32 %v4257_v3, %v4249_v54  ;;  %v4608_v1 = vrot.slane %v8650_v10, 1 }
 0x7ac   :  { %v8608_v50 = vadd.f32 %v4258_v25, %v4250_v26  ;;  %v4331_v4 = vrot.slane %v4323_v36, %v6750_v59 }
 0x7ae   :  { %v4294_v35 = vcombine.low %v8606_v61, %v8608_v50 }
 0x7b0   :  { %v4322_v31 = vrot.slane %v4294_v35, %v6750_v59  ;;  %v4606_v35 = vrot.slane %v8639_v8, 1 }
 0x7b2   :  { %v4324_v55 = vcombine.low %v4315_v18, %v4322_v31  ;;  %v4607_v31 = vrot.slane %v8644_v42, 1 }
 0x7b4   :  { %v4338_v21 = vrot.slane %v4324_v55, %v6750_v59 }
 0x7b6   :  { %v4339_v52 = vcombine.low %v4331_v4, %v4338_v21 }
 0x7b8   :  { %4406 = vmatmul.mubr.f32.vlgmr.msra.gmra.mxu0 %v4339_v52  ;;  %5536 = vmatmul.mubr.f32.vlgmr.msra.gmra.mxu1 %v4339_v52  ;;  %v4609_v52 = vrot.slane %v8655_v33, 1 }
 0x878   :  { %v4407_v62 = vpop.f32.mrf.mxu0  ;;  %v8620_v39 = vpop.f32.mrf.mxu1 }
 0x879   :  { %v4408_v32 = vadd.f32 %v4407_v62, %v9014_v19 }
 0x87a   :  { %v5537_v49 = vpop.f32.mrf.mxu1  ;;  %v4409_v27 = vpop.f32.mrf.mxu0 }
 0x87b   :  { %v4483_v41 = vcombine.high %v4408_v32, %v4408_v32  ;;  %v4490_v34 = vrot.slane %v4408_v32, %v6750_v59  ;;  %v4410_v23 = vadd.f32 %v4409_v27, %v9015_v28  ;;  %v8662_v28 = vld [vmem:[%s8728_s0 + $0x97] ss:$8 sm:$0x7] }
 0x87d   :  { %v4497_v7 = vrot.slane %v4483_v41, %v6750_v59  ;;  %v4498_v40 = vcombine.high %v4490_v34, %v4490_v34  ;;  %v4506_v19 = vrot.slane %v4490_v34, %v6750_v59  ;;  %v4621_v46 = vcombine.high %v4410_v23, %v4410_v23 }
 0x87e   :  { %v4628_v51 = vrot.slane %v4410_v23, %v6750_v59 }
 0x87f   :  { %v4499_v16 = vcombine.high %v4497_v7, %v4497_v7  ;;  %v4513_v43 = vrot.slane %v4497_v7, %v6750_v59  ;;  %v4520_v53 = vrot.slane %v4498_v40, %v6750_v59  ;;  %v4528_v17 = vcombine.high %v4506_v19, %v4506_v19 }
 0x880   :  { %v4540_v45 = vadd.f32 %v8627_v58, %v4506_v19  ;;  %v4635_v36 = vrot.slane %v4621_v46, %v6750_v59  ;;  %v4636_v4 = vcombine.high %v4628_v51, %v4628_v51  ;;  %v4644_v21 = vrot.slane %v4628_v51, %v6750_v59 }
 0x881   :  { %v4527_v0 = vrot.slane %v4499_v16, %v6750_v59  ;;  %v4529_v47 = vcombine.high %v4513_v43, %v4513_v43  ;;  %v4530_v37 = vcombine.high %v4520_v53, %v4520_v53  ;;  %v4541_v48 = vadd.f32 %v8632_v44, %v4520_v53 }
 0x882   :  { %v4542_v38 = vadd.f32 %v8639_v8, %v4528_v17  ;;  %v4544_v12 = vadd.f32 %v8650_v10, %v4513_v43  ;;  %v5106_v6 = vmul.f32 -1.442695, %v4540_v45  ;;  %v4637_v62 = vcombine.high %v4635_v36, %v4635_v36 }
 0x883   :  { %v4531_v57 = vcombine.high %v4527_v0, %v4527_v0  ;;  %v4543_v5 = vadd.f32 %v8644_v42, %v4530_v37  ;;  %v4545_v11 = vadd.f32 %v8655_v33, %v4527_v0  ;;  %v4546_v15 = vadd.f32 %v8662_v28, %v4529_v47 }
 0x884   :  { %6102 = vpow2.f32 %v5106_v6  ;;  %v5107_v56 = vmul.f32 -1.442695, %v4541_v48  ;;  %v5108_v54 = vmul.f32 -1.442695, %v4542_v38  ;;  %v5110_v25 = vmul.f32 -1.442695, %v4544_v12 }
 0x885   :  { %v4547_v26 = vadd.f32 %v8671_v13, %v4531_v57  ;;  %v5109_v3 = vmul.f32 -1.442695, %v4543_v5  ;;  %v5111_v22 = vmul.f32 -1.442695, %v4545_v11  ;;  %v5112_v18 = vmul.f32 -1.442695, %v4546_v15 }
 0x886   :  { %6104 = vpow2.f32 %v5107_v56  ;;  %v4651_v32 = vrot.slane %v4635_v36, %v6750_v59  ;;  %v4658_v49 = vrot.slane %v4636_v4, %v6750_v59  ;;  %v4666_v41 = vcombine.high %v4644_v21, %v4644_v21 }
 0x887   :  { %6106 = vpow2.f32 %v5108_v54  ;;  %v5113_v55 = vmul.f32 -1.442695, %v4547_v26  ;;  %v4678_v34 = vadd.f32 %v4644_v21, %v4604_v9  ;;  %v4665_v27 = vrot.slane %v4637_v62, %v6750_v59 }
 0x888   :  { %6108 = vpow2.f32 %v5109_v3  ;;  %v4682_v7 = vadd.f32 %v4651_v32, %v4608_v1  ;;  %v4668_v40 = vcombine.high %v4658_v49, %v4658_v49  ;;  %v4679_v19 = vadd.f32 %v4658_v49, %v4605_v29 }
 0x889   :  { %6110 = vpow2.f32 %v5110_v25  ;;  %v4680_v23 = vadd.f32 %v4666_v41, %v4606_v35  ;;  %v4683_v16 = vadd.f32 %v4665_v27, %v4609_v52  ;;  %v5114_v43 = vmul.f32 -1.442695, %v4678_v34 }
 0x88a   :  { %6112 = vpow2.f32 %v5111_v22  ;;  %v4681_v53 = vadd.f32 %v4668_v40, %v4607_v31  ;;  %v5115_v17 = vmul.f32 -1.442695, %v4679_v19  ;;  %v5118_v0 = vmul.f32 -1.442695, %v4682_v7 }
 0x88b   :  { %6114 = vpow2.f32 %v5112_v18  ;;  %v5116_v45 = vmul.f32 -1.442695, %v4680_v23  ;;  %v4610_v9 = vrot.slane %v8662_v28, 1  ;;  %v4667_v48 = vcombine.high %v4651_v32, %v4651_v32 }
 0x88c   :  { %6116 = vpow2.f32 %v5113_v55  ;;  %v5117_v47 = vmul.f32 -1.442695, %v4681_v53  ;;  %v5119_v38 = vmul.f32 -1.442695, %v4683_v16  ;;  %v4611_v6 = vrot.slane %v8671_v13, 1 }
 0x88d   :  { %6118 = vpow2.f32 %v5114_v43  ;;  %v4669_v46 = vcombine.high %v4665_v27, %v4665_v27  ;;  %v4479_v5 = vadd.f32 %v8620_v39, %v6827_v14  ;;  %v4684_v51 = vadd.f32 %v4667_v48, %v4610_v9 }
 0x88e   :  { %6120 = vpow2.f32 %v5115_v17  ;;  %v4800_v43 = vrot.slane %v8627_v58, 2  ;;  %v4801_v53 = vrot.slane %v8632_v44, 2 }
 0x88f   :  { %6122 = vpow2.f32 %v5116_v45  ;;  %v4685_v25 = vadd.f32 %v4669_v46, %v4611_v6  ;;  %v4735_v35 = vcombine.high %v4479_v5, %v4479_v5  ;;  %v4742_v14 = vrot.slane %v4479_v5, %v6750_v59 }
 0x890   :  { %6124 = vpow2.f32 %v5117_v47  ;;  %v5120_v36 = vmul.f32 -1.442695, %v4684_v51  ;;  %v4803_v47 = vrot.slane %v8644_v42, 2 }
 0x891   :  { %v6103_v37 = vpop.eup %6102  ;;  %6126 = vpow2.f32 %v5118_v0  ;;  %v5121_v4 = vmul.f32 -1.442695, %v4685_v25  ;;  %v4749_v21 = vrot.slane %v4735_v35, %v6750_v59  ;;  %v4750_v62 = vcombine.high %v4742_v14, %v4742_v14 }
 0x892   :  { %v4572_v12 = vadd.f32 1.0, %v6103_v37  ;;  %v4758_v40 = vrot.slane %v4742_v14, %v6750_v59  ;;  %v4802_v0 = vrot.slane %v8639_v8, 2 }
 0x893   :  { %v6105_v57 = vpop.eup %6104  ;;  %v4751_v7 = vcombine.high %v4749_v21, %v4749_v21  ;;  %v4772_v16 = vrot.slane %v4750_v62, %v6750_v59  ;;  %v4765_v48 = vrot.slane %v4749_v21, %v6750_v59 }
 0x894   :  { %v6107_v11 = vpop.eup %6106  ;;  %v4573_v15 = vadd.f32 1.0, %v6105_v57  ;;  %6128 = vrcp.f32 %v4572_v12  ;;  %v4804_v12 = vrot.slane %v8650_v10, 2  ;;  %v4780_v46 = vcombine.high %v4758_v40, %v4758_v40 }
 0x895   :  { %v6109_v56 = vpop.eup %6108  ;;  %v4574_v54 = vadd.f32 1.0, %v6107_v11  ;;  %6130 = vpow2.f32 %v5119_v38  ;;  %v4779_v58 = vrot.slane %v4751_v7, %v6750_v59  ;;  %v4782_v5 = vcombine.high %v4772_v16, %v4772_v16 }
 0x896   :  { %v6111_v26 = vpop.eup %6110  ;;  %v4575_v3 = vadd.f32 1.0, %v6109_v56  ;;  %6132 = vrcp.f32 %v4573_v15  ;;  %v4805_v56 = vrot.slane %v8655_v33, 2 }
 0x897   :  { %v6113_v29 = vpop.eup %6112  ;;  %v4576_v22 = vadd.f32 1.0, %v6111_v26  ;;  %6134 = vrcp.f32 %v4574_v54  ;;  %v4806_v54 = vrot.slane %v8662_v28, 2  ;;  %v4807_v26 = vrot.slane %v8671_v13, 2 }
 0x898   :  { %v6115_v1 = vpop.eup %6114  ;;  %v4577_v18 = vadd.f32 1.0, %v6113_v29  ;;  %6136 = vrcp.f32 %v4575_v3  ;;  %v4781_v29 = vcombine.high %v4765_v48, %v4765_v48 }
 0x899   :  { %v6117_v39 = vpop.eup %6116  ;;  %v4578_v31 = vadd.f32 1.0, %v6115_v1  ;;  %6138 = vrcp.f32 %v4576_v22 }
 0x89a   :  { %v4579_v55 = vadd.f32 1.0, %v6117_v39  ;;  %6140 = vrcp.f32 %v4577_v18  ;;  %v6119_v52 = vpop.eup %6118  ;;  %v4783_v18 = vcombine.high %v4779_v58, %v4779_v58 }
 0x89b   :  { %6142 = vrcp.f32 %v4578_v31  ;;  %v6121_v32 = vpop.eup %6120  ;;  %v4710_v49 = vadd.f32 1.0, %v6119_v52 }
 0x89c   :  { %6144 = vrcp.f32 %v4579_v55  ;;  %v6123_v41 = vpop.eup %6122  ;;  %v4711_v34 = vadd.f32 1.0, %v6121_v32 }
 0x89d   :  { %6146 = vpow2.f32 %v5120_v36  ;;  %v6125_v27 = vpop.eup %6124  ;;  %v4712_v19 = vadd.f32 1.0, %v6123_v41 }
 0x89e   :  { %6148 = vpow2.f32 %v5121_v4  ;;  %v6127_v23 = vpop.eup %6126  ;;  %v4713_v17 = vadd.f32 1.0, %v6125_v27 }
 0x89f   :  { %v4714_v37 = vadd.f32 1.0, %v6127_v23  ;;  %6150 = vrcp.f32 %v4710_v49 }
 0x8a0   :  { %6152 = vrcp.f32 %v4711_v34 }
 0x8a1   :  { %v6129_v45 = vpop.eup %6128  ;;  %6154 = vrcp.f32 %v4712_v19 }
 0x8a2   :  { %v6131_v9 = vpop.eup %6130  ;;  %v4792_v38 = vmul.f32 %v6129_v45, %v4758_v40  ;;  %6156 = vrcp.f32 %v4713_v17 }
 0x8a3   :  { %v6133_v6 = vpop.eup %6132  ;;  %v4715_v44 = vadd.f32 1.0, %v6131_v9  ;;  %6158 = vrcp.f32 %v4714_v37 }
 0x8a4   :  { %v6135_v57 = vpop.eup %6134  ;;  %v4793_v8 = vmul.f32 %v6133_v6, %v4772_v16  ;;  %v4816_v11 = vadd.f32 %v4800_v43, %v4792_v38 }
 0x8a5   :  { %v6137_v42 = vpop.eup %6136  ;;  %v4794_v15 = vmul.f32 %v6135_v57, %v4780_v46  ;;  %6160 = vrcp.f32 %v4715_v44 }
 0x8a6   :  { %v6139_v10 = vpop.eup %6138  ;;  %v4795_v51 = vmul.f32 %v6137_v42, %v4782_v5  ;;  %v4817_v3 = vadd.f32 %v4801_v53, %v4793_v8  ;;  %6162 = vtanh.f32 %v4816_v11 }
 0x8a7   :  { %v6141_v25 = vpop.eup %6140  ;;  %v4796_v22 = vmul.f32 %v6139_v10, %v4765_v48  ;;  %v4818_v35 = vadd.f32 %v4802_v0, %v4794_v15 }
 0x8a8   :  { %v6143_v1 = vpop.eup %6142  ;;  %v4797_v14 = vmul.f32 %v6141_v25, %v4779_v58  ;;  %v4819_v39 = vadd.f32 %v4803_v47, %v4795_v51  ;;  %6164 = vtanh.f32 %v4817_v3 }
 0x8a9   :  { %v6145_v33 = vpop.eup %6144  ;;  %v4798_v31 = vmul.f32 %v6143_v1, %v4781_v29  ;;  %v4820_v28 = vadd.f32 %v4804_v12, %v4796_v22  ;;  %6166 = vtanh.f32 %v4818_v35 }
 0x8aa   :  { %v6147_v36 = vpop.eup %6146  ;;  %v4799_v55 = vmul.f32 %v6145_v33, %v4783_v18  ;;  %v4821_v4 = vadd.f32 %v4805_v56, %v4797_v14  ;;  %6168 = vtanh.f32 %v4819_v39 }
 0x8ab   :  { %v6149_v13 = vpop.eup %6148  ;;  %v4822_v21 = vadd.f32 %v4806_v54, %v4798_v31  ;;  %6170 = vtanh.f32 %v4820_v28  ;;  %v4716_v52 = vadd.f32 1.0, %v6147_v36 }
 0x8ac   :  { %v4823_v62 = vadd.f32 %v4807_v26, %v4799_v55  ;;  %6172 = vtanh.f32 %v4821_v4  ;;  %v4717_v32 = vadd.f32 1.0, %v6149_v13  ;;  %v6151_v49 = vpop.eup %6150 }
 0x8ad   :  { %6174 = vtanh.f32 %v4822_v21  ;;  %v6153_v41 = vpop.eup %6152  ;;  %v4832_v0 = vsub.f32 1.0, %v6151_v49  ;;  %v4848_v15 = vmul.f32 %v6151_v49, %v8593_v60 }
 0x8ae   :  { %6176 = vtanh.f32 %v4823_v62  ;;  %v6155_v34 = vpop.eup %6154  ;;  %v4833_v16 = vsub.f32 1.0, %v6153_v41  ;;  %v4849_v46 = vmul.f32 %v6153_v41, %v8588_v24 }
 0x8af   :  { %6178 = vrcp.f32 %v4716_v52  ;;  %v6157_v27 = vpop.eup %6156  ;;  %v4834_v53 = vsub.f32 1.0, %v6155_v34  ;;  %v4850_v8 = vmul.f32 %v6155_v34, %v8591_v30 }
 0x8b0   :  { %6180 = vrcp.f32 %v4717_v32  ;;  %v6159_v7 = vpop.eup %6158  ;;  %v4835_v17 = vsub.f32 1.0, %v6157_v27  ;;  %v4851_v12 = vmul.f32 %v6157_v27, %v8585_v2 }
 0x8b1   :  { %v4836_v57 = vsub.f32 1.0, %v6159_v7  ;;  %v4852_v24 = vmul.f32 %v6159_v7, %v8604_v63 }
 0x8b2   :  { %v6161_v40 = vpop.eup %6160 }
 0x8b3   :  { %v6163_v19 = vpop.eup %6162  ;;  %v4837_v9 = vsub.f32 1.0, %v6161_v40  ;;  %v4853_v51 = vmul.f32 %v6161_v40, %v8596_v20 }
 0x8b4   :  { %v4840_v58 = vmul.f32 %v6163_v19, %v4832_v0 }
 0x8b5   :  { %v6165_v23 = vpop.eup %6164 }
 0x8b6   :  { %v6167_v43 = vpop.eup %6166  ;;  %v4841_v47 = vmul.f32 %v6165_v23, %v4833_v16  ;;  %v4856_v25 = vadd.f32 %v4848_v15, %v4840_v58 }
 0x8b7   :  { %v6169_v45 = vpop.eup %6168  ;;  %v4842_v48 = vmul.f32 %v6167_v43, %v4834_v53 }
 0x8b8   :  { %v6171_v37 = vpop.eup %6170  ;;  %v4843_v38 = vmul.f32 %v6169_v45, %v4835_v17  ;;  %v4857_v56 = vadd.f32 %v4849_v46, %v4841_v47 }
 0x8b9   :  { %v6173_v6 = vpop.eup %6172  ;;  %v4844_v10 = vmul.f32 %v6171_v37, %v4836_v57  ;;  %v4858_v26 = vadd.f32 %v4850_v8, %v4842_v48 }
 0x8ba   :  { %v6175_v44 = vpop.eup %6174  ;;  %v4845_v5 = vmul.f32 %v6173_v6, %v4837_v9  ;;  %v4859_v11 = vadd.f32 %v4851_v12, %v4843_v38  ;;  %v4872_v30 = vcombine.low %v4856_v25, %v4857_v56 }
 0x8bb   :  { %v6177_v42 = vpop.eup %6176  ;;  %v4860_v39 = vadd.f32 %v4852_v24, %v4844_v10 }
 0x8bc   :  { %v6179_v54 = vpop.eup %6178  ;;  %v4861_v22 = vadd.f32 %v4853_v51, %v4845_v5  ;;  %v4873_v35 = vcombine.low %v4858_v26, %v4859_v11  ;;  %v4882_v55 = vrot.slane %v4872_v30, %v6750_v59 }
 0x8bd   :  { %v6181_v2 = vpop.eup %6180  ;;  %v4838_v3 = vsub.f32 1.0, %v6179_v54  ;;  %v4854_v14 = vmul.f32 %v6179_v54, %v8606_v61 }
 0x8be   :  { %v4839_v29 = vsub.f32 1.0, %v6181_v2  ;;  %v4855_v60 = vmul.f32 %v6181_v2, %v8608_v50  ;;  %v4874_v20 = vcombine.low %v4860_v39, %v4861_v22  ;;  %v4889_v28 = vrot.slane %v4873_v35, %v6750_v59 }
 0x8bf   :  { %v4846_v1 = vmul.f32 %v6175_v44, %v4838_v3 }
 0x8c0   :  { %v4847_v18 = vmul.f32 %v6177_v42, %v4839_v29  ;;  %v4896_v63 = vrot.slane %v4874_v20, %v6750_v59  ;;  %v4904_v13 = vcombine.low %v4882_v55, %v4889_v28 }
 0x8c1   :  { %v4862_v33 = vadd.f32 %v4854_v14, %v4846_v1 }
 0x8c2   :  { %v4863_v31 = vadd.f32 %v4855_v60, %v4847_v18  ;;  %v4912_v52 = vrot.slane %v4904_v13, %v6750_v59 }
 0x8c4   :  { %v4875_v36 = vcombine.low %v4862_v33, %v4863_v31 }
 0x8c6   :  { %v4903_v4 = vrot.slane %v4875_v36, %v6750_v59 }
 0x8c8   :  { %v4905_v21 = vcombine.low %v4896_v63, %v4903_v4 }
 0x8ca   :  { %v4919_v61 = vrot.slane %v4905_v21, %v6750_v59 }
 0x8cc   :  { %v4920_v50 = vcombine.low %v4912_v52, %v4919_v61 }
 0x8ce   :  { %4926 = vst [vmem:[%s8729_s4] sm:$0xff] %v4920_v50 }

</bundles_post_ra>
